<compile_context>
chip_gen: v5e
topology: v5e:2x2
jax: 0.10.0
libtpu: 0.0.40
codegen_flags: <defaults>
</compile_context>

<pallas_src>
import functools

import jax
import jax.numpy as jnp
from jax.experimental import pallas as pl
from jax.experimental.pallas import tpu as pltpu

HEAD_WIDTH = 128  # lane-dense output width: [logits | value | zero pad]


def _layernorm(x, gamma=None, beta=None, eps=1e-5):
    # var = E[x^2] - mu^2: both cross-lane reductions depend only on x, so they
    # can issue back-to-back on the XLU instead of reduce -> VPU -> reduce.
    mu = jnp.mean(x, axis=-1, keepdims=True)
    var = jnp.mean(x * x, axis=-1, keepdims=True) - mu * mu
    y = (x - mu) * jax.lax.rsqrt(var + eps)
    if gamma is None:          # affine folded elsewhere (last layer -> head)
        return y
    return y * gamma + beta


def policy_kernel(num_layers, num_actions,
                  env_ref, tht_ref, ws_ref, wt_ref, lw_ref, lv_ref,
                  hw_ref, mb_ref, out_ref):
    f32, bf16 = jnp.float32, jnp.bfloat16
    d = ws_ref.shape[1]

    biases = mb_ref[...]                          # (2, 128) f32
    enc_b = biases[0:1, :d]
    head_b = biases[1:2, :]                       # (1, 128), zero-padded

    # --- input encoders: two small dots, no wrapper-side concat ---
    h = (jnp.dot(env_ref[...].astype(bf16), ws_ref[...],
                 preferred_element_type=f32)
         + jnp.dot(tht_ref[...].astype(bf16), wt_ref[...],
                   preferred_element_type=f32)
         + enc_b)

    # --- transformer encoder layers (post-norm, ReLU FFN, seq_len == 1) ---
    for l in range(num_layers):
        vec = lv_ref[l]                           # (8, d) f32 per-layer vectors
        b_attn, g1, be1 = vec[0:1], vec[1:2], vec[2:3]
        b1, b2, g2, be2 = vec[3:4], vec[4:5], vec[5:6], vec[6:7]

        # attention == out_proj(V_proj(x)); the two projections are pre-fused.
        attn = jnp.dot(h.astype(bf16), lw_ref[3 * l],
                       preferred_element_type=f32) + b_attn
        h = _layernorm(h + attn, g1, be1)

        ffh = jnp.maximum(
            jnp.dot(h.astype(bf16), lw_ref[3 * l + 1],
                    preferred_element_type=f32) + b1, 0.0)
        ff = jnp.dot(ffh.astype(bf16), lw_ref[3 * l + 2],
                     preferred_element_type=f32) + b2
        if l == num_layers - 1:
            h = _layernorm(h + ff)                # affine folded into head
        else:
            h = _layernorm(h + ff, g2, be2)

    # --- fused actor|critic head (lane-dense 128 cols) ---
    heads = jnp.dot(h.astype(bf16), hw_ref[...],
                    preferred_element_type=f32) + head_b

    col = jax.lax.broadcasted_iota(jnp.int32, heads.shape, 1)
    is_action = col < num_actions
    logits = jnp.where(is_action, heads, -1e30)
    m = jnp.max(logits, axis=-1, keepdims=True)
    e = jnp.where(is_action, jnp.exp(logits - m), 0.0)
    inv = pl.reciprocal(jnp.sum(e, axis=-1, keepdims=True), approx=True)
    out_ref[...] = jnp.where(is_action, e * inv, heads)


def fuse_params(p):
    """Pack raw (PyTorch-layout, transposed) params into kernel operands."""
    f32, bf16 = jnp.float32, jnp.bfloat16
    d = p["ws"].shape[1]
    L = p["wv"].shape[0]
    num_actions = p["wa"].shape[1]
    na1 = num_actions + 1
    assert d <= HEAD_WIDTH and na1 <= HEAD_WIDTH

    # input encoders: biases pre-added, weights stay separate (no concat needed)
    enc_b = (p["bs"] + p["bt"]).astype(f32)                      # (1, d)

    # fuse V-projection and out-projection (linear composition, exact)
    wv_f = jnp.einsum("lij,ljk->lik", p["wv"], p["wo"])          # (L, d, d)
    b_attn = jnp.einsum("lij,ljk->lik", p["bv"], p["wo"]) + p["bo"]  # (L,1,d)

    # per-layer weight pack: [attn_fused, w1, w2] -> (3L, d, d)
    layer_w = jnp.stack([wv_f, p["w1"], p["w2"]], axis=1).reshape(3 * L, d, d)

    # per-layer vector pack: (L, 8, d)
    layer_vec = jnp.concatenate(
        [b_attn, p["g1"], p["be1"], p["b1"], p["b2"], p["g2"], p["be2"],
         jnp.zeros((L, 1, d), f32)], axis=1)

    # fused actor|critic head with the last layer's LayerNorm affine folded in:
    #   (y*g2 + be2) @ W + b  ==  y @ (g2^T * W) + (be2 @ W + b)
    head_w_raw = jnp.concatenate([p["wa"], p["wc"]], axis=1)     # (d, na1)
    head_b_raw = jnp.concatenate([p["ba"], p["bc"]], axis=1)     # (1, na1)
    g2_last = p["g2"][L - 1]                                     # (1, d)
    be2_last = p["be2"][L - 1]                                   # (1, d)
    head_b_f = be2_last @ head_w_raw + head_b_raw                # (1, na1)
    head_w_f = g2_last.reshape(d, 1) * head_w_raw                # (d, na1)

    # lane-dense pad to 128 output columns (zero pad columns -> zero outputs)
    head_w_pad = jnp.pad(head_w_f, ((0, 0), (0, HEAD_WIDTH - na1)))
    head_b_pad = jnp.pad(head_b_f, ((0, 0), (0, HEAD_WIDTH - na1)))

    misc_b = jnp.concatenate(
        [jnp.pad(enc_b, ((0, 0), (0, HEAD_WIDTH - d))), head_b_pad], axis=0)

    return {
        "ws": p["ws"].astype(bf16),
        "wt": p["wt"].astype(bf16),
        "layer_w": layer_w.astype(bf16),
        "layer_vec": layer_vec.astype(f32),
        "head_w": head_w_pad.astype(bf16),
        "misc_b": misc_b.astype(f32),
        "num_layers": L,
        "num_actions": num_actions,
        "d": d,
    }


def policy_forward(env_state, thought_vector, fused, block_b=128):
    B, sd = env_state.shape
    td = thought_vector.shape[1]
    num_actions = fused["num_actions"]
    num_layers = fused["num_layers"]

    # pad batch up to a multiple of the (16-aligned, MXU-filling) batch block
    b_pad = block_b * pl.cdiv(B, block_b)
    if b_pad != B:
        env_state = jnp.pad(env_state, ((0, b_pad - B), (0, 0)))
        thought_vector = jnp.pad(thought_vector, ((0, b_pad - B), (0, 0)))

    ws, wt = fused["ws"], fused["wt"]
    lw, lv = fused["layer_w"], fused["layer_vec"]
    hw, mb = fused["head_w"], fused["misc_b"]

    const2 = lambda i: (0, 0)            # weights: VMEM-resident across steps
    const3 = lambda i: (0, 0, 0)

    kernel = functools.partial(policy_kernel, num_layers, num_actions)

    out = pl.pallas_call(
        kernel,
        grid=(b_pad // block_b,),
        out_shape=jax.ShapeDtypeStruct((b_pad, HEAD_WIDTH), jnp.float32),
        in_specs=[
            pl.BlockSpec((block_b, sd), lambda i: (i, 0)),   # env: streamed
            pl.BlockSpec((block_b, td), lambda i: (i, 0)),   # thought: streamed
            pl.BlockSpec(ws.shape, const2),                  # resident weights
            pl.BlockSpec(wt.shape, const2),
            pl.BlockSpec(lw.shape, const3),
            pl.BlockSpec(lv.shape, const3),
            pl.BlockSpec(hw.shape, const2),
            pl.BlockSpec(mb.shape, const2),
        ],
        out_specs=pl.BlockSpec((block_b, HEAD_WIDTH), lambda i: (i, 0)),
        compiler_params=pltpu.CompilerParams(
            dimension_semantics=("parallel",)),
    )(env_state, thought_vector, ws, wt, lw, lv, hw, mb)

    return out[:B, :num_actions], out[:B, num_actions:num_actions + 1]


def init_params(key, state_dim, thought_dim, d, num_layers, num_actions):
    """Deterministic synthetic parameter init (Linear weights stored (in, out))."""
    keys = iter(jax.random.split(key, 64))

    def w(shape, scale=0.1):
        return jax.random.normal(next(keys), shape, jnp.float32) * scale

    return {
        "ws": w((state_dim, d)),   "bs": w((1, d)),
        "wt": w((thought_dim, d)), "bt": w((1, d)),
        "wv": w((num_layers, d, d)), "bv": w((num_layers, 1, d)),
        "wo": w((num_layers, d, d)), "bo": w((num_layers, 1, d)),
        "g1": 1.0 + w((num_layers, 1, d), 0.05), "be1": w((num_layers, 1, d), 0.05),
        "w1": w((num_layers, d, d)), "b1": w((num_layers, 1, d)),
        "w2": w((num_layers, d, d)), "b2": w((num_layers, 1, d)),
        "g2": 1.0 + w((num_layers, 1, d), 0.05), "be2": w((num_layers, 1, d), 0.05),
        "wa": w((d, num_actions)), "ba": w((1, num_actions)),
        "wc": w((d, 1)),           "bc": w((1, 1)),
    }


def _ref_layernorm(x, gamma, beta, eps=1e-5):
    mu = jnp.mean(x, axis=-1, keepdims=True)
    var = jnp.mean((x - mu) ** 2, axis=-1, keepdims=True)
    return (x - mu) * jax.lax.rsqrt(var + eps) * gamma + beta


def ref_forward(env, tht, p):
    """Pure-JAX f32 reference with the UNFUSED math (validates all fusions)."""
    h = env @ p["ws"] + p["bs"] + tht @ p["wt"] + p["bt"]
    L = p["wv"].shape[0]
    for l in range(L):
        attn = (h @ p["wv"][l] + p["bv"][l]) @ p["wo"][l] + p["bo"][l]
        h = _ref_layernorm(h + attn, p["g1"][l], p["be1"][l])
        ff = jnp.maximum(h @ p["w1"][l] + p["b1"][l], 0.0) @ p["w2"][l] + p["b2"][l]
        h = _ref_layernorm(h + ff, p["g2"][l], p["be2"][l])
    probs = jax.nn.softmax(h @ p["wa"] + p["ba"], axis=-1)
    value = h @ p["wc"] + p["bc"]
    return probs, value


if __name__ == "__main__":
    # Small shapes consistent with the module's forward.
    state_dim = 12
    thought_vector_dim = 20
    dim_feedforward = 32      # == d_model
    nhead = 4                 # seq_len==1 -> attention reduces to out_proj(V)
    num_encoder_layers = 2
    num_actions = 6
    batch = 8

    key = jax.random.PRNGKey(0)
    kp, kx, kt = jax.random.split(key, 3)
    raw = init_params(kp, state_dim, thought_vector_dim, dim_feedforward,
                      num_encoder_layers, num_actions)
    fused = fuse_params(raw)

    env_state = jax.random.normal(kx, (batch, state_dim), jnp.float32)
    thought_vector = jax.random.normal(kt, (batch, thought_vector_dim), jnp.float32)

    probs, value = policy_forward(env_state, thought_vector, fused)
    jax.block_until_ready((probs, value))

    # Sanity checks against the unfused pure-f32 reference (bf16 matmul path and
    # approx reciprocal introduce small, bounded error).
    ref_probs, ref_value = ref_forward(env_state, thought_vector, raw)
    assert probs.shape == (batch, num_actions) and value.shape == (batch, 1)
    assert jnp.allclose(jnp.sum(probs, axis=-1), 1.0, atol=5e-3)
    assert jnp.allclose(probs, ref_probs, atol=2e-2, rtol=2e-2)
    assert jnp.allclose(value, ref_value, atol=2e-2, rtol=2e-2)

    print("KERNEL_OK")
</pallas_src>

<mosaic_0001>
module attributes {stable_mosaic.version = 11 : i64} {
  func.func @policy_kernel(%arg0: i32, %arg1: memref<128x12xf32, #tpu.memory_space<vmem>>, %arg2: memref<128x20xf32, #tpu.memory_space<vmem>>, %arg3: memref<12x32xbf16, #tpu.memory_space<vmem>>, %arg4: memref<20x32xbf16, #tpu.memory_space<vmem>>, %arg5: memref<6x32x32xbf16, #tpu.memory_space<vmem>>, %arg6: memref<2x8x32xf32, #tpu.memory_space<vmem>>, %arg7: memref<32x128xbf16, #tpu.memory_space<vmem>>, %arg8: memref<2x128xf32, #tpu.memory_space<vmem>>, %arg9: memref<128x128xf32, #tpu.memory_space<vmem>>) attributes {dimension_semantics = [#tpu.dimension_semantics<parallel>], iteration_bounds = array<i64: 1>, scalar_prefetch = 0 : i64, scratch_operands = 0 : i64, tpu.core_type = #tpu.core_type<tc>, window_params = [{transform_indices = @transform_0, window_bounds = array<i64: 128, 12>}, {transform_indices = @transform_1, window_bounds = array<i64: 128, 20>}, {pipeline_mode = #tpu.pipeline_mode<synchronous>, transform_indices = @transform_2, window_bounds = array<i64: 12, 32>}, {pipeline_mode = #tpu.pipeline_mode<synchronous>, transform_indices = @transform_3, window_bounds = array<i64: 20, 32>}, {pipeline_mode = #tpu.pipeline_mode<synchronous>, transform_indices = @transform_4, window_bounds = array<i64: 6, 32, 32>}, {pipeline_mode = #tpu.pipeline_mode<synchronous>, transform_indices = @transform_5, window_bounds = array<i64: 2, 8, 32>}, {pipeline_mode = #tpu.pipeline_mode<synchronous>, transform_indices = @transform_6, window_bounds = array<i64: 32, 128>}, {pipeline_mode = #tpu.pipeline_mode<synchronous>, transform_indices = @transform_7, window_bounds = array<i64: 2, 128>}, {transform_indices = @transform_8, window_bounds = array<i64: 128, 128>}]} {
    %c0 = arith.constant 0 : index
    %c0_0 = arith.constant 0 : index
    %0 = vector.load %arg8[%c0, %c0_0] : memref<2x128xf32, #tpu.memory_space<vmem>>, vector<2x128xf32>
    %1 = vector.extract_strided_slice %0 {offsets = [0, 0], sizes = [1, 32], strides = [1, 1]} : vector<2x128xf32> to vector<1x32xf32>
    %2 = vector.extract_strided_slice %0 {offsets = [1, 0], sizes = [1, 128], strides = [1, 1]} : vector<2x128xf32> to vector<1x128xf32>
    %c0_1 = arith.constant 0 : index
    %c0_2 = arith.constant 0 : index
    %3 = vector.load %arg1[%c0_1, %c0_2] : memref<128x12xf32, #tpu.memory_space<vmem>>, vector<128x12xf32>
    %4 = arith.truncf %3 : vector<128x12xf32> to vector<128x12xbf16>
    %c0_3 = arith.constant 0 : index
    %c0_4 = arith.constant 0 : index
    %5 = vector.load %arg3[%c0_3, %c0_4] : memref<12x32xbf16, #tpu.memory_space<vmem>>, vector<12x32xbf16>
    %cst = arith.constant dense<0.000000e+00> : vector<128x32xf32>
    %6 = tpu.matmul %4, %5, %cst {dimension_numbers = #tpu.dot_dimension_numbers<[1], [0], [0], [1], [0, 0, 1, 1], [], []>} : vector<128x12xbf16>, vector<12x32xbf16>, vector<128x32xf32> -> vector<128x32xf32>
    %c0_5 = arith.constant 0 : index
    %c0_6 = arith.constant 0 : index
    %7 = vector.load %arg2[%c0_5, %c0_6] : memref<128x20xf32, #tpu.memory_space<vmem>>, vector<128x20xf32>
    %8 = arith.truncf %7 : vector<128x20xf32> to vector<128x20xbf16>
    %c0_7 = arith.constant 0 : index
    %c0_8 = arith.constant 0 : index
    %9 = vector.load %arg4[%c0_7, %c0_8] : memref<20x32xbf16, #tpu.memory_space<vmem>>, vector<20x32xbf16>
    %cst_9 = arith.constant dense<0.000000e+00> : vector<128x32xf32>
    %10 = tpu.matmul %8, %9, %cst_9 {dimension_numbers = #tpu.dot_dimension_numbers<[1], [0], [0], [1], [0, 0, 1, 1], [], []>} : vector<128x20xbf16>, vector<20x32xbf16>, vector<128x32xf32> -> vector<128x32xf32>
    %11 = arith.addf %6, %10 : vector<128x32xf32>
    %12 = vector.broadcast %1 : vector<1x32xf32> to vector<128x32xf32>
    %13 = arith.addf %11, %12 : vector<128x32xf32>
    %c0_10 = arith.constant 0 : index
    %c0_11 = arith.constant 0 : index
    %c0_12 = arith.constant 0 : index
    %14 = vector.load %arg6[%c0_10, %c0_11, %c0_12] : memref<2x8x32xf32, #tpu.memory_space<vmem>>, vector<1x8x32xf32>
    %15 = vector.shape_cast %14 : vector<1x8x32xf32> to vector<8x32xf32>
    %16 = vector.extract_strided_slice %15 {offsets = [0, 0], sizes = [1, 32], strides = [1, 1]} : vector<8x32xf32> to vector<1x32xf32>
    %17 = vector.extract_strided_slice %15 {offsets = [1, 0], sizes = [1, 32], strides = [1, 1]} : vector<8x32xf32> to vector<1x32xf32>
    %18 = vector.extract_strided_slice %15 {offsets = [2, 0], sizes = [1, 32], strides = [1, 1]} : vector<8x32xf32> to vector<1x32xf32>
    %19 = vector.extract_strided_slice %15 {offsets = [3, 0], sizes = [1, 32], strides = [1, 1]} : vector<8x32xf32> to vector<1x32xf32>
    %20 = vector.extract_strided_slice %15 {offsets = [4, 0], sizes = [1, 32], strides = [1, 1]} : vector<8x32xf32> to vector<1x32xf32>
    %21 = vector.extract_strided_slice %15 {offsets = [5, 0], sizes = [1, 32], strides = [1, 1]} : vector<8x32xf32> to vector<1x32xf32>
    %22 = vector.extract_strided_slice %15 {offsets = [6, 0], sizes = [1, 32], strides = [1, 1]} : vector<8x32xf32> to vector<1x32xf32>
    %23 = arith.truncf %13 : vector<128x32xf32> to vector<128x32xbf16>
    %c0_13 = arith.constant 0 : index
    %c0_14 = arith.constant 0 : index
    %c0_15 = arith.constant 0 : index
    %24 = vector.load %arg5[%c0_13, %c0_14, %c0_15] : memref<6x32x32xbf16, #tpu.memory_space<vmem>>, vector<1x32x32xbf16>
    %25 = vector.shape_cast %24 : vector<1x32x32xbf16> to vector<32x32xbf16>
    %cst_16 = arith.constant dense<0.000000e+00> : vector<128x32xf32>
    %26 = tpu.matmul %23, %25, %cst_16 {dimension_numbers = #tpu.dot_dimension_numbers<[1], [0], [0], [1], [0, 0, 1, 1], [], []>} : vector<128x32xbf16>, vector<32x32xbf16>, vector<128x32xf32> -> vector<128x32xf32>
    %27 = vector.broadcast %16 : vector<1x32xf32> to vector<128x32xf32>
    %28 = arith.addf %26, %27 : vector<128x32xf32>
    %29 = arith.addf %13, %28 : vector<128x32xf32>
    %cst_17 = arith.constant dense<0.000000e+00> : vector<128xf32>
    %30 = vector.multi_reduction <add>, %29, %cst_17 [1] : vector<128x32xf32> to vector<128xf32>
    %31 = vector.shape_cast %30 : vector<128xf32> to vector<128x1xf32>
    %cst_18 = arith.constant 3.200000e+01 : f32
    %32 = vector.broadcast %cst_18 : f32 to vector<128x1xf32>
    %33 = arith.divf %31, %32 : vector<128x1xf32>
    %34 = arith.mulf %29, %29 : vector<128x32xf32>
    %cst_19 = arith.constant dense<0.000000e+00> : vector<128xf32>
    %35 = vector.multi_reduction <add>, %34, %cst_19 [1] : vector<128x32xf32> to vector<128xf32>
    %36 = vector.shape_cast %35 : vector<128xf32> to vector<128x1xf32>
    %cst_20 = arith.constant 3.200000e+01 : f32
    %37 = vector.broadcast %cst_20 : f32 to vector<128x1xf32>
    %38 = arith.divf %36, %37 : vector<128x1xf32>
    %39 = arith.mulf %33, %33 : vector<128x1xf32>
    %40 = arith.subf %38, %39 : vector<128x1xf32>
    %41 = vector.broadcast %33 : vector<128x1xf32> to vector<128x32xf32>
    %42 = arith.subf %29, %41 : vector<128x32xf32>
    %cst_21 = arith.constant 9.99999974E-6 : f32
    %43 = vector.broadcast %cst_21 : f32 to vector<128x1xf32>
    %44 = arith.addf %40, %43 : vector<128x1xf32>
    %45 = math.rsqrt %44 : vector<128x1xf32>
    %46 = vector.broadcast %45 : vector<128x1xf32> to vector<128x32xf32>
    %47 = arith.mulf %42, %46 : vector<128x32xf32>
    %48 = vector.broadcast %17 : vector<1x32xf32> to vector<128x32xf32>
    %49 = arith.mulf %47, %48 : vector<128x32xf32>
    %50 = vector.broadcast %18 : vector<1x32xf32> to vector<128x32xf32>
    %51 = arith.addf %49, %50 : vector<128x32xf32>
    %52 = arith.truncf %51 : vector<128x32xf32> to vector<128x32xbf16>
    %c1 = arith.constant 1 : index
    %c0_22 = arith.constant 0 : index
    %c0_23 = arith.constant 0 : index
    %53 = vector.load %arg5[%c1, %c0_22, %c0_23] : memref<6x32x32xbf16, #tpu.memory_space<vmem>>, vector<1x32x32xbf16>
    %54 = vector.shape_cast %53 : vector<1x32x32xbf16> to vector<32x32xbf16>
    %cst_24 = arith.constant dense<0.000000e+00> : vector<128x32xf32>
    %55 = tpu.matmul %52, %54, %cst_24 {dimension_numbers = #tpu.dot_dimension_numbers<[1], [0], [0], [1], [0, 0, 1, 1], [], []>} : vector<128x32xbf16>, vector<32x32xbf16>, vector<128x32xf32> -> vector<128x32xf32>
    %56 = vector.broadcast %19 : vector<1x32xf32> to vector<128x32xf32>
    %57 = arith.addf %55, %56 : vector<128x32xf32>
    %cst_25 = arith.constant 0.000000e+00 : f32
    %58 = vector.broadcast %cst_25 : f32 to vector<128x32xf32>
    %59 = arith.maximumf %57, %58 : vector<128x32xf32>
    %60 = arith.truncf %59 : vector<128x32xf32> to vector<128x32xbf16>
    %c2 = arith.constant 2 : index
    %c0_26 = arith.constant 0 : index
    %c0_27 = arith.constant 0 : index
    %61 = vector.load %arg5[%c2, %c0_26, %c0_27] : memref<6x32x32xbf16, #tpu.memory_space<vmem>>, vector<1x32x32xbf16>
    %62 = vector.shape_cast %61 : vector<1x32x32xbf16> to vector<32x32xbf16>
    %cst_28 = arith.constant dense<0.000000e+00> : vector<128x32xf32>
    %63 = tpu.matmul %60, %62, %cst_28 {dimension_numbers = #tpu.dot_dimension_numbers<[1], [0], [0], [1], [0, 0, 1, 1], [], []>} : vector<128x32xbf16>, vector<32x32xbf16>, vector<128x32xf32> -> vector<128x32xf32>
    %64 = vector.broadcast %20 : vector<1x32xf32> to vector<128x32xf32>
    %65 = arith.addf %63, %64 : vector<128x32xf32>
    %66 = arith.addf %51, %65 : vector<128x32xf32>
    %cst_29 = arith.constant dense<0.000000e+00> : vector<128xf32>
    %67 = vector.multi_reduction <add>, %66, %cst_29 [1] : vector<128x32xf32> to vector<128xf32>
    %68 = vector.shape_cast %67 : vector<128xf32> to vector<128x1xf32>
    %cst_30 = arith.constant 3.200000e+01 : f32
    %69 = vector.broadcast %cst_30 : f32 to vector<128x1xf32>
    %70 = arith.divf %68, %69 : vector<128x1xf32>
    %71 = arith.mulf %66, %66 : vector<128x32xf32>
    %cst_31 = arith.constant dense<0.000000e+00> : vector<128xf32>
    %72 = vector.multi_reduction <add>, %71, %cst_31 [1] : vector<128x32xf32> to vector<128xf32>
    %73 = vector.shape_cast %72 : vector<128xf32> to vector<128x1xf32>
    %cst_32 = arith.constant 3.200000e+01 : f32
    %74 = vector.broadcast %cst_32 : f32 to vector<128x1xf32>
    %75 = arith.divf %73, %74 : vector<128x1xf32>
    %76 = arith.mulf %70, %70 : vector<128x1xf32>
    %77 = arith.subf %75, %76 : vector<128x1xf32>
    %78 = vector.broadcast %70 : vector<128x1xf32> to vector<128x32xf32>
    %79 = arith.subf %66, %78 : vector<128x32xf32>
    %cst_33 = arith.constant 9.99999974E-6 : f32
    %80 = vector.broadcast %cst_33 : f32 to vector<128x1xf32>
    %81 = arith.addf %77, %80 : vector<128x1xf32>
    %82 = math.rsqrt %81 : vector<128x1xf32>
    %83 = vector.broadcast %82 : vector<128x1xf32> to vector<128x32xf32>
    %84 = arith.mulf %79, %83 : vector<128x32xf32>
    %85 = vector.broadcast %21 : vector<1x32xf32> to vector<128x32xf32>
    %86 = arith.mulf %84, %85 : vector<128x32xf32>
    %87 = vector.broadcast %22 : vector<1x32xf32> to vector<128x32xf32>
    %88 = arith.addf %86, %87 : vector<128x32xf32>
    %c1_34 = arith.constant 1 : index
    %c0_35 = arith.constant 0 : index
    %c0_36 = arith.constant 0 : index
    %89 = vector.load %arg6[%c1_34, %c0_35, %c0_36] : memref<2x8x32xf32, #tpu.memory_space<vmem>>, vector<1x8x32xf32>
    %90 = vector.shape_cast %89 : vector<1x8x32xf32> to vector<8x32xf32>
    %91 = vector.extract_strided_slice %90 {offsets = [0, 0], sizes = [1, 32], strides = [1, 1]} : vector<8x32xf32> to vector<1x32xf32>
    %92 = vector.extract_strided_slice %90 {offsets = [1, 0], sizes = [1, 32], strides = [1, 1]} : vector<8x32xf32> to vector<1x32xf32>
    %93 = vector.extract_strided_slice %90 {offsets = [2, 0], sizes = [1, 32], strides = [1, 1]} : vector<8x32xf32> to vector<1x32xf32>
    %94 = vector.extract_strided_slice %90 {offsets = [3, 0], sizes = [1, 32], strides = [1, 1]} : vector<8x32xf32> to vector<1x32xf32>
    %95 = vector.extract_strided_slice %90 {offsets = [4, 0], sizes = [1, 32], strides = [1, 1]} : vector<8x32xf32> to vector<1x32xf32>
    %96 = arith.truncf %88 : vector<128x32xf32> to vector<128x32xbf16>
    %c3 = arith.constant 3 : index
    %c0_37 = arith.constant 0 : index
    %c0_38 = arith.constant 0 : index
    %97 = vector.load %arg5[%c3, %c0_37, %c0_38] : memref<6x32x32xbf16, #tpu.memory_space<vmem>>, vector<1x32x32xbf16>
    %98 = vector.shape_cast %97 : vector<1x32x32xbf16> to vector<32x32xbf16>
    %cst_39 = arith.constant dense<0.000000e+00> : vector<128x32xf32>
    %99 = tpu.matmul %96, %98, %cst_39 {dimension_numbers = #tpu.dot_dimension_numbers<[1], [0], [0], [1], [0, 0, 1, 1], [], []>} : vector<128x32xbf16>, vector<32x32xbf16>, vector<128x32xf32> -> vector<128x32xf32>
    %100 = vector.broadcast %91 : vector<1x32xf32> to vector<128x32xf32>
    %101 = arith.addf %99, %100 : vector<128x32xf32>
    %102 = arith.addf %88, %101 : vector<128x32xf32>
    %cst_40 = arith.constant dense<0.000000e+00> : vector<128xf32>
    %103 = vector.multi_reduction <add>, %102, %cst_40 [1] : vector<128x32xf32> to vector<128xf32>
    %104 = vector.shape_cast %103 : vector<128xf32> to vector<128x1xf32>
    %cst_41 = arith.constant 3.200000e+01 : f32
    %105 = vector.broadcast %cst_41 : f32 to vector<128x1xf32>
    %106 = arith.divf %104, %105 : vector<128x1xf32>
    %107 = arith.mulf %102, %102 : vector<128x32xf32>
    %cst_42 = arith.constant dense<0.000000e+00> : vector<128xf32>
    %108 = vector.multi_reduction <add>, %107, %cst_42 [1] : vector<128x32xf32> to vector<128xf32>
    %109 = vector.shape_cast %108 : vector<128xf32> to vector<128x1xf32>
    %cst_43 = arith.constant 3.200000e+01 : f32
    %110 = vector.broadcast %cst_43 : f32 to vector<128x1xf32>
    %111 = arith.divf %109, %110 : vector<128x1xf32>
    %112 = arith.mulf %106, %106 : vector<128x1xf32>
    %113 = arith.subf %111, %112 : vector<128x1xf32>
    %114 = vector.broadcast %106 : vector<128x1xf32> to vector<128x32xf32>
    %115 = arith.subf %102, %114 : vector<128x32xf32>
    %cst_44 = arith.constant 9.99999974E-6 : f32
    %116 = vector.broadcast %cst_44 : f32 to vector<128x1xf32>
    %117 = arith.addf %113, %116 : vector<128x1xf32>
    %118 = math.rsqrt %117 : vector<128x1xf32>
    %119 = vector.broadcast %118 : vector<128x1xf32> to vector<128x32xf32>
    %120 = arith.mulf %115, %119 : vector<128x32xf32>
    %121 = vector.broadcast %92 : vector<1x32xf32> to vector<128x32xf32>
    %122 = arith.mulf %120, %121 : vector<128x32xf32>
    %123 = vector.broadcast %93 : vector<1x32xf32> to vector<128x32xf32>
    %124 = arith.addf %122, %123 : vector<128x32xf32>
    %125 = arith.truncf %124 : vector<128x32xf32> to vector<128x32xbf16>
    %c4 = arith.constant 4 : index
    %c0_45 = arith.constant 0 : index
    %c0_46 = arith.constant 0 : index
    %126 = vector.load %arg5[%c4, %c0_45, %c0_46] : memref<6x32x32xbf16, #tpu.memory_space<vmem>>, vector<1x32x32xbf16>
    %127 = vector.shape_cast %126 : vector<1x32x32xbf16> to vector<32x32xbf16>
    %cst_47 = arith.constant dense<0.000000e+00> : vector<128x32xf32>
    %128 = tpu.matmul %125, %127, %cst_47 {dimension_numbers = #tpu.dot_dimension_numbers<[1], [0], [0], [1], [0, 0, 1, 1], [], []>} : vector<128x32xbf16>, vector<32x32xbf16>, vector<128x32xf32> -> vector<128x32xf32>
    %129 = vector.broadcast %94 : vector<1x32xf32> to vector<128x32xf32>
    %130 = arith.addf %128, %129 : vector<128x32xf32>
    %cst_48 = arith.constant 0.000000e+00 : f32
    %131 = vector.broadcast %cst_48 : f32 to vector<128x32xf32>
    %132 = arith.maximumf %130, %131 : vector<128x32xf32>
    %133 = arith.truncf %132 : vector<128x32xf32> to vector<128x32xbf16>
    %c5 = arith.constant 5 : index
    %c0_49 = arith.constant 0 : index
    %c0_50 = arith.constant 0 : index
    %134 = vector.load %arg5[%c5, %c0_49, %c0_50] : memref<6x32x32xbf16, #tpu.memory_space<vmem>>, vector<1x32x32xbf16>
    %135 = vector.shape_cast %134 : vector<1x32x32xbf16> to vector<32x32xbf16>
    %cst_51 = arith.constant dense<0.000000e+00> : vector<128x32xf32>
    %136 = tpu.matmul %133, %135, %cst_51 {dimension_numbers = #tpu.dot_dimension_numbers<[1], [0], [0], [1], [0, 0, 1, 1], [], []>} : vector<128x32xbf16>, vector<32x32xbf16>, vector<128x32xf32> -> vector<128x32xf32>
    %137 = vector.broadcast %95 : vector<1x32xf32> to vector<128x32xf32>
    %138 = arith.addf %136, %137 : vector<128x32xf32>
    %139 = arith.addf %124, %138 : vector<128x32xf32>
    %cst_52 = arith.constant dense<0.000000e+00> : vector<128xf32>
    %140 = vector.multi_reduction <add>, %139, %cst_52 [1] : vector<128x32xf32> to vector<128xf32>
    %141 = vector.shape_cast %140 : vector<128xf32> to vector<128x1xf32>
    %cst_53 = arith.constant 3.200000e+01 : f32
    %142 = vector.broadcast %cst_53 : f32 to vector<128x1xf32>
    %143 = arith.divf %141, %142 : vector<128x1xf32>
    %144 = arith.mulf %139, %139 : vector<128x32xf32>
    %cst_54 = arith.constant dense<0.000000e+00> : vector<128xf32>
    %145 = vector.multi_reduction <add>, %144, %cst_54 [1] : vector<128x32xf32> to vector<128xf32>
    %146 = vector.shape_cast %145 : vector<128xf32> to vector<128x1xf32>
    %cst_55 = arith.constant 3.200000e+01 : f32
    %147 = vector.broadcast %cst_55 : f32 to vector<128x1xf32>
    %148 = arith.divf %146, %147 : vector<128x1xf32>
    %149 = arith.mulf %143, %143 : vector<128x1xf32>
    %150 = arith.subf %148, %149 : vector<128x1xf32>
    %151 = vector.broadcast %143 : vector<128x1xf32> to vector<128x32xf32>
    %152 = arith.subf %139, %151 : vector<128x32xf32>
    %cst_56 = arith.constant 9.99999974E-6 : f32
    %153 = vector.broadcast %cst_56 : f32 to vector<128x1xf32>
    %154 = arith.addf %150, %153 : vector<128x1xf32>
    %155 = math.rsqrt %154 : vector<128x1xf32>
    %156 = vector.broadcast %155 : vector<128x1xf32> to vector<128x32xf32>
    %157 = arith.mulf %152, %156 : vector<128x32xf32>
    %158 = arith.truncf %157 : vector<128x32xf32> to vector<128x32xbf16>
    %c0_57 = arith.constant 0 : index
    %c0_58 = arith.constant 0 : index
    %159 = vector.load %arg7[%c0_57, %c0_58] : memref<32x128xbf16, #tpu.memory_space<vmem>>, vector<32x128xbf16>
    %cst_59 = arith.constant dense<0.000000e+00> : vector<128x128xf32>
    %160 = tpu.matmul %158, %159, %cst_59 {dimension_numbers = #tpu.dot_dimension_numbers<[1], [0], [0], [1], [0, 0, 1, 1], [], []>} : vector<128x32xbf16>, vector<32x128xbf16>, vector<128x128xf32> -> vector<128x128xf32>
    %161 = vector.broadcast %2 : vector<1x128xf32> to vector<128x128xf32>
    %162 = arith.addf %160, %161 : vector<128x128xf32>
    %163 = tpu.iota {dimensions = array<i32: 1>} : vector<128x128xi32>
    %c6_i32 = arith.constant 6 : i32
    %164 = vector.broadcast %c6_i32 : i32 to vector<128x128xi32>
    %165 = arith.cmpi slt, %163, %164 : vector<128x128xi32>
    %cst_60 = arith.constant -1.000000e+30 : f32
    %166 = vector.broadcast %cst_60 : f32 to vector<128x128xf32>
    %167 = arith.select %165, %162, %166 : vector<128x128xi1>, vector<128x128xf32>
    %cst_61 = arith.constant dense<0xFF800000> : vector<128xf32>
    %168 = vector.multi_reduction <maximumf>, %167, %cst_61 [1] : vector<128x128xf32> to vector<128xf32>
    %169 = vector.shape_cast %168 : vector<128xf32> to vector<128x1xf32>
    %170 = vector.broadcast %169 : vector<128x1xf32> to vector<128x128xf32>
    %171 = arith.subf %167, %170 : vector<128x128xf32>
    %172 = math.exp %171 : vector<128x128xf32>
    %cst_62 = arith.constant 0.000000e+00 : f32
    %173 = vector.broadcast %cst_62 : f32 to vector<128x128xf32>
    %174 = arith.select %165, %172, %173 : vector<128x128xi1>, vector<128x128xf32>
    %cst_63 = arith.constant dense<0.000000e+00> : vector<128xf32>
    %175 = vector.multi_reduction <add>, %174, %cst_63 [1] : vector<128x128xf32> to vector<128xf32>
    %176 = vector.shape_cast %175 : vector<128xf32> to vector<128x1xf32>
    %177 = tpu.reciprocal %176 {approx = true} : vector<128x1xf32> -> vector<128x1xf32>
    %178 = vector.broadcast %177 : vector<128x1xf32> to vector<128x128xf32>
    %179 = arith.mulf %174, %178 : vector<128x128xf32>
    %180 = arith.select %165, %179, %162 : vector<128x128xi1>, vector<128x128xf32>
    %c0_64 = arith.constant 0 : index
    %c0_65 = arith.constant 0 : index
    %181 = vector.load %arg9[%c0_64, %c0_65] : memref<128x128xf32, #tpu.memory_space<vmem>>, vector<128x128xf32>
    tpu.vector_store %arg9[%c0_64, %c0_65], %180 {strides = array<i32>} : memref<128x128xf32, #tpu.memory_space<vmem>>, vector<128x128xf32>,
    return
  }
  func.func @transform_0(%arg0: i32) -> (i32, i32) {
    %c0_i32 = arith.constant 0 : i32
    %c0_i32_0 = arith.constant 0 : i32
    return %arg0, %c0_i32 : i32, i32
  }
  func.func @transform_1(%arg0: i32) -> (i32, i32) {
    %c0_i32 = arith.constant 0 : i32
    %c0_i32_0 = arith.constant 0 : i32
    return %arg0, %c0_i32 : i32, i32
  }
  func.func @transform_2(%arg0: i32) -> (i32, i32) {
    %c0_i32 = arith.constant 0 : i32
    %c0_i32_0 = arith.constant 0 : i32
    %c0_i32_1 = arith.constant 0 : i32
    return %c0_i32, %c0_i32_0 : i32, i32
  }
  func.func @transform_3(%arg0: i32) -> (i32, i32) {
    %c0_i32 = arith.constant 0 : i32
    %c0_i32_0 = arith.constant 0 : i32
    %c0_i32_1 = arith.constant 0 : i32
    return %c0_i32, %c0_i32_0 : i32, i32
  }
  func.func @transform_4(%arg0: i32) -> (i32, i32, i32) {
    %c0_i32 = arith.constant 0 : i32
    %c0_i32_0 = arith.constant 0 : i32
    %c0_i32_1 = arith.constant 0 : i32
    %c0_i32_2 = arith.constant 0 : i32
    return %c0_i32, %c0_i32_0, %c0_i32_1 : i32, i32, i32
  }
  func.func @transform_5(%arg0: i32) -> (i32, i32, i32) {
    %c0_i32 = arith.constant 0 : i32
    %c0_i32_0 = arith.constant 0 : i32
    %c0_i32_1 = arith.constant 0 : i32
    %c0_i32_2 = arith.constant 0 : i32
    return %c0_i32, %c0_i32_0, %c0_i32_1 : i32, i32, i32
  }
  func.func @transform_6(%arg0: i32) -> (i32, i32) {
    %c0_i32 = arith.constant 0 : i32
    %c0_i32_0 = arith.constant 0 : i32
    %c0_i32_1 = arith.constant 0 : i32
    return %c0_i32, %c0_i32_0 : i32, i32
  }
  func.func @transform_7(%arg0: i32) -> (i32, i32) {
    %c0_i32 = arith.constant 0 : i32
    %c0_i32_0 = arith.constant 0 : i32
    %c0_i32_1 = arith.constant 0 : i32
    return %c0_i32, %c0_i32_0 : i32, i32
  }
  func.func @transform_8(%arg0: i32) -> (i32, i32) {
    %c0_i32 = arith.constant 0 : i32
    %c0_i32_0 = arith.constant 0 : i32
    return %arg0, %c0_i32 : i32, i32
  }
}

</mosaic_0001>

<bundles_post_ra>
// kernel: tpu_custom_call.1
= control target key start
LH: loop header
LB: loop body
LE: loop exit
PB: predicated region body
PF: predicated region fallthrough
CT: control target
= control target key end

     0   :  { %vm202_vm0 = vcmask 1045504   ;;  %vm119_vm1 = vcmask 1041408   ;;  %s5330_s0 = inlined_call_operand.vmem [shape: f32[128,12], index: 0, kind: input, shape index: {}]   ;;  %s5331_s1 = inlined_call_operand.vmem [shape: f32[128,20], index: 1, kind: input, shape index: {}]   ;;  %s5332_s2 = inlined_call_operand.vmem [shape: bf16[12,32], index: 2, kind: input, shape index: {}]   ;;  %s5333_s3 = inlined_call_operand.vmem [shape: bf16[20,32], index: 3, kind: input, shape index: {}]   ;;  %s5334_s4 = inlined_call_operand.vmem [shape: bf16[6,32,32], index: 4, kind: input, shape index: {}]   ;;  %s5335_s5 = inlined_call_operand.vmem [shape: f32[2,8,32], index: 5, kind: input, shape index: {}]   ;;  %s5336_s6 = inlined_call_operand.vmem [shape: bf16[32,128], index: 6, kind: input, shape index: {}]   ;;  %s5337_s7 = inlined_call_operand.vmem [shape: f32[2,128], index: 7, kind: input, shape index: {}]   ;;  %s5338_s8 = inlined_call_operand.hbm [shape: f32[128,128], index: 8, kind: output, shape index: {}]  }
   0x1   :  { %v84_v0 = vld [vmem:[%s5333_s3 + $0x8] sm:$0x3]  ;;  %v2951_v2 = vld [vmem:[%s5332_s2] sm:$0xf]  ;;  %v3094_v3 = vld [vmem:[%s5332_s2] sm:$0x30] }
   0x2   :  { %v90_v1 = vunpack.c.l.b16 %v84_v0  ;;  %v2952_v4 = vor.u32 %v3094_v3, %v2951_v2 }
   0x4   :  { %v92_v5 = vpack.c.b16 %v90_v1, %v90_v1 }
   0x5   :  { %13 = vsyncpa [#allocation3], 0  ;;  %v204_v6 = vsel %vm202_vm0, %v2952_v4, 0  ;;  %v3095_v8 = vld [vmem:[%s5333_s3] sm:$0xff]  ;;  %v59_v10 = vld [vmem:[%s5331_s1 + $0x8] sm:$0xff]  ;;  %vm94_vm2 = vcmask 162816  }
   0x6   :  { %v121_v7 = vsel %vm119_vm1, %v92_v5, 0  ;;  %3110 = vmatpush.bf16.msra.mxu1 %v204_v6  ;;  %3111 = vmatpush.bf16.msra.mxu2 %v204_v6  ;;  %v58_v9 = vld [vmem:[%s5331_s1] sm:$0xff]  ;;  %v37_v13 = vld [vmem:[%s5330_s0 + $0x28] sm:$0xff]  ;;  %vm177_vm3 = vcmask 97280   ;;  %v38_v15 = vld [vmem:[%s5330_s0 + $0x30] sm:$0xff]  ;;  %vm298_vm4 = vcmask 261120  }
   0x7   :  { %129 = vmatpush.bf16.msra.mxu0 %v121_v7  ;;  %3112 = vmatpush.bf16.msra.mxu3 %v204_v6  ;;  %v74_v11 = vpack.c.bf16 %v59_v10, %v58_v9  ;;  %v36_v12 = vld [vmem:[%s5330_s0 + $0x20] sm:$0xff]  ;;  %v39_v16 = vld [vmem:[%s5330_s0 + $0x38] sm:$0xff]  ;;  %v60_v18 = vld [vmem:[%s5331_s1 + $0x10] sm:$0xff]  ;;  %s2925_s16 = sshll.u32 %s5338_s8, 4  ;;  %s3342_s17 = smov 128   ;;  %s2926_s16 = int_to_ptr.hbm [resolvable:$true] %s2925_s16 }
   0x8   :  { %v50_v14 = vpack.c.bf16 %v37_v13, %v36_v12  ;;  %v51_v17 = vpack.c.bf16 %v39_v16, %v38_v15  ;;  %v61_v19 = vld [vmem:[%s5331_s1 + $0x18] sm:$0xff]  ;;  %v40_v21 = vld [vmem:[%s5330_s0 + $0x40] sm:$0xff]  ;;  %v41_v22 = vld [vmem:[%s5330_s0 + $0x48] sm:$0xff]  ;;  %s3343_s18 = smov 8  }
   0x9   :  { %v75_v20 = vpack.c.bf16 %v61_v19, %v60_v18  ;;  %v52_v23 = vpack.c.bf16 %v41_v22, %v40_v21  ;;  %v62_v24 = vld [vmem:[%s5331_s1 + $0x20] sm:$0xff]  ;;  %v63_v25 = vld [vmem:[%s5331_s1 + $0x28] sm:$0xff]  ;;  %v42_v27 = vld [vmem:[%s5330_s0 + $0x50] sm:$0xff] }
   0xa   :  { %2955 = vmatmul.msk.bf16.vlgmr.msra.gmra.mxu1 %vm177_vm3, %v50_v14  ;;  %2956 = vmatmul.msk.bf16.vlgmr.msra.gmra.mxu2 %vm177_vm3, %v51_v17  ;;  %v76_v26 = vpack.c.bf16 %v63_v25, %v62_v24  ;;  %v43_v28 = vld [vmem:[%s5330_s0 + $0x58] sm:$0xff]  ;;  %v64_v30 = vld [vmem:[%s5331_s1 + $0x30] sm:$0xff]  ;;  %v44_v33 = vld [vmem:[%s5330_s0 + $0x60] sm:$0xff] }
   0xb   :  { %130 = vmatpush.bf16.msra.mxu0 %v3095_v8  ;;  %v53_v29 = vpack.c.bf16 %v43_v28, %v42_v27  ;;  %v65_v31 = vld [vmem:[%s5331_s1 + $0x38] sm:$0xff]  ;;  %v45_v34 = vld [vmem:[%s5330_s0 + $0x68] sm:$0xff]  ;;  %v66_v36 = vld [vmem:[%s5331_s1 + $0x40] sm:$0xff] }
   0xc   :  { %v77_v32 = vpack.c.bf16 %v65_v31, %v64_v30  ;;  %v54_v35 = vpack.c.bf16 %v45_v34, %v44_v33  ;;  %v67_v37 = vld [vmem:[%s5331_s1 + $0x48] sm:$0xff]  ;;  %v46_v39 = vld [vmem:[%s5330_s0 + $0x70] sm:$0xff]  ;;  %v47_v40 = vld [vmem:[%s5330_s0 + $0x78] sm:$0xff] }
   0xd   :  { %v78_v38 = vpack.c.bf16 %v67_v37, %v66_v36  ;;  %v55_v41 = vpack.c.bf16 %v47_v40, %v46_v39  ;;  %v68_v42 = vld [vmem:[%s5331_s1 + $0x50] sm:$0xff]  ;;  %v69_v43 = vld [vmem:[%s5331_s1 + $0x58] sm:$0xff]  ;;  %v70_v45 = vld [vmem:[%s5331_s1 + $0x60] sm:$0xff] }
   0xe   :  { %2941 = vmatmul.msk.bf16.vlgmr.msra.gmra.mxu0 %vm94_vm2, %v74_v11  ;;  %2959 = vmatmul.msk.bf16.vlgmr.msra.gmra.mxu3 %vm177_vm3, %v54_v35  ;;  %v79_v44 = vpack.c.bf16 %v69_v43, %v68_v42  ;;  %v71_v46 = vld [vmem:[%s5331_s1 + $0x68] sm:$0xff]  ;;  %v72_v48 = vld [vmem:[%s5331_s1 + $0x70] sm:$0xff]  ;;  %v73_v49 = vld [vmem:[%s5331_s1 + $0x78] sm:$0xff] }
   0xf   :  { %213 = vmatpush.bf16.msrb.mxu0 %v204_v6  ;;  %v80_v47 = vpack.c.bf16 %v71_v46, %v70_v45  ;;  %v81_v50 = vpack.c.bf16 %v73_v49, %v72_v48  ;;  %v32_v51 = vld [vmem:[%s5330_s0] sm:$0xff]  ;;  %v33_v52 = vld [vmem:[%s5330_s0 + $0x8] sm:$0xff]  ;;  %v34_v56 = vld [vmem:[%s5330_s0 + $0x10] sm:$0xff] }
  0x10   :  { %v48_v53 = vpack.c.bf16 %v33_v52, %v32_v51  ;;  %v35_v57 = vld [vmem:[%s5330_s0 + $0x18] sm:$0xff]  ;;  %v3097_v1 = vld [vmem:[%s5334_s4 + $0x8] sm:$0xff]  ;;  %v3096_v5 = vld [vmem:[%s5334_s4] sm:$0xff] }
  0x11   :  { %v49_v58 = vpack.c.bf16 %v35_v57, %v34_v56  ;;  %329 = vmatpush.bf16.msrb.mxu2 %v3097_v1  ;;  %v31_v12 = vld [vmem:[%s5337_s7] sm:$0x3] }
  0x12   :  { %v255_v15 = vperm.slane %v31_v12, 0 }
  0x15   :  { %330 = vmatpush.bf16.msrb.mxu2 %v3096_v5  ;;  %v3584_v5 = vld [vmem:[%s5335_s5] sm:$0xff] }
  0x1a   :  { %2957 = vmatmul.msk.bf16.gmra.mxu2 %vm177_vm3, %v52_v23 }
  0x1e   :  { %2942 = vmatmul.msk.bf16.gmra.mxu0 %vm94_vm2, %v75_v20  ;;  %2960 = vmatmul.msk.bf16.gmra.mxu3 %vm177_vm3, %v55_v41 }
  0x2a   :  { %2958 = vmatmul.msk.bf16.gmra.mxu2 %vm177_vm3, %v53_v29 }
  0x2e   :  { %2943 = vmatmul.msk.bf16.gmra.mxu0 %vm94_vm2, %v76_v26 }
  0x3e   :  { %2944 = vmatmul.msk.bf16.gmra.mxu0 %vm94_vm2, %v77_v32 }
  0x4e   :  { %2945 = vmatmul.msk.bf16.gmra.mxu0 %vm94_vm2, %v78_v38 }
  0x5e   :  { %2946 = vmatmul.msk.bf16.gmra.mxu0 %vm94_vm2, %v79_v44 }
  0x6e   :  { %2947 = vmatmul.msk.bf16.gmra.mxu0 %vm94_vm2, %v80_v47 }
  0x7e   :  { %2948 = vmatmul.msk.bf16.gmra.mxu0 %vm94_vm2, %v81_v50 }
  0x87   :  { %v225_v22 = vpop.f32.mrf.mxu1 }
  0x8b   :  { %v132_v54 = vpop.f32.mrf.mxu0 }
  0x8d   :  { %v230_v28 = vpop.f32.mrf.mxu2 }
  0x8e   :  { %2953 = vmatmul.msk.bf16.vlgmr.msrb.gmra.mxu0 %vm177_vm3, %v48_v53 }
  0x8f   :  { %v227_v29 = vpop.f32.mrf.mxu1 }
  0x91   :  { %v245_v50 = vpop.f32.mrf.mxu3 }
  0x93   :  { %v134_v55 = vpop.f32.mrf.mxu0 }
  0x95   :  { %v232_v33 = vpop.f32.mrf.mxu2 }
  0x99   :  { %v247_v56 = vpop.f32.mrf.mxu3 }
  0x9b   :  { %v137_v59 = vpop.f32.mrf.mxu0 }
  0x9d   :  { %v235_v36 = vpop.f32.mrf.mxu2 }
  0x9e   :  { %2954 = vmatmul.msk.bf16.gmra.mxu0 %vm177_vm3, %v49_v58 }
  0xa3   :  { %v139_v60 = vpop.f32.mrf.mxu0 }
  0xa5   :  { %v237_v42 = vpop.f32.mrf.mxu2 }
  0xab   :  { %v142_v61 = vpop.f32.mrf.mxu0 }
  0xac   :  { %v226_v31 = vadd.f32 %v225_v22, %v142_v61 }
  0xad   :  { %v240_v45 = vpop.f32.mrf.mxu2 }
  0xae   :  { %v3540_v34 = vadd.f32 %v255_v15, %v226_v31 }
  0xb3   :  { %v144_v62 = vpop.f32.mrf.mxu0 }
  0xb4   :  { %v228_v30 = vadd.f32 %v227_v29, %v144_v62 }
  0xb5   :  { %v242_v49 = vpop.f32.mrf.mxu2 }
  0xb6   :  { %v3538_v32 = vadd.f32 %v255_v15, %v228_v30 }
  0xb8   :  { %v275_v35 = vpack.c.bf16 %v3538_v32, %v3540_v34 }
  0xbb   :  { %v147_v63 = vpop.f32.mrf.mxu0 }
  0xbc   :  { %v231_v38 = vadd.f32 %v230_v28, %v147_v63 }
  0xbe   :  { %v3547_v40 = vadd.f32 %v255_v15, %v231_v38 }
  0xc3   :  { %v149_v0 = vpop.f32.mrf.mxu0 }
  0xc4   :  { %v233_v37 = vadd.f32 %v232_v33, %v149_v0 }
  0xc6   :  { %v3545_v39 = vadd.f32 %v255_v15, %v233_v37 }
  0xc8   :  { %v276_v41 = vpack.c.bf16 %v3545_v39, %v3547_v40 }
  0xcb   :  { %v152_v2 = vpop.f32.mrf.mxu0 }
  0xcc   :  { %v236_v44 = vadd.f32 %v235_v36, %v152_v2 }
  0xce   :  { %v3554_v47 = vadd.f32 %v255_v15, %v236_v44 }
  0xd3   :  { %v154_v3 = vpop.f32.mrf.mxu0 }
  0xd4   :  { %v238_v43 = vadd.f32 %v237_v42, %v154_v3 }
  0xd6   :  { %v3552_v46 = vadd.f32 %v255_v15, %v238_v43 }
  0xd8   :  { %v277_v48 = vpack.c.bf16 %v3552_v46, %v3554_v47 }
  0xdb   :  { %v157_v4 = vpop.f32.mrf.mxu0 }
  0xdc   :  { %v241_v52 = vadd.f32 %v240_v45, %v157_v4 }
  0xe3   :  { %v159_v6 = vpop.f32.mrf.mxu0 }
  0xe4   :  { %v243_v51 = vadd.f32 %v242_v49, %v159_v6  ;;  %v3587_v6 = vperm.slane %v3584_v5, 0 }
  0xe6   :  { %v3559_v53 = vadd.f32 %v255_v15, %v243_v51 }
  0xeb   :  { %v162_v7 = vpop.f32.mrf.mxu0 }
  0xec   :  { %v246_v58 = vadd.f32 %v245_v50, %v162_v7 }
  0xee   :  { %v3568_v61 = vadd.f32 %v255_v15, %v246_v58 }
  0xf3   :  { %v164_v8 = vpop.f32.mrf.mxu0 }
  0xf4   :  { %v248_v57 = vadd.f32 %v247_v56, %v164_v8 }
  0xfb   :  { %v3519_v9 = vpop.f32.mrf.mxu0 }
 0x103   :  { %v169_v10 = vpop.f32.mrf.mxu0 }
 0x10b   :  { %v215_v11 = vpop.f32.mrf.mxu0 }
 0x10c   :  { %v216_v13 = vadd.f32 %v215_v11, %v132_v54  ;;  %v3561_v54 = vadd.f32 %v255_v15, %v241_v52 }
 0x10e   :  { %v3524_v17 = vadd.f32 %v255_v15, %v216_v13 }
 0x113   :  { %v217_v14 = vpop.f32.mrf.mxu0 }
 0x114   :  { %v218_v16 = vadd.f32 %v217_v14, %v134_v55  ;;  %v278_v55 = vpack.c.bf16 %v3559_v53, %v3561_v54 }
 0x116   :  { %v3526_v18 = vadd.f32 %v255_v15, %v218_v16 }
 0x118   :  { %v273_v19 = vpack.c.bf16 %v3526_v18, %v3524_v17 }
 0x11a   :  { %2969 = vmatmul.msk.bf16.vlgmr.msrb.gmra.mxu2 %vm298_vm4, %v273_v19 }
 0x11b   :  { %v220_v20 = vpop.f32.mrf.mxu0 }
 0x11c   :  { %v221_v21 = vadd.f32 %v220_v20, %v137_v59  ;;  %v250_v59 = vpop.f32.mrf.mxu3 }
 0x11d   :  { %v251_v1 = vadd.f32 %v250_v59, %v3519_v9 }
 0x11e   :  { %v3531_v25 = vadd.f32 %v255_v15, %v221_v21 }
 0x11f   :  { %v3576_v3 = vadd.f32 %v255_v15, %v251_v1 }
 0x123   :  { %v222_v23 = vpop.f32.mrf.mxu0 }
 0x124   :  { %v223_v24 = vadd.f32 %v222_v23, %v139_v60  ;;  %v3566_v60 = vadd.f32 %v255_v15, %v248_v57  ;;  %v252_v63 = vpop.f32.mrf.mxu3 }
 0x125   :  { %v253_v0 = vadd.f32 %v252_v63, %v169_v10 }
 0x126   :  { %v3533_v26 = vadd.f32 %v255_v15, %v223_v24  ;;  %v279_v62 = vpack.c.bf16 %v3566_v60, %v3568_v61 }
 0x127   :  { %v3574_v2 = vadd.f32 %v255_v15, %v253_v0 }
 0x128   :  { %v274_v27 = vpack.c.bf16 %v3533_v26, %v3531_v25 }
 0x129   :  { %v280_v4 = vpack.c.bf16 %v3574_v2, %v3576_v3 }
 0x12a   :  { %2970 = vmatmul.msk.bf16.gmra.mxu2 %vm298_vm4, %v274_v27 }
 0x13a   :  { %2971 = vmatmul.msk.bf16.gmra.mxu2 %vm298_vm4, %v275_v35 }
 0x14a   :  { %2972 = vmatmul.msk.bf16.gmra.mxu2 %vm298_vm4, %v276_v41 }
 0x15a   :  { %2973 = vmatmul.msk.bf16.gmra.mxu2 %vm298_vm4, %v277_v48 }
 0x16a   :  { %2974 = vmatmul.msk.bf16.gmra.mxu2 %vm298_vm4, %v278_v55 }
 0x17a   :  { %2975 = vmatmul.msk.bf16.gmra.mxu2 %vm298_vm4, %v279_v62 }
 0x18a   :  { %2976 = vmatmul.msk.bf16.gmra.mxu2 %vm298_vm4, %v280_v4 }
 0x19d   :  { %v332_v7 = vpop.f32.mrf.mxu2 }
 0x19e   :  { %v333_v8 = vadd.f32 %v332_v7, %v3587_v6 }
 0x1a0   :  { %v3591_v9 = vadd.f32 %v333_v8, %v3524_v17 }
 0x1a2   :  { %v388_v10 = vsel %vm298_vm4, %v3591_v9, 0.0  ;;  %v459_v11 = vmul.f32 %v3591_v9, %v3591_v9 }
 0x1a3   :  { %389 = vadd.xlane.f32.xlu0 %v388_v10 }
 0x1a4   :  { %v475_v12 = vsel %vm298_vm4, %v459_v11, 0.0 }
 0x1a5   :  { %v334_v13 = vpop.f32.mrf.mxu2  ;;  %476 = vadd.xlane.f32.xlu1 %v475_v12 }
 0x1a6   :  { %v335_v14 = vadd.f32 %v334_v13, %v3587_v6 }
 0x1a8   :  { %v3600_v15 = vadd.f32 %v335_v14, %v3526_v18 }
 0x1aa   :  { %v391_v16 = vsel %vm298_vm4, %v3600_v15, 0.0  ;;  %v460_v17 = vmul.f32 %v3600_v15, %v3600_v15 }
 0x1ab   :  { %392 = vadd.xlane.f32.xlu0 %v391_v16 }
 0x1ac   :  { %v478_v19 = vsel %vm298_vm4, %v460_v17, 0.0 }
 0x1ad   :  { %v337_v20 = vpop.f32.mrf.mxu2  ;;  %479 = vadd.xlane.f32.xlu1 %v478_v19 }
 0x1ae   :  { %v338_v21 = vadd.f32 %v337_v20, %v3587_v6 }
 0x1b0   :  { %v3609_v22 = vadd.f32 %v338_v21, %v3531_v25 }
 0x1b2   :  { %v394_v18 = vsel %vm298_vm4, %v3609_v22, 0.0  ;;  %v461_v23 = vmul.f32 %v3609_v22, %v3609_v22 }
 0x1b3   :  { %395 = vadd.xlane.f32.xlu2 %v394_v18 }
 0x1b4   :  { %v481_v24 = vsel %vm298_vm4, %v461_v23, 0.0 }
 0x1b5   :  { %v339_v27 = vpop.f32.mrf.mxu2  ;;  %482 = vadd.xlane.f32.xlu0 %v481_v24  ;;  %v3340_v24 = vmov 32.0  }
 0x1b6   :  { %v340_v28 = vadd.f32 %v339_v27, %v3587_v6  ;;  %3117 = vrcp.f32 %v3340_v24 }
 0x1b8   :  { %v3618_v29 = vadd.f32 %v340_v28, %v3533_v26 }
 0x1ba   :  { %v397_v25 = vsel %vm298_vm4, %v3618_v29, 0.0  ;;  %v462_v30 = vmul.f32 %v3618_v29, %v3618_v29 }
 0x1bb   :  { %398 = vadd.xlane.f32.xlu2 %v397_v25 }
 0x1bc   :  { %v484_v31 = vsel %vm298_vm4, %v462_v30, 0.0 }
 0x1bd   :  { %v342_v33 = vpop.f32.mrf.mxu2  ;;  %485 = vadd.xlane.f32.xlu1 %v484_v31 }
 0x1be   :  { %v343_v35 = vadd.f32 %v342_v33, %v3587_v6 }
 0x1c0   :  { %v3627_v36 = vadd.f32 %v343_v35, %v3540_v34 }
 0x1c2   :  { %v400_v26 = vsel %vm298_vm4, %v3627_v36, 0.0  ;;  %v463_v37 = vmul.f32 %v3627_v36, %v3627_v36 }
 0x1c3   :  { %401 = vadd.xlane.f32.xlu2 %v400_v26 }
 0x1c4   :  { %v487_v38 = vsel %vm298_vm4, %v463_v37, 0.0 }
 0x1c5   :  { %v344_v41 = vpop.f32.mrf.mxu2  ;;  %488 = vadd.xlane.f32.xlu1 %v487_v38 }
 0x1c6   :  { %v345_v42 = vadd.f32 %v344_v41, %v3587_v6 }
 0x1c8   :  { %v3636_v43 = vadd.f32 %v345_v42, %v3538_v32 }
 0x1ca   :  { %v403_v34 = vsel %vm298_vm4, %v3636_v43, 0.0  ;;  %v464_v44 = vmul.f32 %v3636_v43, %v3636_v43 }
 0x1cb   :  { %404 = vadd.xlane.f32.xlu0 %v403_v34 }
 0x1cc   :  { %v490_v45 = vsel %vm298_vm4, %v464_v44, 0.0 }
 0x1cd   :  { %v347_v48 = vpop.f32.mrf.mxu2  ;;  %491 = vadd.xlane.f32.xlu2 %v490_v45 }
 0x1ce   :  { %v348_v49 = vadd.f32 %v347_v48, %v3587_v6 }
 0x1d0   :  { %v3645_v50 = vadd.f32 %v348_v49, %v3547_v40 }
 0x1d2   :  { %v406_v32 = vsel %vm298_vm4, %v3645_v50, 0.0  ;;  %v465_v51 = vmul.f32 %v3645_v50, %v3645_v50 }
 0x1d3   :  { %407 = vadd.xlane.f32.xlu0 %v406_v32 }
 0x1d4   :  { %v493_v52 = vsel %vm298_vm4, %v465_v51, 0.0 }
 0x1d5   :  { %v349_v55 = vpop.f32.mrf.mxu2  ;;  %494 = vadd.xlane.f32.xlu2 %v493_v52 }
 0x1d6   :  { %v350_v56 = vadd.f32 %v349_v55, %v3587_v6 }
 0x1d8   :  { %v3654_v57 = vadd.f32 %v350_v56, %v3545_v39 }
 0x1da   :  { %v409_v40 = vsel %vm298_vm4, %v3654_v57, 0.0  ;;  %v466_v58 = vmul.f32 %v3654_v57, %v3654_v57 }
 0x1db   :  { %410 = vadd.xlane.f32.xlu1 %v409_v40 }
 0x1dc   :  { %v496_v59 = vsel %vm298_vm4, %v466_v58, 0.0 }
 0x1dd   :  { %v352_v62 = vpop.f32.mrf.mxu2  ;;  %497 = vadd.xlane.f32.xlu0 %v496_v59 }
 0x1de   :  { %v353_v63 = vadd.f32 %v352_v62, %v3587_v6 }
 0x1e0   :  { %v3663_v0 = vadd.f32 %v353_v63, %v3554_v47 }
 0x1e2   :  { %v412_v39 = vsel %vm298_vm4, %v3663_v0, 0.0  ;;  %v467_v1 = vmul.f32 %v3663_v0, %v3663_v0 }
 0x1e3   :  { %413 = vadd.xlane.f32.xlu1 %v412_v39  ;;  %v3099_v39 = vld [vmem:[%s5334_s4 + $0x18] sm:$0xff] }
 0x1e4   :  { %v499_v4 = vsel %vm298_vm4, %v467_v1, 0.0  ;;  %869 = vmatpush.bf16.msrb.mxu3 %v3099_v39  ;;  %v3759_v39 = vperm.slane %v3584_v5, 1 }
 0x1e5   :  { %v354_v7 = vpop.f32.mrf.mxu2  ;;  %500 = vadd.xlane.f32.xlu0 %v499_v4 }
 0x1e6   :  { %v355_v8 = vadd.f32 %v354_v7, %v3587_v6 }
 0x1e8   :  { %v3672_v10 = vadd.f32 %v355_v8, %v3552_v46 }
 0x1ea   :  { %v415_v47 = vsel %vm298_vm4, %v3672_v10, 0.0  ;;  %v468_v11 = vmul.f32 %v3672_v10, %v3672_v10 }
 0x1eb   :  { %416 = vadd.xlane.f32.xlu2 %v415_v47  ;;  %v3098_v47 = vld [vmem:[%s5334_s4 + $0x10] sm:$0xff] }
 0x1ec   :  { %v502_v12 = vsel %vm298_vm4, %v468_v11, 0.0  ;;  %870 = vmatpush.bf16.msrb.mxu3 %v3098_v47  ;;  %v3766_v47 = vperm.slane %v3584_v5, 2 }
 0x1ed   :  { %v357_v13 = vpop.f32.mrf.mxu2  ;;  %503 = vadd.xlane.f32.xlu1 %v502_v12 }
 0x1ee   :  { %v358_v14 = vadd.f32 %v357_v13, %v3587_v6 }
 0x1f0   :  { %v3681_v16 = vadd.f32 %v358_v14, %v3561_v54 }
 0x1f2   :  { %v418_v46 = vsel %vm298_vm4, %v3681_v16, 0.0  ;;  %v469_v17 = vmul.f32 %v3681_v16, %v3681_v16 }
 0x1f3   :  { %419 = vadd.xlane.f32.xlu2 %v418_v46 }
 0x1f4   :  { %v505_v19 = vsel %vm298_vm4, %v469_v17, 0.0 }
 0x1f5   :  { %v359_v20 = vpop.f32.mrf.mxu2  ;;  %506 = vadd.xlane.f32.xlu1 %v505_v19 }
 0x1f6   :  { %v360_v21 = vadd.f32 %v359_v20, %v3587_v6 }
 0x1f8   :  { %v3690_v18 = vadd.f32 %v360_v21, %v3559_v53  ;;  %v3118_v53 = vpop.eup %3117 }
 0x1f9   :  { %v437_v26 = vmul.f32 32.0, %v3118_v53  ;;  %vm441_vm5 = vweird.f32 %v3118_v53 }
 0x1fa   :  { %v421_v54 = vsel %vm298_vm4, %v3690_v18, 0.0  ;;  %v470_v23 = vmul.f32 %v3690_v18, %v3690_v18 }
 0x1fb   :  { %422 = vadd.xlane.f32.xlu0 %v421_v54 }
 0x1fc   :  { %v508_v27 = vsel %vm298_vm4, %v470_v23, 0.0 }
 0x1fd   :  { %v362_v28 = vpop.f32.mrf.mxu2  ;;  %509 = vadd.xlane.f32.xlu2 %v508_v27 }
 0x1fe   :  { %v363_v25 = vadd.f32 %v362_v28, %v3587_v6 }
 0x200   :  { %v3699_v30 = vadd.f32 %v363_v25, %v3568_v61  ;;  %v438_v61 = vsub.f32 1.0, %v437_v26 }
 0x202   :  { %v424_v31 = vsel %vm298_vm4, %v3699_v30, 0.0  ;;  %v471_v33 = vmul.f32 %v3699_v30, %v3699_v30  ;;  %v439_v45 = vmul.f32 %v3118_v53, %v438_v61 }
 0x203   :  { %425 = vadd.xlane.f32.xlu0 %v424_v31 }
 0x204   :  { %v511_v35 = vsel %vm298_vm4, %v471_v33, 0.0 }
 0x205   :  { %v364_v37 = vpop.f32.mrf.mxu2  ;;  %512 = vadd.xlane.f32.xlu2 %v511_v35 }
 0x206   :  { %v365_v38 = vadd.f32 %v364_v37, %v3587_v6 }
 0x208   :  { %v3708_v41 = vadd.f32 %v365_v38, %v3566_v60  ;;  %v440_v60 = vadd.f32 %v3118_v53, %v439_v45 }
 0x20a   :  { %v427_v42 = vsel %vm298_vm4, %v3708_v41, 0.0  ;;  %v472_v34 = vmul.f32 %v3708_v41, %v3708_v41  ;;  %v3724_v56 = vsel %vm441_vm5, %v3118_v53, %v440_v60 }
 0x20b   :  { %428 = vadd.xlane.f32.xlu1 %v427_v42 }
 0x20c   :  { %v514_v44 = vsel %vm298_vm4, %v472_v34, 0.0 }
 0x20d   :  { %v367_v48 = vpop.f32.mrf.mxu2  ;;  %515 = vadd.xlane.f32.xlu0 %v514_v44 }
 0x20e   :  { %v368_v49 = vadd.f32 %v367_v48, %v3587_v6 }
 0x210   :  { %v3717_v32 = vadd.f32 %v368_v49, %v3576_v3 }
 0x212   :  { %v430_v51 = vsel %vm298_vm4, %v3717_v32, 0.0  ;;  %v473_v52 = vmul.f32 %v3717_v32, %v3717_v32 }
 0x213   :  { %431 = vadd.xlane.f32.xlu1 %v430_v51 }
 0x214   :  { %v517_v55 = vsel %vm298_vm4, %v473_v52, 0.0 }
 0x215   :  { %v369_v40 = vpop.f32.mrf.mxu2  ;;  %518 = vadd.xlane.f32.xlu0 %v517_v55 }
 0x216   :  { %v370_v58 = vadd.f32 %v369_v40, %v3587_v6  ;;  %v390_v59 = vpop.xlane.xlu0 %389 }
 0x217   :  { %v443_v3 = vmul.f32 %v3724_v56, %v390_v59 }
 0x218   :  { %v3729_v62 = vadd.f32 %v370_v58, %v3574_v2  ;;  %v477_v63 = vpop.xlane.xlu1 %476 }
 0x219   :  { %v539_v1 = vmul.f32 %v443_v3, %v443_v3  ;;  %v523_v4 = vmul.f32 %v477_v63, %v3724_v56  ;;  %v571_v52 = vsub.f32 %v3591_v9, %v443_v3 }
 0x21a   :  { %v433_v7 = vsel %vm298_vm4, %v3729_v62, 0.0  ;;  %v474_v6 = vmul.f32 %v3729_v62, %v3729_v62 }
 0x21b   :  { %v555_v8 = vsub.f32 %v523_v4, %v539_v1  ;;  %434 = vadd.xlane.f32.xlu2 %v433_v7 }
 0x21c   :  { %v520_v2 = vsel %vm298_vm4, %v474_v6, 0.0 }
 0x21d   :  { %v587_v11 = vadd.f32 1e-05, %v555_v8  ;;  %521 = vadd.xlane.f32.xlu1 %v520_v2 }
 0x21e   :  { %v393_v12 = vpop.xlane.xlu0 %392 }
 0x21f   :  { %3119 = vrsqrt.f32 %v587_v11  ;;  %v444_v13 = vmul.f32 %v3724_v56, %v393_v12  ;;  %vm609_vm7 = vweird.f32 %v587_v11 }
 0x220   :  { %v480_v14 = vpop.xlane.xlu1 %479 }
 0x221   :  { %v540_v46 = vmul.f32 %v444_v13, %v444_v13  ;;  %v524_v17 = vmul.f32 %v480_v14, %v3724_v56  ;;  %v572_v6 = vsub.f32 %v3600_v15, %v444_v13 }
 0x223   :  { %v556_v19 = vsub.f32 %v524_v17, %v540_v46 }
 0x225   :  { %v3120_v20 = vpop.eup %3119  ;;  %v588_v21 = vadd.f32 1e-05, %v556_v19 }
 0x226   :  { %v604_v54 = vmul.f32 %v3120_v20, %v587_v11  ;;  %v396_v23 = vpop.xlane.xlu2 %395  ;;  %vm610_vm6 = vweird.f32 %v3120_v20 }
 0x227   :  { %3121 = vrsqrt.f32 %v588_v21  ;;  %v3746_v24 = vmul.f32 %v3724_v56, %v396_v23  ;;  %vm611_vm8 = vmor %vm609_vm7, %vm610_vm6  ;;  %vm619_vm10 = vweird.f32 %v588_v21 }
 0x228   :  { %v605_v27 = vmul.f32 %v3120_v20, %v604_v54  ;;  %v483_v28 = vpop.xlane.xlu0 %482 }
 0x229   :  { %v541_v25 = vmul.f32 %v3746_v24, %v3746_v24  ;;  %v525_v53 = vmul.f32 %v483_v28, %v3724_v56 }
 0x22a   :  { %v606_v31 = vmul.f32 0.5, %v605_v27 }
 0x22b   :  { %v557_v33 = vsub.f32 %v525_v53, %v541_v25 }
 0x22c   :  { %v607_v35 = vsub.f32 1.5, %v606_v31 }
 0x22d   :  { %v3122_v26 = vpop.eup %3121  ;;  %v589_v37 = vadd.f32 1e-05, %v557_v33 }
 0x22e   :  { %v608_v38 = vmul.f32 %v3120_v20, %v607_v35  ;;  %v614_v61 = vmul.f32 %v3122_v26, %v588_v21  ;;  %v399_v42 = vpop.xlane.xlu2 %398  ;;  %vm620_vm9 = vweird.f32 %v3122_v26 }
 0x22f   :  { %3123 = vrsqrt.f32 %v589_v37  ;;  %v3752_v34 = vmul.f32 %v3724_v56, %v399_v42  ;;  %vm621_vm11 = vmor %vm619_vm10, %vm620_vm9  ;;  %vm629_vm13 = vweird.f32 %v589_v37  ;;  %v573_v42 = vsub.f32 %v3609_v22, %v3746_v24 }
 0x230   :  { %v615_v44 = vmul.f32 %v3122_v26, %v614_v61  ;;  %v486_v45 = vpop.xlane.xlu1 %485  ;;  %v612_v60 = vsel %vm611_vm8, %v3120_v20, %v608_v38 }
 0x231   :  { %v542_v48 = vmul.f32 %v3752_v34, %v3752_v34  ;;  %v526_v49 = vmul.f32 %v486_v45, %v3724_v56  ;;  %v763_v59 = vmul.f32 %v612_v60, %v571_v52 }
 0x232   :  { %v616_v51 = vmul.f32 0.5, %v615_v44 }
 0x233   :  { %v558_v55 = vsub.f32 %v526_v49, %v542_v48  ;;  %v780_v46 = vmul.f32 %v3759_v39, %v763_v59 }
 0x234   :  { %v617_v40 = vsub.f32 1.5, %v616_v51 }
 0x235   :  { %v3124_v58 = vpop.eup %3123  ;;  %v590_v63 = vadd.f32 1e-05, %v558_v55  ;;  %v3774_v54 = vadd.f32 %v3766_v47, %v780_v46  ;;  %v574_v55 = vsub.f32 %v3618_v29, %v3752_v34 }
 0x236   :  { %v618_v1 = vmul.f32 %v3122_v26, %v617_v40  ;;  %v624_v4 = vmul.f32 %v3124_v58, %v589_v37  ;;  %v402_v7 = vpop.xlane.xlu2 %401  ;;  %vm630_vm12 = vweird.f32 %v3124_v58 }
 0x237   :  { %3125 = vrsqrt.f32 %v590_v63  ;;  %v3763_v8 = vmul.f32 %v3724_v56, %v402_v7  ;;  %vm631_vm14 = vmor %vm629_vm13, %vm630_vm12  ;;  %vm639_vm0 = vweird.f32 %v590_v63 }
 0x238   :  { %v622_v9 = vsel %vm621_vm11, %v3122_v26, %v618_v1  ;;  %v625_v3 = vmul.f32 %v3124_v58, %v624_v4  ;;  %v489_v2 = vpop.xlane.xlu1 %488 }
 0x239   :  { %v764_v11 = vmul.f32 %v622_v9, %v572_v6  ;;  %v543_v12 = vmul.f32 %v3763_v8, %v3763_v8  ;;  %v527_v14 = vmul.f32 %v489_v2, %v3724_v56 }
 0x23a   :  { %v626_v15 = vmul.f32 0.5, %v625_v3 }
 0x23b   :  { %v559_v13 = vsub.f32 %v527_v14, %v543_v12  ;;  %v781_v17 = vmul.f32 %v3759_v39, %v764_v11 }
 0x23c   :  { %v627_v19 = vsub.f32 1.5, %v626_v15 }
 0x23d   :  { %v3126_v20 = vpop.eup %3125  ;;  %v591_v21 = vadd.f32 1e-05, %v559_v13  ;;  %v3777_v5 = vadd.f32 %v3766_v47, %v781_v17 }
 0x23e   :  { %v628_v23 = vmul.f32 %v3124_v58, %v627_v19  ;;  %v634_v27 = vmul.f32 %v3126_v20, %v590_v63  ;;  %v405_v28 = vpop.xlane.xlu0 %404  ;;  %vm640_vm15 = vweird.f32 %v3126_v20 }
 0x23f   :  { %3127 = vrsqrt.f32 %v591_v21  ;;  %v3780_v25 = vmul.f32 %v3724_v56, %v405_v28  ;;  %v813_v53 = vpack.c.bf16 %v3777_v5, %v3774_v54  ;;  %vm641_vm1 = vmor %vm639_vm0, %vm640_vm15  ;;  %vm649_vm3 = vweird.f32 %v591_v21 }
 0x240   :  { %v635_v31 = vmul.f32 %v3126_v20, %v634_v27  ;;  %v492_v33 = vpop.xlane.xlu2 %491  ;;  %v632_v61 = vsel %vm631_vm14, %v3124_v58, %v628_v23 }
 0x241   :  { %v544_v35 = vmul.f32 %v3780_v25, %v3780_v25  ;;  %v528_v26 = vmul.f32 %v492_v33, %v3724_v56  ;;  %2989 = vmatmul.msk.bf16.vlgmr.msrb.gmra.mxu3 %vm298_vm4, %v813_v53  ;;  %v765_v49 = vmul.f32 %v632_v61, %v573_v42  ;;  %v575_v53 = vsub.f32 %v3627_v36, %v3763_v8 }
 0x242   :  { %v636_v38 = vmul.f32 0.5, %v635_v31 }
 0x243   :  { %v560_v44 = vsub.f32 %v528_v26, %v544_v35  ;;  %v782_v63 = vmul.f32 %v3759_v39, %v765_v49 }
 0x244   :  { %v637_v45 = vsub.f32 1.5, %v636_v38 }
 0x245   :  { %v3128_v48 = vpop.eup %3127  ;;  %v592_v37 = vadd.f32 1e-05, %v560_v44  ;;  %v3801_v2 = vadd.f32 %v3766_v47, %v782_v63  ;;  %v576_v44 = vsub.f32 %v3636_v43, %v3780_v25 }
 0x246   :  { %v638_v60 = vmul.f32 %v3126_v20, %v637_v45  ;;  %v644_v51 = vmul.f32 %v3128_v48, %v591_v21  ;;  %v408_v52 = vpop.xlane.xlu0 %407  ;;  %vm650_vm2 = vweird.f32 %v3128_v48 }
 0x247   :  { %3129 = vrsqrt.f32 %v592_v37  ;;  %v3793_v40 = vmul.f32 %v3724_v56, %v408_v52  ;;  %vm651_vm5 = vmor %vm649_vm3, %vm650_vm2  ;;  %vm659_vm7 = vweird.f32 %v592_v37 }
 0x248   :  { %v645_v58 = vmul.f32 %v3128_v48, %v644_v51  ;;  %v495_v22 = vpop.xlane.xlu2 %494  ;;  %v642_v24 = vsel %vm641_vm1, %v3126_v20, %v638_v60 }
 0x249   :  { %v545_v59 = vmul.f32 %v3793_v40, %v3793_v40  ;;  %v529_v1 = vmul.f32 %v495_v22, %v3724_v56  ;;  %v766_v4 = vmul.f32 %v642_v24, %v574_v55 }
 0x24a   :  { %v646_v7 = vmul.f32 0.5, %v645_v58 }
 0x24b   :  { %v561_v6 = vsub.f32 %v529_v1, %v545_v59  ;;  %v783_v29 = vmul.f32 %v3759_v39, %v766_v4 }
 0x24c   :  { %v647_v34 = vsub.f32 1.5, %v646_v7 }
 0x24d   :  { %v3130_v9 = vpop.eup %3129  ;;  %v593_v3 = vadd.f32 1e-05, %v561_v6  ;;  %v3804_v11 = vadd.f32 %v3766_v47, %v783_v29 }
 0x24e   :  { %v648_v12 = vmul.f32 %v3128_v48, %v647_v34  ;;  %v654_v14 = vmul.f32 %v3130_v9, %v592_v37  ;;  %v411_v46 = vpop.xlane.xlu1 %410  ;;  %vm660_vm6 = vweird.f32 %v3130_v9 }
 0x24f   :  { %3131 = vrsqrt.f32 %v593_v3  ;;  %v3807_v15 = vmul.f32 %v3724_v56, %v411_v46  ;;  %v814_v13 = vpack.c.bf16 %v3804_v11, %v3801_v2  ;;  %vm661_vm8 = vmor %vm659_vm7, %vm660_vm6  ;;  %vm669_vm10 = vweird.f32 %v593_v3 }
 0x250   :  { %v655_v17 = vmul.f32 %v3130_v9, %v654_v14  ;;  %v498_v19 = vpop.xlane.xlu0 %497  ;;  %v652_v28 = vsel %vm651_vm5, %v3128_v48, %v648_v12 }
 0x251   :  { %v546_v20 = vmul.f32 %v3807_v15, %v3807_v15  ;;  %v530_v23 = vmul.f32 %v498_v19, %v3724_v56  ;;  %2990 = vmatmul.msk.bf16.gmra.mxu3 %vm298_vm4, %v814_v13  ;;  %v767_v26 = vmul.f32 %v652_v28, %v575_v53  ;;  %v577_v13 = vsub.f32 %v3645_v50, %v3793_v40 }
 0x252   :  { %v656_v27 = vmul.f32 0.5, %v655_v17 }
 0x253   :  { %v562_v31 = vsub.f32 %v530_v23, %v546_v20  ;;  %v784_v37 = vmul.f32 %v3759_v39, %v767_v26 }
 0x254   :  { %v657_v33 = vsub.f32 1.5, %v656_v27 }
 0x255   :  { %v3132_v35 = vpop.eup %3131  ;;  %v594_v21 = vadd.f32 1e-05, %v562_v31  ;;  %v3828_v24 = vadd.f32 %v3766_v47, %v784_v37  ;;  %v578_v31 = vsub.f32 %v3654_v57, %v3807_v15 }
 0x256   :  { %v658_v38 = vmul.f32 %v3130_v9, %v657_v33  ;;  %v664_v61 = vmul.f32 %v3132_v35, %v593_v3  ;;  %v414_v42 = vpop.xlane.xlu1 %413  ;;  %vm670_vm9 = vweird.f32 %v3132_v35 }
 0x257   :  { %3133 = vrsqrt.f32 %v594_v21  ;;  %v3820_v45 = vmul.f32 %v3724_v56, %v414_v42  ;;  %vm671_vm11 = vmor %vm669_vm10, %vm670_vm9  ;;  %vm679_vm13 = vweird.f32 %v594_v21 }
 0x258   :  { %v665_v48 = vmul.f32 %v3132_v35, %v664_v61  ;;  %v501_v36 = vpop.xlane.xlu0 %500  ;;  %v662_v8 = vsel %vm661_vm8, %v3130_v9, %v658_v38 }
 0x259   :  { %v547_v49 = vmul.f32 %v3820_v45, %v3820_v45  ;;  %v531_v60 = vmul.f32 %v501_v36, %v3724_v56  ;;  %v768_v51 = vmul.f32 %v662_v8, %v576_v44 }
 0x25a   :  { %v666_v52 = vmul.f32 0.5, %v665_v48 }
 0x25b   :  { %v563_v55 = vsub.f32 %v531_v60, %v547_v49  ;;  %v785_v43 = vmul.f32 %v3759_v39, %v768_v51 }
 0x25c   :  { %v667_v25 = vsub.f32 1.5, %v666_v52 }
 0x25d   :  { %v3134_v58 = vpop.eup %3133  ;;  %v595_v22 = vadd.f32 1e-05, %v563_v55  ;;  %v3831_v59 = vadd.f32 %v3766_v47, %v785_v43 }
 0x25e   :  { %v668_v1 = vmul.f32 %v3132_v35, %v667_v25  ;;  %v674_v4 = vmul.f32 %v3134_v58, %v594_v21  ;;  %v417_v63 = vpop.xlane.xlu2 %416  ;;  %vm680_vm12 = vweird.f32 %v3134_v58 }
 0x25f   :  { %3135 = vrsqrt.f32 %v595_v22  ;;  %v3834_v7 = vmul.f32 %v3724_v56, %v417_v63  ;;  %v815_v6 = vpack.c.bf16 %v3831_v59, %v3828_v24  ;;  %vm681_vm14 = vmor %vm679_vm13, %vm680_vm12  ;;  %vm689_vm0 = vweird.f32 %v595_v22 }
 0x260   :  { %v675_v29 = vmul.f32 %v3134_v58, %v674_v4  ;;  %v504_v34 = vpop.xlane.xlu1 %503  ;;  %v672_v14 = vsel %vm671_vm11, %v3132_v35, %v668_v1 }
 0x261   :  { %v548_v9 = vmul.f32 %v3834_v7, %v3834_v7  ;;  %v532_v12 = vmul.f32 %v504_v34, %v3724_v56  ;;  %2991 = vmatmul.msk.bf16.gmra.mxu3 %vm298_vm4, %v815_v6  ;;  %v769_v23 = vmul.f32 %v672_v14, %v577_v13  ;;  %v579_v6 = vsub.f32 %v3663_v0, %v3820_v45 }
 0x262   :  { %v676_v46 = vmul.f32 0.5, %v675_v29 }
 0x263   :  { %v564_v17 = vsub.f32 %v532_v12, %v548_v9  ;;  %v786_v21 = vmul.f32 %v3759_v39, %v769_v23 }
 0x264   :  { %v677_v19 = vsub.f32 1.5, %v676_v46 }
 0x265   :  { %v3136_v20 = vpop.eup %3135  ;;  %v596_v3 = vadd.f32 1e-05, %v564_v17  ;;  %v3855_v8 = vadd.f32 %v3766_v47, %v786_v21  ;;  %v580_v17 = vsub.f32 %v3672_v10, %v3834_v7 }
 0x266   :  { %v678_v27 = vmul.f32 %v3134_v58, %v677_v19  ;;  %v684_v28 = vmul.f32 %v3136_v20, %v595_v22  ;;  %v420_v53 = vpop.xlane.xlu2 %419  ;;  %vm690_vm15 = vweird.f32 %v3136_v20 }
 0x267   :  { %3137 = vrsqrt.f32 %v596_v3  ;;  %v3847_v33 = vmul.f32 %v3724_v56, %v420_v53  ;;  %vm691_vm1 = vmor %vm689_vm0, %vm690_vm15  ;;  %vm699_vm3 = vweird.f32 %v596_v3 }
 0x268   :  { %v682_v35 = vsel %vm681_vm14, %v3134_v58, %v678_v27  ;;  %v685_v50 = vmul.f32 %v3136_v20, %v684_v28  ;;  %v507_v40 = vpop.xlane.xlu1 %506 }
 0x269   :  { %v549_v26 = vmul.f32 %v3847_v33, %v3847_v33  ;;  %v533_v38 = vmul.f32 %v507_v40, %v3724_v56  ;;  %v770_v61 = vmul.f32 %v682_v35, %v578_v31 }
 0x26a   :  { %v686_v42 = vmul.f32 0.5, %v685_v50 }
 0x26b   :  { %v565_v44 = vsub.f32 %v533_v38, %v549_v26  ;;  %v787_v57 = vmul.f32 %v3759_v39, %v770_v61 }
 0x26c   :  { %v687_v15 = vsub.f32 1.5, %v686_v42 }
 0x26d   :  { %v3138_v48 = vpop.eup %3137  ;;  %v597_v36 = vadd.f32 1e-05, %v565_v44  ;;  %v3858_v49 = vadd.f32 %v3766_v47, %v787_v57 }
 0x26e   :  { %v688_v60 = vmul.f32 %v3136_v20, %v687_v15  ;;  %v694_v51 = vmul.f32 %v3138_v48, %v596_v3  ;;  %v423_v37 = vpop.xlane.xlu0 %422  ;;  %vm700_vm2 = vweird.f32 %v3138_v48 }
 0x26f   :  { %3139 = vrsqrt.f32 %v597_v36  ;;  %v3861_v52 = vmul.f32 %v3724_v56, %v423_v37  ;;  %v816_v55 = vpack.c.bf16 %v3858_v49, %v3855_v8  ;;  %vm701_vm5 = vmor %vm699_vm3, %vm700_vm2  ;;  %vm709_vm7 = vweird.f32 %v597_v36 }
 0x270   :  { %v695_v43 = vmul.f32 %v3138_v48, %v694_v51  ;;  %v510_v25 = vpop.xlane.xlu2 %509  ;;  %v692_v4 = vsel %vm691_vm1, %v3136_v20, %v688_v60 }
 0x271   :  { %v550_v58 = vmul.f32 %v3861_v52, %v3861_v52  ;;  %v534_v1 = vmul.f32 %v510_v25, %v3724_v56  ;;  %2992 = vmatmul.msk.bf16.gmra.mxu3 %vm298_vm4, %v816_v55  ;;  %v771_v12 = vmul.f32 %v692_v4, %v579_v6  ;;  %v581_v55 = vsub.f32 %v3681_v16, %v3847_v33 }
 0x272   :  { %v696_v63 = vmul.f32 0.5, %v695_v43 }
 0x273   :  { %v566_v29 = vsub.f32 %v534_v1, %v550_v58  ;;  %v788_v3 = vmul.f32 %v3759_v39, %v771_v12 }
 0x274   :  { %v697_v34 = vsub.f32 1.5, %v696_v63 }
 0x275   :  { %v3140_v9 = vpop.eup %3139  ;;  %v598_v22 = vadd.f32 1e-05, %v566_v29  ;;  %v3882_v40 = vadd.f32 %v3766_v47, %v788_v3  ;;  %v582_v29 = vsub.f32 %v3690_v18, %v3861_v52 }
 0x276   :  { %v698_v14 = vmul.f32 %v3138_v48, %v697_v34  ;;  %v704_v46 = vmul.f32 %v3140_v9, %v597_v36  ;;  %v426_v13 = vpop.xlane.xlu0 %425  ;;  %vm710_vm6 = vweird.f32 %v3140_v9 }
 0x277   :  { %3141 = vrsqrt.f32 %v598_v22  ;;  %v3874_v19 = vmul.f32 %v3724_v56, %v426_v13  ;;  %vm711_vm8 = vmor %vm709_vm7, %vm710_vm6  ;;  %vm719_vm10 = vweird.f32 %v598_v22 }
 0x278   :  { %v702_v20 = vsel %vm701_vm5, %v3138_v48, %v698_v14  ;;  %v705_v0 = vmul.f32 %v3140_v9, %v704_v46  ;;  %v513_v45 = vpop.xlane.xlu2 %512 }
 0x279   :  { %v551_v23 = vmul.f32 %v3874_v19, %v3874_v19  ;;  %v535_v27 = vmul.f32 %v513_v45, %v3724_v56  ;;  %v772_v28 = vmul.f32 %v702_v20, %v580_v17 }
 0x27a   :  { %v706_v53 = vmul.f32 0.5, %v705_v0 }
 0x27b   :  { %v567_v31 = vsub.f32 %v535_v27, %v551_v23  ;;  %v789_v10 = vmul.f32 %v3759_v39, %v772_v28 }
 0x27c   :  { %v707_v7 = vsub.f32 1.5, %v706_v53 }
 0x27d   :  { %v3142_v35 = vpop.eup %3141  ;;  %v599_v50 = vadd.f32 1e-05, %v567_v31  ;;  %v3885_v26 = vadd.f32 %v3766_v47, %v789_v10 }
 0x27e   :  { %v708_v38 = vmul.f32 %v3140_v9, %v707_v7  ;;  %v714_v61 = vmul.f32 %v3142_v35, %v598_v22  ;;  %v429_v21 = vpop.xlane.xlu1 %428  ;;  %vm720_vm9 = vweird.f32 %v3142_v35 }
 0x27f   :  { %3143 = vrsqrt.f32 %v599_v50  ;;  %v3888_v42 = vmul.f32 %v3724_v56, %v429_v21  ;;  %v817_v44 = vpack.c.bf16 %v3885_v26, %v3882_v40  ;;  %vm721_vm11 = vmor %vm719_vm10, %vm720_vm9  ;;  %vm729_vm13 = vweird.f32 %v599_v50 }
 0x280   :  { %v715_v57 = vmul.f32 %v3142_v35, %v714_v61  ;;  %v516_v15 = vpop.xlane.xlu0 %515  ;;  %v712_v51 = vsel %vm711_vm8, %v3140_v9, %v708_v38  ;;  %v3101_v61 = vld [vmem:[%s5334_s4 + $0x28] sm:$0xff] }
 0x281   :  { %v552_v48 = vmul.f32 %v3888_v42, %v3888_v42  ;;  %v536_v60 = vmul.f32 %v516_v15, %v3724_v56  ;;  %2993 = vmatmul.msk.bf16.gmra.mxu3 %vm298_vm4, %v817_v44  ;;  %v773_v1 = vmul.f32 %v712_v51, %v581_v55  ;;  %984 = vmatpush.bf16.msrb.mxu1 %v3101_v61 }
 0x282   :  { %v716_v37 = vmul.f32 0.5, %v715_v57  ;;  %v583_v57 = vsub.f32 %v3699_v30, %v3874_v19 }
 0x283   :  { %v568_v43 = vsub.f32 %v536_v60, %v552_v48  ;;  %v790_v22 = vmul.f32 %v3759_v39, %v773_v1 }
 0x284   :  { %v717_v25 = vsub.f32 1.5, %v716_v37 }
 0x285   :  { %v3144_v58 = vpop.eup %3143  ;;  %v600_v36 = vadd.f32 1e-05, %v568_v43  ;;  %v3909_v45 = vadd.f32 %v3766_v47, %v790_v22  ;;  %v584_v43 = vsub.f32 %v3708_v41, %v3888_v42 }
 0x286   :  { %v718_v4 = vmul.f32 %v3142_v35, %v717_v25  ;;  %v724_v63 = vmul.f32 %v3144_v58, %v599_v50  ;;  %v432_v6 = vpop.xlane.xlu1 %431  ;;  %vm730_vm12 = vweird.f32 %v3144_v58 }
 0x287   :  { %3145 = vrsqrt.f32 %v600_v36  ;;  %v3901_v34 = vmul.f32 %v3724_v56, %v432_v6  ;;  %vm731_vm14 = vmor %vm729_vm13, %vm730_vm12  ;;  %vm739_vm0 = vweird.f32 %v600_v36 }
 0x288   :  { %v722_v9 = vsel %vm721_vm11, %v3142_v35, %v718_v4  ;;  %v725_v16 = vmul.f32 %v3144_v58, %v724_v63  ;;  %v519_v33 = vpop.xlane.xlu0 %518 }
 0x289   :  { %v553_v12 = vmul.f32 %v3901_v34, %v3901_v34  ;;  %v537_v14 = vmul.f32 %v519_v33, %v3724_v56  ;;  %v774_v46 = vmul.f32 %v722_v9, %v582_v29 }
 0x28a   :  { %v726_v13 = vmul.f32 0.5, %v725_v16 }
 0x28b   :  { %v569_v17 = vsub.f32 %v537_v14, %v553_v12  ;;  %v791_v18 = vmul.f32 %v3759_v39, %v774_v46  ;;  %v585_v14 = vsub.f32 %v3717_v32, %v3901_v34 }
 0x28c   :  { %v727_v52 = vsub.f32 1.5, %v726_v13 }
 0x28d   :  { %v3146_v20 = vpop.eup %3145  ;;  %v601_v0 = vadd.f32 1e-05, %v569_v17  ;;  %v3912_v23 = vadd.f32 %v3766_v47, %v791_v18  ;;  %v3100_v18 = vld [vmem:[%s5334_s4 + $0x20] sm:$0xff] }
 0x28e   :  { %v728_v27 = vmul.f32 %v3144_v58, %v727_v52  ;;  %v734_v28 = vmul.f32 %v3146_v20, %v600_v36  ;;  %v435_v3 = vpop.xlane.xlu2 %434  ;;  %vm740_vm15 = vweird.f32 %v3146_v20  ;;  %985 = vmatpush.bf16.msrb.mxu1 %v3100_v18 }
 0x28f   :  { %3147 = vrsqrt.f32 %v601_v0  ;;  %v458_v53 = vmul.f32 %v3724_v56, %v435_v3  ;;  %v818_v31 = vpack.c.bf16 %v3912_v23, %v3909_v45  ;;  %vm741_vm1 = vmor %vm739_vm0, %vm740_vm15  ;;  %vm749_vm3 = vweird.f32 %v601_v0  ;;  %v3957_v3 = vld [vmem:[%s5335_s5] sm:$0xff] }
 0x290   :  { %v735_v10 = vmul.f32 %v3146_v20, %v734_v28  ;;  %v522_v7 = vpop.xlane.xlu1 %521  ;;  %v732_v21 = vsel %vm731_vm14, %v3144_v58, %v728_v27 }
 0x291   :  { %v554_v35 = vmul.f32 %v458_v53, %v458_v53  ;;  %v538_v38 = vmul.f32 %v522_v7, %v3724_v56  ;;  %2994 = vmatmul.msk.bf16.gmra.mxu3 %vm298_vm4, %v818_v31  ;;  %v775_v51 = vmul.f32 %v732_v21, %v583_v57  ;;  %v586_v17 = vsub.f32 %v3729_v62, %v458_v53 }
 0x292   :  { %v736_v44 = vmul.f32 0.5, %v735_v10  ;;  %v826_v53 = vperm.slane %v3957_v3, 3 }
 0x293   :  { %v570_v15 = vsub.f32 %v538_v38, %v554_v35  ;;  %v792_v30 = vmul.f32 %v3759_v39, %v775_v51 }
 0x294   :  { %v737_v50 = vsub.f32 1.5, %v736_v44 }
 0x295   :  { %v3148_v48 = vpop.eup %3147  ;;  %v602_v60 = vadd.f32 1e-05, %v570_v15  ;;  %v3929_v29 = vadd.f32 %v3766_v47, %v792_v30 }
 0x296   :  { %v738_v37 = vmul.f32 %v3146_v20, %v737_v50  ;;  %v744_v55 = vmul.f32 %v3148_v48, %v601_v0  ;;  %vm750_vm2 = vweird.f32 %v3148_v48 }
 0x297   :  { %3149 = vrsqrt.f32 %v602_v60  ;;  %vm751_vm5 = vmor %vm749_vm3, %vm750_vm2  ;;  %vm759_vm7 = vweird.f32 %v602_v60 }
 0x298   :  { %v742_v25 = vsel %vm741_vm1, %v3146_v20, %v738_v37  ;;  %v745_v58 = vmul.f32 %v3148_v48, %v744_v55 }
 0x299   :  { %v776_v1 = vmul.f32 %v742_v25, %v584_v43 }
 0x29a   :  { %v746_v19 = vmul.f32 0.5, %v745_v58 }
 0x29b   :  { %v793_v4 = vmul.f32 %v3759_v39, %v776_v1 }
 0x29c   :  { %v747_v63 = vsub.f32 1.5, %v746_v19 }
 0x29d   :  { %v3150_v6 = vpop.eup %3149  ;;  %v3932_v36 = vadd.f32 %v3766_v47, %v793_v4 }
 0x29e   :  { %v748_v9 = vmul.f32 %v3148_v48, %v747_v63  ;;  %v754_v41 = vmul.f32 %v3150_v6, %v602_v60  ;;  %vm760_vm6 = vweird.f32 %v3150_v6 }
 0x29f   :  { %v819_v42 = vpack.c.bf16 %v3932_v36, %v3929_v29  ;;  %vm761_vm8 = vmor %vm759_vm7, %vm760_vm6 }
 0x2a0   :  { %v755_v16 = vmul.f32 %v3150_v6, %v754_v41  ;;  %v752_v33 = vsel %vm751_vm5, %v3148_v48, %v748_v9 }
 0x2a1   :  { %2995 = vmatmul.msk.bf16.gmra.mxu3 %vm298_vm4, %v819_v42  ;;  %v777_v22 = vmul.f32 %v752_v33, %v585_v14 }
 0x2a2   :  { %v756_v12 = vmul.f32 0.5, %v755_v16 }
 0x2a3   :  { %v794_v0 = vmul.f32 %v3759_v39, %v777_v22 }
 0x2a4   :  { %v757_v46 = vsub.f32 1.5, %v756_v12 }
 0x2a5   :  { %v3946_v32 = vadd.f32 %v3766_v47, %v794_v0 }
 0x2a6   :  { %v758_v13 = vmul.f32 %v3150_v6, %v757_v46 }
 0x2a8   :  { %v762_v52 = vsel %vm761_vm8, %v3150_v6, %v758_v13 }
 0x2a9   :  { %v778_v20 = vmul.f32 %v762_v52, %v586_v17 }
 0x2ab   :  { %v795_v27 = vmul.f32 %v3759_v39, %v778_v20 }
 0x2ad   :  { %v3949_v34 = vadd.f32 %v3766_v47, %v795_v27 }
 0x2af   :  { %v820_v62 = vpack.c.bf16 %v3949_v34, %v3946_v32 }
 0x2b1   :  { %2996 = vmatmul.msk.bf16.gmra.mxu3 %vm298_vm4, %v820_v62 }
 0x2c4   :  { %v872_v28 = vpop.f32.mrf.mxu3 }
 0x2c5   :  { %v873_v39 = vadd.f32 %v872_v28, %v826_v53 }
 0x2c7   :  { %v912_v7 = vmax.f32 %v873_v39, 0.0 }
 0x2cc   :  { %v874_v31 = vpop.f32.mrf.mxu3 }
 0x2cd   :  { %v875_v10 = vadd.f32 %v874_v31, %v826_v53 }
 0x2cf   :  { %v913_v35 = vmax.f32 %v875_v10, 0.0 }
 0x2d1   :  { %v928_v47 = vpack.c.bf16 %v913_v35, %v912_v7 }
 0x2d3   :  { %3009 = vmatmul.msk.bf16.vlgmr.msrb.gmra.mxu1 %vm298_vm4, %v928_v47 }
 0x2d4   :  { %v877_v38 = vpop.f32.mrf.mxu3 }
 0x2d5   :  { %v878_v61 = vadd.f32 %v877_v38, %v826_v53 }
 0x2d7   :  { %v914_v57 = vmax.f32 %v878_v61, 0.0 }
 0x2dc   :  { %v879_v21 = vpop.f32.mrf.mxu3 }
 0x2dd   :  { %v880_v44 = vadd.f32 %v879_v21, %v826_v53 }
 0x2df   :  { %v915_v15 = vmax.f32 %v880_v44, 0.0 }
 0x2e1   :  { %v929_v50 = vpack.c.bf16 %v915_v15, %v914_v57  ;;  %v3969_v57 = vperm.slane %v3957_v3, 4 }
 0x2e3   :  { %3010 = vmatmul.msk.bf16.gmra.mxu1 %vm298_vm4, %v929_v50 }
 0x2e4   :  { %v882_v48 = vpop.f32.mrf.mxu3 }
 0x2e5   :  { %v883_v60 = vadd.f32 %v882_v48, %v826_v53 }
 0x2e7   :  { %v916_v55 = vmax.f32 %v883_v60, 0.0 }
 0x2ec   :  { %v884_v51 = vpop.f32.mrf.mxu3 }
 0x2ed   :  { %v885_v37 = vadd.f32 %v884_v51, %v826_v53 }
 0x2ef   :  { %v917_v43 = vmax.f32 %v885_v37, 0.0 }
 0x2f1   :  { %v930_v25 = vpack.c.bf16 %v917_v43, %v916_v55 }
 0x2f3   :  { %3011 = vmatmul.msk.bf16.gmra.mxu1 %vm298_vm4, %v930_v25 }
 0x2f4   :  { %v887_v58 = vpop.f32.mrf.mxu3 }
 0x2f5   :  { %v888_v1 = vadd.f32 %v887_v58, %v826_v53 }
 0x2f7   :  { %v918_v4 = vmax.f32 %v888_v1, 0.0 }
 0x2fc   :  { %v889_v30 = vpop.f32.mrf.mxu3 }
 0x2fd   :  { %v890_v19 = vadd.f32 %v889_v30, %v826_v53 }
 0x2ff   :  { %v919_v63 = vmax.f32 %v890_v19, 0.0 }
 0x301   :  { %v931_v6 = vpack.c.bf16 %v919_v63, %v918_v4 }
 0x303   :  { %3012 = vmatmul.msk.bf16.gmra.mxu1 %vm298_vm4, %v931_v6 }
 0x304   :  { %v892_v9 = vpop.f32.mrf.mxu3 }
 0x305   :  { %v893_v41 = vadd.f32 %v892_v9, %v826_v53 }
 0x307   :  { %v920_v33 = vmax.f32 %v893_v41, 0.0 }
 0x30c   :  { %v894_v42 = vpop.f32.mrf.mxu3 }
 0x30d   :  { %v895_v16 = vadd.f32 %v894_v42, %v826_v53 }
 0x30f   :  { %v921_v12 = vmax.f32 %v895_v16, 0.0 }
 0x311   :  { %v932_v14 = vpack.c.bf16 %v921_v12, %v920_v33 }
 0x313   :  { %3013 = vmatmul.msk.bf16.gmra.mxu1 %vm298_vm4, %v932_v14 }
 0x314   :  { %v897_v46 = vpop.f32.mrf.mxu3 }
 0x315   :  { %v898_v22 = vadd.f32 %v897_v46, %v826_v53 }
 0x317   :  { %v922_v18 = vmax.f32 %v898_v22, 0.0 }
 0x31c   :  { %v899_v13 = vpop.f32.mrf.mxu3 }
 0x31d   :  { %v900_v17 = vadd.f32 %v899_v13, %v826_v53 }
 0x31f   :  { %v923_v52 = vmax.f32 %v900_v17, 0.0 }
 0x321   :  { %v933_v20 = vpack.c.bf16 %v923_v52, %v922_v18 }
 0x323   :  { %3014 = vmatmul.msk.bf16.gmra.mxu1 %vm298_vm4, %v933_v20 }
 0x324   :  { %v902_v0 = vpop.f32.mrf.mxu3 }
 0x325   :  { %v903_v27 = vadd.f32 %v902_v0, %v826_v53 }
 0x327   :  { %v924_v39 = vmax.f32 %v903_v27, 0.0 }
 0x32c   :  { %v904_v62 = vpop.f32.mrf.mxu3 }
 0x32d   :  { %v905_v28 = vadd.f32 %v904_v62, %v826_v53 }
 0x32f   :  { %v925_v31 = vmax.f32 %v905_v28, 0.0 }
 0x331   :  { %v934_v10 = vpack.c.bf16 %v925_v31, %v924_v39 }
 0x333   :  { %3015 = vmatmul.msk.bf16.gmra.mxu1 %vm298_vm4, %v934_v10 }
 0x334   :  { %v907_v7 = vpop.f32.mrf.mxu3 }
 0x335   :  { %v908_v35 = vadd.f32 %v907_v7, %v826_v53 }
 0x337   :  { %v926_v61 = vmax.f32 %v908_v35, 0.0 }
 0x33c   :  { %v909_v47 = vpop.f32.mrf.mxu3 }
 0x33d   :  { %v910_v38 = vadd.f32 %v909_v47, %v826_v53 }
 0x33f   :  { %v927_v21 = vmax.f32 %v910_v38, 0.0 }
 0x341   :  { %v935_v44 = vpack.c.bf16 %v927_v21, %v926_v61 }
 0x343   :  { %3016 = vmatmul.msk.bf16.gmra.mxu1 %vm298_vm4, %v935_v44 }
 0x350   :  { %v987_v15 = vpop.f32.mrf.mxu1 }
 0x351   :  { %v988_v50 = vadd.f32 %v987_v15, %v3969_v57 }
 0x353   :  { %v3973_v48 = vadd.f32 %v988_v50, %v3774_v54 }
 0x355   :  { %v1043_v60 = vsel %vm298_vm4, %v3973_v48, 0.0  ;;  %v1107_v53 = vmul.f32 %v3973_v48, %v3973_v48 }
 0x356   :  { %1044 = vadd.xlane.f32.xlu2 %v1043_v60 }
 0x357   :  { %v1123_v51 = vsel %vm298_vm4, %v1107_v53, 0.0 }
 0x358   :  { %v989_v37 = vpop.f32.mrf.mxu1  ;;  %1124 = vadd.xlane.f32.xlu1 %v1123_v51 }
 0x359   :  { %v990_v55 = vadd.f32 %v989_v37, %v3969_v57 }
 0x35b   :  { %v3982_v43 = vadd.f32 %v990_v55, %v3777_v5 }
 0x35d   :  { %v1046_v54 = vsel %vm298_vm4, %v3982_v43, 0.0  ;;  %v1108_v25 = vmul.f32 %v3982_v43, %v3982_v43 }
 0x35e   :  { %1047 = vadd.xlane.f32.xlu0 %v1046_v54 }
 0x35f   :  { %v1126_v58 = vsel %vm298_vm4, %v1108_v25, 0.0 }
 0x360   :  { %1127 = vadd.xlane.f32.xlu2 %v1126_v58  ;;  %v992_v1 = vpop.f32.mrf.mxu1 }
 0x361   :  { %v993_v30 = vadd.f32 %v992_v1, %v3969_v57 }
 0x363   :  { %v3991_v19 = vadd.f32 %v993_v30, %v3801_v2 }
 0x365   :  { %v1049_v5 = vsel %vm298_vm4, %v3991_v19, 0.0  ;;  %v1109_v4 = vmul.f32 %v3991_v19, %v3991_v19 }
 0x366   :  { %1050 = vadd.xlane.f32.xlu0 %v1049_v5 }
 0x367   :  { %v1129_v63 = vsel %vm298_vm4, %v1109_v4, 0.0 }
 0x368   :  { %v994_v6 = vpop.f32.mrf.mxu1  ;;  %1130 = vadd.xlane.f32.xlu2 %v1129_v63 }
 0x369   :  { %v995_v9 = vadd.f32 %v994_v6, %v3969_v57 }
 0x36b   :  { %v4000_v41 = vadd.f32 %v995_v9, %v3804_v11 }
 0x36d   :  { %v1052_v2 = vsel %vm298_vm4, %v4000_v41, 0.0  ;;  %v1110_v42 = vmul.f32 %v4000_v41, %v4000_v41 }
 0x36e   :  { %1053 = vadd.xlane.f32.xlu1 %v1052_v2 }
 0x36f   :  { %v1132_v16 = vsel %vm298_vm4, %v1110_v42, 0.0 }
 0x370   :  { %1133 = vadd.xlane.f32.xlu0 %v1132_v16  ;;  %v997_v33 = vpop.f32.mrf.mxu1 }
 0x371   :  { %v998_v12 = vadd.f32 %v997_v33, %v3969_v57 }
 0x373   :  { %v4009_v14 = vadd.f32 %v998_v12, %v3828_v24 }
 0x375   :  { %v1055_v11 = vsel %vm298_vm4, %v4009_v14, 0.0  ;;  %v1111_v46 = vmul.f32 %v4009_v14, %v4009_v14 }
 0x376   :  { %1056 = vadd.xlane.f32.xlu1 %v1055_v11 }
 0x377   :  { %v1135_v22 = vsel %vm298_vm4, %v1111_v46, 0.0 }
 0x378   :  { %v999_v13 = vpop.f32.mrf.mxu1  ;;  %1136 = vadd.xlane.f32.xlu0 %v1135_v22 }
 0x379   :  { %v1000_v17 = vadd.f32 %v999_v13, %v3969_v57 }
 0x37b   :  { %v4018_v18 = vadd.f32 %v1000_v17, %v3831_v59 }
 0x37d   :  { %v1058_v24 = vsel %vm298_vm4, %v4018_v18, 0.0  ;;  %v1112_v52 = vmul.f32 %v4018_v18, %v4018_v18 }
 0x37e   :  { %1059 = vadd.xlane.f32.xlu2 %v1058_v24 }
 0x37f   :  { %v1138_v20 = vsel %vm298_vm4, %v1112_v52, 0.0 }
 0x380   :  { %1139 = vadd.xlane.f32.xlu1 %v1138_v20  ;;  %v1002_v0 = vpop.f32.mrf.mxu1 }
 0x381   :  { %v1003_v27 = vadd.f32 %v1002_v0, %v3969_v57 }
 0x383   :  { %v4027_v62 = vadd.f32 %v1003_v27, %v3855_v8 }
 0x385   :  { %v1061_v59 = vsel %vm298_vm4, %v4027_v62, 0.0  ;;  %v1113_v28 = vmul.f32 %v4027_v62, %v4027_v62 }
 0x386   :  { %1062 = vadd.xlane.f32.xlu2 %v1061_v59 }
 0x387   :  { %v1141_v39 = vsel %vm298_vm4, %v1113_v28, 0.0 }
 0x388   :  { %v1004_v31 = vpop.f32.mrf.mxu1  ;;  %1142 = vadd.xlane.f32.xlu1 %v1141_v39 }
 0x389   :  { %v1005_v10 = vadd.f32 %v1004_v31, %v3969_v57 }
 0x38b   :  { %v4036_v7 = vadd.f32 %v1005_v10, %v3858_v49  ;;  %v3103_v10 = vld [vmem:[%s5334_s4 + $0x38] sm:$0xff] }
 0x38c   :  { %1519 = vmatpush.bf16.msra.mxu0 %v3103_v10 }
 0x38d   :  { %v1064_v8 = vsel %vm298_vm4, %v4036_v7, 0.0  ;;  %v1114_v35 = vmul.f32 %v4036_v7, %v4036_v7 }
 0x38e   :  { %1065 = vadd.xlane.f32.xlu0 %v1064_v8 }
 0x38f   :  { %v1144_v47 = vsel %vm298_vm4, %v1114_v35, 0.0 }
 0x390   :  { %1145 = vadd.xlane.f32.xlu2 %v1144_v47  ;;  %v1007_v38 = vpop.f32.mrf.mxu1 }
 0x391   :  { %v1008_v61 = vadd.f32 %v1007_v38, %v3969_v57 }
 0x393   :  { %v4045_v21 = vadd.f32 %v1008_v61, %v3882_v40  ;;  %v3102_v61 = vld [vmem:[%s5334_s4 + $0x30] sm:$0xff] }
 0x394   :  { %1520 = vmatpush.bf16.msra.mxu0 %v3102_v61  ;;  %v4146_v61 = vperm.slane %v3957_v3, 6 }
 0x395   :  { %v1067_v49 = vsel %vm298_vm4, %v4045_v21, 0.0  ;;  %v1115_v44 = vmul.f32 %v4045_v21, %v4045_v21 }
 0x396   :  { %1068 = vadd.xlane.f32.xlu0 %v1067_v49 }
 0x397   :  { %v1147_v15 = vsel %vm298_vm4, %v1115_v44, 0.0 }
 0x398   :  { %v1009_v50 = vpop.f32.mrf.mxu1  ;;  %1148 = vadd.xlane.f32.xlu2 %v1147_v15 }
 0x399   :  { %v1010_v60 = vadd.f32 %v1009_v50, %v3969_v57 }
 0x39b   :  { %v4054_v53 = vadd.f32 %v1010_v60, %v3885_v26 }
 0x39d   :  { %v1070_v40 = vsel %vm298_vm4, %v4054_v53, 0.0  ;;  %v1116_v51 = vmul.f32 %v4054_v53, %v4054_v53 }
 0x39e   :  { %1071 = vadd.xlane.f32.xlu1 %v1070_v40 }
 0x39f   :  { %v1150_v37 = vsel %vm298_vm4, %v1116_v51, 0.0 }
 0x3a0   :  { %1151 = vadd.xlane.f32.xlu0 %v1150_v37  ;;  %v1012_v55 = vpop.f32.mrf.mxu1 }
 0x3a1   :  { %v1013_v54 = vadd.f32 %v1012_v55, %v3969_v57 }
 0x3a3   :  { %v4063_v25 = vadd.f32 %v1013_v54, %v3909_v45 }
 0x3a5   :  { %v1073_v26 = vsel %vm298_vm4, %v4063_v25, 0.0  ;;  %v1117_v58 = vmul.f32 %v4063_v25, %v4063_v25 }
 0x3a6   :  { %1074 = vadd.xlane.f32.xlu1 %v1073_v26 }
 0x3a7   :  { %v1153_v1 = vsel %vm298_vm4, %v1117_v58, 0.0 }
 0x3a8   :  { %v1014_v30 = vpop.f32.mrf.mxu1  ;;  %1154 = vadd.xlane.f32.xlu0 %v1153_v1 }
 0x3a9   :  { %v1015_v5 = vadd.f32 %v1014_v30, %v3969_v57 }
 0x3ab   :  { %v4072_v4 = vadd.f32 %v1015_v5, %v3912_v23 }
 0x3ad   :  { %v1076_v45 = vsel %vm298_vm4, %v4072_v4, 0.0  ;;  %v1118_v63 = vmul.f32 %v4072_v4, %v4072_v4 }
 0x3ae   :  { %1077 = vadd.xlane.f32.xlu2 %v1076_v45 }
 0x3af   :  { %v1156_v6 = vsel %vm298_vm4, %v1118_v63, 0.0 }
 0x3b0   :  { %1157 = vadd.xlane.f32.xlu1 %v1156_v6  ;;  %v1017_v9 = vpop.f32.mrf.mxu1 }
 0x3b1   :  { %v1018_v2 = vadd.f32 %v1017_v9, %v3969_v57 }
 0x3b3   :  { %v4081_v42 = vadd.f32 %v1018_v2, %v3929_v29 }
 0x3b5   :  { %v1079_v23 = vsel %vm298_vm4, %v4081_v42, 0.0  ;;  %v1119_v16 = vmul.f32 %v4081_v42, %v4081_v42 }
 0x3b6   :  { %1080 = vadd.xlane.f32.xlu2 %v1079_v23 }
 0x3b7   :  { %v1159_v33 = vsel %vm298_vm4, %v1119_v16, 0.0 }
 0x3b8   :  { %v1019_v12 = vpop.f32.mrf.mxu1  ;;  %1160 = vadd.xlane.f32.xlu1 %v1159_v33 }
 0x3b9   :  { %v1020_v11 = vadd.f32 %v1019_v12, %v3969_v57 }
 0x3bb   :  { %v4090_v46 = vadd.f32 %v1020_v11, %v3932_v36 }
 0x3bd   :  { %v1082_v29 = vsel %vm298_vm4, %v4090_v46, 0.0  ;;  %v1120_v22 = vmul.f32 %v4090_v46, %v4090_v46 }
 0x3be   :  { %1083 = vadd.xlane.f32.xlu0 %v1082_v29 }
 0x3bf   :  { %v1162_v13 = vsel %vm298_vm4, %v1120_v22, 0.0 }
 0x3c0   :  { %1163 = vadd.xlane.f32.xlu2 %v1162_v13  ;;  %v1022_v17 = vpop.f32.mrf.mxu1 }
 0x3c1   :  { %v1023_v24 = vadd.f32 %v1022_v17, %v3969_v57 }
 0x3c3   :  { %v4099_v52 = vadd.f32 %v1023_v24, %v3946_v32 }
 0x3c5   :  { %v1085_v36 = vsel %vm298_vm4, %v4099_v52, 0.0  ;;  %v1121_v20 = vmul.f32 %v4099_v52, %v4099_v52 }
 0x3c6   :  { %1086 = vadd.xlane.f32.xlu0 %v1085_v36 }
 0x3c7   :  { %v1165_v0 = vsel %vm298_vm4, %v1121_v20, 0.0 }
 0x3c8   :  { %v1024_v27 = vpop.f32.mrf.mxu1  ;;  %1166 = vadd.xlane.f32.xlu2 %v1165_v0 }
 0x3c9   :  { %v1025_v59 = vadd.f32 %v1024_v27, %v3969_v57  ;;  %v1045_v28 = vpop.xlane.xlu2 %1044 }
 0x3ca   :  { %v1091_v39 = vmul.f32 %v1045_v28, %v3724_v56  ;;  %v4139_v28 = vperm.slane %v3957_v3, 5 }
 0x3cb   :  { %v4109_v31 = vadd.f32 %v1025_v59, %v3949_v34  ;;  %v1125_v32 = vpop.xlane.xlu1 %1124 }
 0x3cc   :  { %v1187_v8 = vmul.f32 %v1091_v39, %v1091_v39  ;;  %v1171_v35 = vmul.f32 %v1125_v32, %v3724_v56  ;;  %v1219_v20 = vsub.f32 %v3973_v48, %v1091_v39 }
 0x3cd   :  { %v1088_v47 = vsel %vm298_vm4, %v4109_v31, 0.0  ;;  %v1122_v57 = vmul.f32 %v4109_v31, %v4109_v31 }
 0x3ce   :  { %v1203_v38 = vsub.f32 %v1171_v35, %v1187_v8  ;;  %1089 = vadd.xlane.f32.xlu1 %v1088_v47 }
 0x3cf   :  { %v1168_v34 = vsel %vm298_vm4, %v1122_v57, 0.0 }
 0x3d0   :  { %v1235_v49 = vadd.f32 1e-05, %v1203_v38  ;;  %1169 = vadd.xlane.f32.xlu0 %v1168_v34 }
 0x3d1   :  { %v1048_v44 = vpop.xlane.xlu0 %1047 }
 0x3d2   :  { %3151 = vrsqrt.f32 %v1235_v49  ;;  %v1092_v15 = vmul.f32 %v1048_v44, %v3724_v56  ;;  %vm1257_vm10 = vweird.f32 %v1235_v49 }
 0x3d3   :  { %v1128_v50 = vpop.xlane.xlu2 %1127 }
 0x3d4   :  { %v1188_v60 = vmul.f32 %v1092_v15, %v1092_v15  ;;  %v1172_v40 = vmul.f32 %v1128_v50, %v3724_v56  ;;  %v1220_v57 = vsub.f32 %v3982_v43, %v1092_v15 }
 0x3d6   :  { %v1204_v51 = vsub.f32 %v1172_v40, %v1188_v60 }
 0x3d8   :  { %v3152_v37 = vpop.eup %3151  ;;  %v1236_v55 = vadd.f32 1e-05, %v1204_v51 }
 0x3d9   :  { %v1252_v54 = vmul.f32 %v3152_v37, %v1235_v49  ;;  %v1051_v26 = vpop.xlane.xlu0 %1050  ;;  %vm1258_vm9 = vweird.f32 %v3152_v37 }
 0x3da   :  { %3153 = vrsqrt.f32 %v1236_v55  ;;  %v4126_v58 = vmul.f32 %v1051_v26, %v3724_v56  ;;  %vm1259_vm11 = vmor %vm1257_vm10, %vm1258_vm9  ;;  %vm1267_vm13 = vweird.f32 %v1236_v55 }
 0x3db   :  { %v1253_v1 = vmul.f32 %v3152_v37, %v1252_v54  ;;  %v1131_v30 = vpop.xlane.xlu2 %1130 }
 0x3dc   :  { %v1189_v5 = vmul.f32 %v4126_v58, %v4126_v58  ;;  %v1173_v45 = vmul.f32 %v1131_v30, %v3724_v56 }
 0x3dd   :  { %v1254_v63 = vmul.f32 0.5, %v1253_v1 }
 0x3de   :  { %v1205_v6 = vsub.f32 %v1173_v45, %v1189_v5 }
 0x3df   :  { %v1255_v9 = vsub.f32 1.5, %v1254_v63 }
 0x3e0   :  { %v3154_v2 = vpop.eup %3153  ;;  %v1237_v23 = vadd.f32 1e-05, %v1205_v6 }
 0x3e1   :  { %v1256_v16 = vmul.f32 %v3152_v37, %v1255_v9  ;;  %v1262_v33 = vmul.f32 %v3154_v2, %v1236_v55  ;;  %v1054_v12 = vpop.xlane.xlu1 %1053  ;;  %vm1268_vm12 = vweird.f32 %v3154_v2 }
 0x3e2   :  { %3155 = vrsqrt.f32 %v1237_v23  ;;  %v4132_v11 = vmul.f32 %v1054_v12, %v3724_v56  ;;  %vm1269_vm14 = vmor %vm1267_vm13, %vm1268_vm12  ;;  %vm1277_vm0 = vweird.f32 %v1237_v23  ;;  %v1221_v12 = vsub.f32 %v3991_v19, %v4126_v58 }
 0x3e3   :  { %v1263_v29 = vmul.f32 %v3154_v2, %v1262_v33  ;;  %v1134_v22 = vpop.xlane.xlu0 %1133  ;;  %v1260_v24 = vsel %vm1259_vm11, %v3152_v37, %v1256_v16 }
 0x3e4   :  { %v1190_v13 = vmul.f32 %v4132_v11, %v4132_v11  ;;  %v1174_v17 = vmul.f32 %v1134_v22, %v3724_v56  ;;  %v1411_v32 = vmul.f32 %v1260_v24, %v1219_v20 }
 0x3e5   :  { %v1264_v36 = vmul.f32 0.5, %v1263_v29 }
 0x3e6   :  { %v1206_v0 = vsub.f32 %v1174_v17, %v1190_v13  ;;  %v1428_v49 = vmul.f32 %v4139_v28, %v1411_v32 }
 0x3e7   :  { %v1265_v27 = vsub.f32 1.5, %v1264_v36 }
 0x3e8   :  { %v3156_v59 = vpop.eup %3155  ;;  %v1238_v10 = vadd.f32 1e-05, %v1206_v0  ;;  %v4154_v54 = vadd.f32 %v4146_v61, %v1428_v49  ;;  %v1222_v0 = vsub.f32 %v4000_v41, %v4132_v11 }
 0x3e9   :  { %v1266_v8 = vmul.f32 %v3154_v2, %v1265_v27  ;;  %v1272_v35 = vmul.f32 %v3156_v59, %v1237_v23  ;;  %v1057_v47 = vpop.xlane.xlu1 %1056  ;;  %vm1278_vm15 = vweird.f32 %v3156_v59 }
 0x3ea   :  { %3157 = vrsqrt.f32 %v1238_v10  ;;  %v4143_v38 = vmul.f32 %v1057_v47, %v3724_v56  ;;  %vm1279_vm1 = vmor %vm1277_vm0, %vm1278_vm15  ;;  %vm1287_vm3 = vweird.f32 %v1238_v10 }
 0x3eb   :  { %v1270_v48 = vsel %vm1269_vm14, %v3154_v2, %v1266_v8  ;;  %v1273_v39 = vmul.f32 %v3156_v59, %v1272_v35  ;;  %v1137_v34 = vpop.xlane.xlu0 %1136 }
 0x3ec   :  { %v1412_v44 = vmul.f32 %v1270_v48, %v1220_v57  ;;  %v1191_v50 = vmul.f32 %v4143_v38, %v4143_v38  ;;  %v1175_v60 = vmul.f32 %v1137_v34, %v3724_v56 }
 0x3ed   :  { %v1274_v43 = vmul.f32 0.5, %v1273_v39 }
 0x3ee   :  { %v1429_v15 = vmul.f32 %v4139_v28, %v1412_v44  ;;  %v1207_v40 = vsub.f32 %v1175_v60, %v1191_v50 }
 0x3ef   :  { %v1275_v51 = vsub.f32 1.5, %v1274_v43 }
 0x3f0   :  { %v3158_v37 = vpop.eup %3157  ;;  %v1239_v55 = vadd.f32 1e-05, %v1207_v40  ;;  %v4157_v3 = vadd.f32 %v4146_v61, %v1429_v15 }
 0x3f1   :  { %v1276_v26 = vmul.f32 %v3156_v59, %v1275_v51  ;;  %v1282_v1 = vmul.f32 %v3158_v37, %v1238_v10  ;;  %v1060_v30 = vpop.xlane.xlu2 %1059  ;;  %vm1288_vm2 = vweird.f32 %v3158_v37 }
 0x3f2   :  { %3159 = vrsqrt.f32 %v1239_v55  ;;  %v4160_v5 = vmul.f32 %v1060_v30, %v3724_v56  ;;  %v1463_v45 = vpack.c.bf16 %v4157_v3, %v4154_v54  ;;  %vm1289_vm5 = vmor %vm1287_vm3, %vm1288_vm2  ;;  %vm1297_vm7 = vweird.f32 %v1239_v55 }
 0x3f3   :  { %v1283_v63 = vmul.f32 %v3158_v37, %v1282_v1  ;;  %v1140_v6 = vpop.xlane.xlu1 %1139  ;;  %v1280_v16 = vsel %vm1279_vm1, %v3156_v59, %v1276_v26 }
 0x3f4   :  { %v1192_v9 = vmul.f32 %v4160_v5, %v4160_v5  ;;  %v1176_v2 = vmul.f32 %v1140_v6, %v3724_v56  ;;  %3030 = vmatmul.msk.bf16.vlgmr.msra.gmra.mxu0 %vm298_vm4, %v1463_v45  ;;  %v1413_v17 = vmul.f32 %v1280_v16, %v1221_v12  ;;  %v1223_v45 = vsub.f32 %v4009_v14, %v4143_v38 }
 0x3f5   :  { %v1284_v33 = vmul.f32 0.5, %v1283_v63 }
 0x3f6   :  { %v1208_v29 = vsub.f32 %v1176_v2, %v1192_v9  ;;  %v1430_v10 = vmul.f32 %v4139_v28, %v1413_v17 }
 0x3f7   :  { %v1285_v22 = vsub.f32 1.5, %v1284_v33 }
 0x3f8   :  { %v3160_v13 = vpop.eup %3159  ;;  %v1240_v23 = vadd.f32 1e-05, %v1208_v29  ;;  %v4181_v34 = vadd.f32 %v4146_v61, %v1430_v10  ;;  %v1224_v29 = vsub.f32 %v4018_v18, %v4160_v5 }
 0x3f9   :  { %v1286_v24 = vmul.f32 %v3158_v37, %v1285_v22  ;;  %v1292_v36 = vmul.f32 %v3160_v13, %v1239_v55  ;;  %v1063_v20 = vpop.xlane.xlu2 %1062  ;;  %vm1298_vm6 = vweird.f32 %v3160_v13 }
 0x3fa   :  { %3161 = vrsqrt.f32 %v1240_v23  ;;  %v4173_v27 = vmul.f32 %v1063_v20, %v3724_v56  ;;  %vm1299_vm8 = vmor %vm1297_vm7, %vm1298_vm6  ;;  %vm1307_vm10 = vweird.f32 %v1240_v23 }
 0x3fb   :  { %v1290_v59 = vsel %vm1289_vm5, %v3158_v37, %v1286_v24  ;;  %v1293_v19 = vmul.f32 %v3160_v13, %v1292_v36  ;;  %v1143_v58 = vpop.xlane.xlu1 %1142 }
 0x3fc   :  { %v1193_v32 = vmul.f32 %v4173_v27, %v4173_v27  ;;  %v1177_v8 = vmul.f32 %v1143_v58, %v3724_v56  ;;  %v1414_v35 = vmul.f32 %v1290_v59, %v1222_v0 }
 0x3fd   :  { %v1294_v47 = vmul.f32 0.5, %v1293_v19 }
 0x3fe   :  { %v1209_v57 = vsub.f32 %v1177_v8, %v1193_v32  ;;  %v1431_v41 = vmul.f32 %v4139_v28, %v1414_v35 }
 0x3ff   :  { %v1295_v11 = vsub.f32 1.5, %v1294_v47 }
 0x400   :  { %v3162_v48 = vpop.eup %3161  ;;  %v1241_v39 = vadd.f32 1e-05, %v1209_v57  ;;  %v4184_v49 = vadd.f32 %v4146_v61, %v1431_v41 }
 0x401   :  { %v1296_v44 = vmul.f32 %v3160_v13, %v1295_v11  ;;  %v1302_v50 = vmul.f32 %v3162_v48, %v1240_v23  ;;  %v1066_v60 = vpop.xlane.xlu0 %1065  ;;  %vm1308_vm9 = vweird.f32 %v3162_v48 }
 0x402   :  { %3163 = vrsqrt.f32 %v1241_v39  ;;  %v4187_v43 = vmul.f32 %v1066_v60, %v3724_v56  ;;  %v1464_v15 = vpack.c.bf16 %v4184_v49, %v4181_v34  ;;  %vm1309_vm11 = vmor %vm1307_vm10, %vm1308_vm9  ;;  %vm1317_vm13 = vweird.f32 %v1241_v39 }
 0x403   :  { %v1303_v40 = vmul.f32 %v3162_v48, %v1302_v50  ;;  %v1146_v51 = vpop.xlane.xlu2 %1145  ;;  %v1300_v1 = vsel %vm1299_vm8, %v3160_v13, %v1296_v44 }
 0x404   :  { %v1194_v37 = vmul.f32 %v4187_v43, %v4187_v43  ;;  %v1178_v26 = vmul.f32 %v1146_v51, %v3724_v56  ;;  %3031 = vmatmul.msk.bf16.gmra.mxu0 %vm298_vm4, %v1464_v15  ;;  %v1415_v55 = vmul.f32 %v1300_v1, %v1223_v45  ;;  %v1225_v15 = vsub.f32 %v4027_v62, %v4173_v27 }
 0x405   :  { %v1304_v30 = vmul.f32 0.5, %v1303_v40 }
 0x406   :  { %v1210_v63 = vsub.f32 %v1178_v26, %v1194_v37  ;;  %v1432_v23 = vmul.f32 %v4139_v28, %v1415_v55 }
 0x407   :  { %v1305_v6 = vsub.f32 1.5, %v1304_v30 }
 0x408   :  { %v3164_v9 = vpop.eup %3163  ;;  %v1242_v2 = vadd.f32 1e-05, %v1210_v63  ;;  %v4208_v58 = vadd.f32 %v4146_v61, %v1432_v23  ;;  %v1226_v63 = vsub.f32 %v4036_v7, %v4187_v43 }
 0x409   :  { %v1306_v16 = vmul.f32 %v3162_v48, %v1305_v6  ;;  %v1312_v33 = vmul.f32 %v3164_v9, %v1241_v39  ;;  %v1069_v12 = vpop.xlane.xlu0 %1068  ;;  %vm1318_vm12 = vweird.f32 %v3164_v9 }
 0x40a   :  { %3165 = vrsqrt.f32 %v1242_v2  ;;  %v4200_v22 = vmul.f32 %v1069_v12, %v3724_v56  ;;  %vm1319_vm14 = vmor %vm1317_vm13, %vm1318_vm12  ;;  %vm1327_vm0 = vweird.f32 %v1242_v2 }
 0x40b   :  { %v1310_v13 = vsel %vm1309_vm11, %v3162_v48, %v1306_v16  ;;  %v1313_v14 = vmul.f32 %v3164_v9, %v1312_v33  ;;  %v1149_v38 = vpop.xlane.xlu2 %1148 }
 0x40c   :  { %v1416_v17 = vmul.f32 %v1310_v13, %v1224_v29  ;;  %v1195_v24 = vmul.f32 %v4200_v22, %v4200_v22  ;;  %v1179_v36 = vmul.f32 %v1149_v38, %v3724_v56 }
 0x40d   :  { %v1314_v20 = vmul.f32 0.5, %v1313_v14 }
 0x40e   :  { %v1211_v0 = vsub.f32 %v1179_v36, %v1195_v24  ;;  %v1433_v18 = vmul.f32 %v4139_v28, %v1416_v17 }
 0x40f   :  { %v1315_v5 = vsub.f32 1.5, %v1314_v20 }
 0x410   :  { %v3166_v59 = vpop.eup %3165  ;;  %v1243_v19 = vadd.f32 1e-05, %v1211_v0  ;;  %v4211_v32 = vadd.f32 %v4146_v61, %v1433_v18 }
 0x411   :  { %v1316_v8 = vmul.f32 %v3164_v9, %v1315_v5  ;;  %v1322_v35 = vmul.f32 %v3166_v59, %v1242_v2  ;;  %v1072_v10 = vpop.xlane.xlu1 %1071  ;;  %vm1328_vm15 = vweird.f32 %v3166_v59 }
 0x412   :  { %3167 = vrsqrt.f32 %v1243_v19  ;;  %v4214_v47 = vmul.f32 %v1072_v10, %v3724_v56  ;;  %v1465_v57 = vpack.c.bf16 %v4211_v32, %v4208_v58  ;;  %vm1329_vm1 = vmor %vm1327_vm0, %vm1328_vm15  ;;  %vm1337_vm3 = vweird.f32 %v1243_v19 }
 0x413   :  { %v1323_v41 = vmul.f32 %v3166_v59, %v1322_v35  ;;  %v1152_v11 = vpop.xlane.xlu0 %1151  ;;  %v1320_v50 = vsel %vm1319_vm14, %v3164_v9, %v1316_v8 }
 0x414   :  { %v1196_v48 = vmul.f32 %v4214_v47, %v4214_v47  ;;  %v1180_v44 = vmul.f32 %v1152_v11, %v3724_v56  ;;  %3032 = vmatmul.msk.bf16.gmra.mxu0 %vm298_vm4, %v1465_v57  ;;  %v1417_v39 = vmul.f32 %v1320_v50, %v1225_v15  ;;  %v1227_v57 = vsub.f32 %v4045_v21, %v4200_v22 }
 0x415   :  { %v1324_v60 = vmul.f32 0.5, %v1323_v41 }
 0x416   :  { %v1212_v40 = vsub.f32 %v1180_v44, %v1196_v48  ;;  %v1434_v2 = vmul.f32 %v4139_v28, %v1417_v39 }
 0x417   :  { %v1325_v51 = vsub.f32 1.5, %v1324_v60 }
 0x418   :  { %v3168_v37 = vpop.eup %3167  ;;  %v1244_v26 = vadd.f32 1e-05, %v1212_v40  ;;  %v4235_v38 = vadd.f32 %v4146_v61, %v1434_v2  ;;  %v1228_v40 = vsub.f32 %v4054_v53, %v4214_v47 }
 0x419   :  { %v1326_v1 = vmul.f32 %v3166_v59, %v1325_v51  ;;  %v1332_v30 = vmul.f32 %v3168_v37, %v1243_v19  ;;  %v1075_v45 = vpop.xlane.xlu1 %1074  ;;  %vm1338_vm2 = vweird.f32 %v3168_v37 }
 0x41a   :  { %3169 = vrsqrt.f32 %v1244_v26  ;;  %v4227_v6 = vmul.f32 %v1075_v45, %v3724_v56  ;;  %vm1339_vm5 = vmor %vm1337_vm3, %vm1338_vm2  ;;  %vm1347_vm7 = vweird.f32 %v1244_v26 }
 0x41b   :  { %v1330_v9 = vsel %vm1329_vm1, %v3166_v59, %v1326_v1  ;;  %v1333_v62 = vmul.f32 %v3168_v37, %v1332_v30  ;;  %v1155_v27 = vpop.xlane.xlu0 %1154 }
 0x41c   :  { %v1418_v55 = vmul.f32 %v1330_v9, %v1226_v63  ;;  %v1197_v16 = vmul.f32 %v4227_v6, %v4227_v6  ;;  %v1181_v33 = vmul.f32 %v1155_v27, %v3724_v56 }
 0x41d   :  { %v1334_v12 = vmul.f32 0.5, %v1333_v62 }
 0x41e   :  { %v1213_v29 = vsub.f32 %v1181_v33, %v1197_v16  ;;  %v1435_v7 = vmul.f32 %v4139_v28, %v1418_v55 }
 0x41f   :  { %v1335_v43 = vsub.f32 1.5, %v1334_v12 }
 0x420   :  { %v3170_v13 = vpop.eup %3169  ;;  %v1245_v14 = vadd.f32 1e-05, %v1213_v29  ;;  %v4238_v17 = vadd.f32 %v4146_v61, %v1435_v7 }
 0x421   :  { %v1336_v24 = vmul.f32 %v3168_v37, %v1335_v43  ;;  %v1342_v36 = vmul.f32 %v3170_v13, %v1244_v26  ;;  %v1078_v23 = vpop.xlane.xlu2 %1077  ;;  %vm1348_vm6 = vweird.f32 %v3170_v13 }
 0x422   :  { %3171 = vrsqrt.f32 %v1245_v14  ;;  %v4241_v20 = vmul.f32 %v1078_v23, %v3724_v56  ;;  %v1466_v0 = vpack.c.bf16 %v4238_v17, %v4235_v38  ;;  %vm1349_vm8 = vmor %vm1347_vm7, %vm1348_vm6  ;;  %vm1357_vm10 = vweird.f32 %v1245_v14 }
 0x423   :  { %v1343_v18 = vmul.f32 %v3170_v13, %v1342_v36  ;;  %v1158_v5 = vpop.xlane.xlu1 %1157  ;;  %v1340_v35 = vsel %vm1339_vm5, %v3168_v37, %v1336_v24 }
 0x424   :  { %v1198_v59 = vmul.f32 %v4241_v20, %v4241_v20  ;;  %v1182_v8 = vmul.f32 %v1158_v5, %v3724_v56  ;;  %3033 = vmatmul.msk.bf16.gmra.mxu0 %vm298_vm4, %v1466_v0  ;;  %v1419_v19 = vmul.f32 %v1340_v35, %v1227_v57  ;;  %v1229_v0 = vsub.f32 %v4063_v25, %v4227_v6 }
 0x425   :  { %v1344_v10 = vmul.f32 0.5, %v1343_v18 }
 0x426   :  { %v1214_v41 = vsub.f32 %v1182_v8, %v1198_v59  ;;  %v1436_v26 = vmul.f32 %v4139_v28, %v1419_v19 }
 0x427   :  { %v1345_v11 = vsub.f32 1.5, %v1344_v10 }
 0x428   :  { %v3172_v48 = vpop.eup %3171  ;;  %v1246_v44 = vadd.f32 1e-05, %v1214_v41  ;;  %v4262_v27 = vadd.f32 %v4146_v61, %v1436_v26  ;;  %v1230_v41 = vsub.f32 %v4072_v4, %v4241_v20 }
 0x429   :  { %v1346_v50 = vmul.f32 %v3170_v13, %v1345_v11  ;;  %v1352_v60 = vmul.f32 %v3172_v48, %v1245_v14  ;;  %v1081_v15 = vpop.xlane.xlu2 %1080  ;;  %vm1358_vm9 = vweird.f32 %v3172_v48 }
 0x42a   :  { %3173 = vrsqrt.f32 %v1246_v44  ;;  %v4254_v51 = vmul.f32 %v1081_v15, %v3724_v56  ;;  %vm1359_vm11 = vmor %vm1357_vm10, %vm1358_vm9  ;;  %vm1367_vm13 = vweird.f32 %v1246_v44 }
 0x42b   :  { %v1350_v37 = vsel %vm1349_vm8, %v3170_v13, %v1346_v50  ;;  %v1353_v21 = vmul.f32 %v3172_v48, %v1352_v60  ;;  %v1161_v22 = vpop.xlane.xlu1 %1160 }
 0x42c   :  { %v1420_v39 = vmul.f32 %v1350_v37, %v1228_v40  ;;  %v1199_v1 = vmul.f32 %v4254_v51, %v4254_v51  ;;  %v1183_v30 = vmul.f32 %v1161_v22, %v3724_v56 }
 0x42d   :  { %v1354_v45 = vmul.f32 0.5, %v1353_v21 }
 0x42e   :  { %v1215_v63 = vsub.f32 %v1183_v30, %v1199_v1  ;;  %v1437_v53 = vmul.f32 %v4139_v28, %v1420_v39 }
 0x42f   :  { %v1355_v47 = vsub.f32 1.5, %v1354_v45 }
 0x430   :  { %v3174_v9 = vpop.eup %3173  ;;  %v1247_v62 = vadd.f32 1e-05, %v1215_v63  ;;  %v4265_v55 = vadd.f32 %v4146_v61, %v1437_v53 }
 0x431   :  { %v1356_v16 = vmul.f32 %v3172_v48, %v1355_v47  ;;  %v1362_v33 = vmul.f32 %v3174_v9, %v1246_v44  ;;  %v1084_v2 = vpop.xlane.xlu0 %1083  ;;  %vm1368_vm12 = vweird.f32 %v3174_v9 }
 0x432   :  { %3175 = vrsqrt.f32 %v1247_v62  ;;  %v4268_v12 = vmul.f32 %v1084_v2, %v3724_v56  ;;  %v1467_v29 = vpack.c.bf16 %v4265_v55, %v4262_v27  ;;  %vm1369_vm14 = vmor %vm1367_vm13, %vm1368_vm12  ;;  %vm1377_vm0 = vweird.f32 %v1247_v62 }
 0x433   :  { %v1363_v7 = vmul.f32 %v3174_v9, %v1362_v33  ;;  %v1164_v43 = vpop.xlane.xlu2 %1163  ;;  %v1360_v36 = vsel %vm1359_vm11, %v3172_v48, %v1356_v16 }
 0x434   :  { %v1200_v13 = vmul.f32 %v4268_v12, %v4268_v12  ;;  %v1184_v24 = vmul.f32 %v1164_v43, %v3724_v56  ;;  %3034 = vmatmul.msk.bf16.gmra.mxu0 %vm298_vm4, %v1467_v29  ;;  %v1421_v14 = vmul.f32 %v1360_v36, %v1229_v0  ;;  %v1231_v29 = vsub.f32 %v4081_v42, %v4254_v51 }
 0x435   :  { %v1364_v23 = vmul.f32 0.5, %v1363_v7  ;;  %v1232_v0 = vsub.f32 %v4090_v46, %v4268_v12 }
 0x436   :  { %v1216_v18 = vsub.f32 %v1184_v24, %v1200_v13  ;;  %v1438_v44 = vmul.f32 %v4139_v28, %v1421_v14 }
 0x437   :  { %v1365_v5 = vsub.f32 1.5, %v1364_v23 }
 0x438   :  { %v3176_v59 = vpop.eup %3175  ;;  %v1248_v8 = vadd.f32 1e-05, %v1216_v18  ;;  %v4289_v22 = vadd.f32 %v4146_v61, %v1438_v44 }
 0x439   :  { %v1366_v35 = vmul.f32 %v3174_v9, %v1365_v5  ;;  %v1372_v10 = vmul.f32 %v3176_v59, %v1247_v62  ;;  %v1087_v57 = vpop.xlane.xlu0 %1086  ;;  %vm1378_vm15 = vweird.f32 %v3176_v59 }
 0x43a   :  { %3177 = vrsqrt.f32 %v1248_v8  ;;  %v4281_v11 = vmul.f32 %v1087_v57, %v3724_v56  ;;  %vm1379_vm1 = vmor %vm1377_vm0, %vm1378_vm15  ;;  %vm1387_vm3 = vweird.f32 %v1248_v8 }
 0x43b   :  { %v1370_v48 = vsel %vm1369_vm14, %v3174_v9, %v1366_v35  ;;  %v1373_v25 = vmul.f32 %v3176_v59, %v1372_v10  ;;  %v1167_v6 = vpop.xlane.xlu2 %1166 }
 0x43c   :  { %v1422_v19 = vmul.f32 %v1370_v48, %v1230_v41  ;;  %v1201_v50 = vmul.f32 %v4281_v11, %v4281_v11  ;;  %v1185_v60 = vmul.f32 %v1167_v6, %v3724_v56 }
 0x43d   :  { %v1374_v15 = vmul.f32 0.5, %v1373_v25 }
 0x43e   :  { %v1217_v40 = vsub.f32 %v1185_v60, %v1201_v50  ;;  %v1439_v4 = vmul.f32 %v4139_v28, %v1422_v19  ;;  %v1233_v19 = vsub.f32 %v4099_v52, %v4281_v11 }
 0x43f   :  { %v1375_v20 = vsub.f32 1.5, %v1374_v15 }
 0x440   :  { %v3178_v37 = vpop.eup %3177  ;;  %v1249_v21 = vadd.f32 1e-05, %v1217_v40  ;;  %v4292_v39 = vadd.f32 %v4146_v61, %v1439_v4 }
 0x441   :  { %v1376_v1 = vmul.f32 %v3176_v59, %v1375_v20  ;;  %v1382_v30 = vmul.f32 %v3178_v37, %v1248_v8  ;;  %v1090_v26 = vpop.xlane.xlu1 %1089  ;;  %vm1388_vm2 = vweird.f32 %v3178_v37 }
 0x442   :  { %3179 = vrsqrt.f32 %v1249_v21  ;;  %v1106_v45 = vmul.f32 %v1090_v26, %v3724_v56  ;;  %v1468_v63 = vpack.c.bf16 %v4292_v39, %v4289_v22  ;;  %vm1389_vm5 = vmor %vm1387_vm3, %vm1388_vm2  ;;  %vm1397_vm7 = vweird.f32 %v1249_v21 }
 0x443   :  { %v1383_v53 = vmul.f32 %v3178_v37, %v1382_v30  ;;  %v1170_v47 = vpop.xlane.xlu0 %1169  ;;  %v1380_v33 = vsel %vm1379_vm1, %v3176_v59, %v1376_v1 }
 0x444   :  { %v1202_v9 = vmul.f32 %v1106_v45, %v1106_v45  ;;  %v1186_v16 = vmul.f32 %v1170_v47, %v3724_v56  ;;  %3035 = vmatmul.msk.bf16.gmra.mxu0 %vm298_vm4, %v1468_v63  ;;  %v1423_v24 = vmul.f32 %v1380_v33, %v1231_v29  ;;  %v1234_v15 = vsub.f32 %v4109_v31, %v1106_v45  ;;  %v4331_v31 = vld [vmem:[%s5335_s5 + $0x8] sm:$0xff] }
 0x445   :  { %v1384_v2 = vmul.f32 0.5, %v1383_v53  ;;  %v4334_v11 = vperm.slane %v4331_v31, 0 }
 0x446   :  { %v1218_v7 = vsub.f32 %v1186_v16, %v1202_v9  ;;  %v1440_v14 = vmul.f32 %v4139_v28, %v1423_v24 }
 0x447   :  { %v1385_v43 = vsub.f32 1.5, %v1384_v2 }
 0x448   :  { %v3180_v13 = vpop.eup %3179  ;;  %v1250_v36 = vadd.f32 1e-05, %v1218_v7  ;;  %v4306_v57 = vadd.f32 %v4146_v61, %v1440_v14 }
 0x449   :  { %v1386_v62 = vmul.f32 %v3178_v37, %v1385_v43  ;;  %v1392_v23 = vmul.f32 %v3180_v13, %v1249_v21  ;;  %vm1398_vm6 = vweird.f32 %v3180_v13 }
 0x44a   :  { %3181 = vrsqrt.f32 %v1250_v36  ;;  %vm1399_vm8 = vmor %vm1397_vm7, %vm1398_vm6  ;;  %vm1407_vm10 = vweird.f32 %v1250_v36 }
 0x44b   :  { %v1390_v18 = vsel %vm1389_vm5, %v3178_v37, %v1386_v62  ;;  %v1393_v5 = vmul.f32 %v3180_v13, %v1392_v23 }
 0x44c   :  { %v1424_v59 = vmul.f32 %v1390_v18, %v1232_v0 }
 0x44d   :  { %v1394_v42 = vmul.f32 0.5, %v1393_v5 }
 0x44e   :  { %v1441_v51 = vmul.f32 %v4139_v28, %v1424_v59 }
 0x44f   :  { %v1395_v35 = vsub.f32 1.5, %v1394_v42 }
 0x450   :  { %v3182_v10 = vpop.eup %3181  ;;  %v4309_v8 = vadd.f32 %v4146_v61, %v1441_v51 }
 0x451   :  { %v1396_v41 = vmul.f32 %v3180_v13, %v1395_v35  ;;  %v1402_v46 = vmul.f32 %v3182_v10, %v1250_v36  ;;  %vm1408_vm9 = vweird.f32 %v3182_v10 }
 0x452   :  { %v1469_v12 = vpack.c.bf16 %v4309_v8, %v4306_v57  ;;  %vm1409_vm11 = vmor %vm1407_vm10, %vm1408_vm9 }
 0x453   :  { %v1403_v48 = vmul.f32 %v3182_v10, %v1402_v46  ;;  %v1400_v25 = vsel %vm1399_vm8, %v3180_v13, %v1396_v41 }
 0x454   :  { %3036 = vmatmul.msk.bf16.gmra.mxu0 %vm298_vm4, %v1469_v12  ;;  %v1425_v60 = vmul.f32 %v1400_v25, %v1233_v19 }
 0x455   :  { %v1404_v6 = vmul.f32 0.5, %v1403_v48 }
 0x456   :  { %v1442_v20 = vmul.f32 %v4139_v28, %v1425_v60 }
 0x457   :  { %v1405_v50 = vsub.f32 1.5, %v1404_v6 }
 0x458   :  { %v4320_v21 = vadd.f32 %v4146_v61, %v1442_v20 }
 0x459   :  { %v1406_v44 = vmul.f32 %v3182_v10, %v1405_v50 }
 0x45b   :  { %v1410_v40 = vsel %vm1409_vm11, %v3182_v10, %v1406_v44 }
 0x45c   :  { %v1426_v4 = vmul.f32 %v1410_v40, %v1234_v15 }
 0x45e   :  { %v1443_v37 = vmul.f32 %v4139_v28, %v1426_v4 }
 0x460   :  { %v4323_v1 = vadd.f32 %v4146_v61, %v1443_v37  ;;  %v3105_v61 = vld [vmem:[%s5334_s4 + $0x48] sm:$0xff] }
 0x461   :  { %2052 = vmatpush.bf16.msra.mxu2 %v3105_v61 }
 0x462   :  { %v1470_v52 = vpack.c.bf16 %v4323_v1, %v4320_v21 }
 0x464   :  { %3037 = vmatmul.msk.bf16.gmra.mxu0 %vm298_vm4, %v1470_v52 }
 0x471   :  { %v1522_v28 = vpop.f32.mrf.mxu0 }
 0x472   :  { %v1523_v30 = vadd.f32 %v1522_v28, %v4334_v11 }
 0x474   :  { %v4338_v26 = vadd.f32 %v1523_v30, %v4154_v54 }
 0x476   :  { %v1578_v45 = vsel %vm298_vm4, %v4338_v26, 0.0  ;;  %v1642_v63 = vmul.f32 %v4338_v26, %v4338_v26 }
 0x477   :  { %1579 = vadd.xlane.f32.xlu1 %v1578_v45 }
 0x478   :  { %v1658_v53 = vsel %vm298_vm4, %v1642_v63, 0.0 }
 0x479   :  { %v1524_v47 = vpop.f32.mrf.mxu0  ;;  %1659 = vadd.xlane.f32.xlu0 %v1658_v53 }
 0x47a   :  { %v1525_v9 = vadd.f32 %v1524_v47, %v4334_v11 }
 0x47c   :  { %v4350_v54 = vadd.f32 %v1525_v9, %v4157_v3 }
 0x47e   :  { %v1581_v16 = vsel %vm298_vm4, %v4350_v54, 0.0  ;;  %v1643_v33 = vmul.f32 %v4350_v54, %v4350_v54 }
 0x47f   :  { %1582 = vadd.xlane.f32.xlu2 %v1581_v16 }
 0x480   :  { %v1661_v2 = vsel %vm298_vm4, %v1643_v33, 0.0 }
 0x481   :  { %1662 = vadd.xlane.f32.xlu1 %v1661_v2  ;;  %v1527_v29 = vpop.f32.mrf.mxu0 }
 0x482   :  { %v1528_v7 = vadd.f32 %v1527_v29, %v4334_v11 }
 0x484   :  { %v4359_v43 = vadd.f32 %v1528_v7, %v4181_v34 }
 0x486   :  { %v1584_v3 = vsel %vm298_vm4, %v4359_v43, 0.0  ;;  %v1644_v13 = vmul.f32 %v4359_v43, %v4359_v43 }
 0x487   :  { %1585 = vadd.xlane.f32.xlu2 %v1584_v3 }
 0x488   :  { %v1664_v24 = vsel %vm298_vm4, %v1644_v13, 0.0 }
 0x489   :  { %v1529_v36 = vpop.f32.mrf.mxu0  ;;  %1665 = vadd.xlane.f32.xlu1 %v1664_v24 }
 0x48a   :  { %v1530_v62 = vadd.f32 %v1529_v36, %v4334_v11 }
 0x48c   :  { %v4368_v23 = vadd.f32 %v1530_v62, %v4184_v49 }
 0x48e   :  { %v1587_v34 = vsel %vm298_vm4, %v4368_v23, 0.0  ;;  %v1645_v0 = vmul.f32 %v4368_v23, %v4368_v23 }
 0x48f   :  { %1588 = vadd.xlane.f32.xlu0 %v1587_v34 }
 0x490   :  { %v1667_v18 = vsel %vm298_vm4, %v1645_v0, 0.0 }
 0x491   :  { %1668 = vadd.xlane.f32.xlu2 %v1667_v18  ;;  %v1532_v5 = vpop.f32.mrf.mxu0 }
 0x492   :  { %v1533_v59 = vadd.f32 %v1532_v5, %v4334_v11 }
 0x494   :  { %v4377_v14 = vadd.f32 %v1533_v59, %v4208_v58 }
 0x496   :  { %v1590_v49 = vsel %vm298_vm4, %v4377_v14, 0.0  ;;  %v1646_v42 = vmul.f32 %v4377_v14, %v4377_v14 }
 0x497   :  { %1591 = vadd.xlane.f32.xlu0 %v1590_v49 }
 0x498   :  { %v1670_v51 = vsel %vm298_vm4, %v1646_v42, 0.0 }
 0x499   :  { %v1534_v35 = vpop.f32.mrf.mxu0  ;;  %1671 = vadd.xlane.f32.xlu2 %v1670_v51 }
 0x49a   :  { %v1535_v10 = vadd.f32 %v1534_v35, %v4334_v11 }
 0x49c   :  { %v4386_v41 = vadd.f32 %v1535_v10, %v4211_v32 }
 0x49e   :  { %v1593_v58 = vsel %vm298_vm4, %v4386_v41, 0.0  ;;  %v1647_v46 = vmul.f32 %v4386_v41, %v4386_v41 }
 0x49f   :  { %1594 = vadd.xlane.f32.xlu1 %v1593_v58 }
 0x4a0   :  { %v1673_v12 = vsel %vm298_vm4, %v1647_v46, 0.0 }
 0x4a1   :  { %1674 = vadd.xlane.f32.xlu0 %v1673_v12  ;;  %v1537_v48 = vpop.f32.mrf.mxu0 }
 0x4a2   :  { %v1538_v25 = vadd.f32 %v1537_v48, %v4334_v11 }
 0x4a4   :  { %v4395_v6 = vadd.f32 %v1538_v25, %v4235_v38 }
 0x4a6   :  { %v1596_v32 = vsel %vm298_vm4, %v4395_v6, 0.0  ;;  %v1648_v19 = vmul.f32 %v4395_v6, %v4395_v6 }
 0x4a7   :  { %1597 = vadd.xlane.f32.xlu1 %v1596_v32 }
 0x4a8   :  { %v1676_v50 = vsel %vm298_vm4, %v1648_v19, 0.0 }
 0x4a9   :  { %v1539_v60 = vpop.f32.mrf.mxu0  ;;  %1677 = vadd.xlane.f32.xlu0 %v1676_v50 }
 0x4aa   :  { %v1540_v44 = vadd.f32 %v1539_v60, %v4334_v11 }
 0x4ac   :  { %v4404_v15 = vadd.f32 %v1540_v44, %v4238_v17  ;;  %v3104_v17 = vld [vmem:[%s5334_s4 + $0x40] sm:$0xff] }
 0x4ad   :  { %2053 = vmatpush.bf16.msra.mxu2 %v3104_v17 }
 0x4ae   :  { %v1599_v38 = vsel %vm298_vm4, %v4404_v15, 0.0  ;;  %v1649_v40 = vmul.f32 %v4404_v15, %v4404_v15 }
 0x4af   :  { %1600 = vadd.xlane.f32.xlu2 %v1599_v38 }
 0x4b0   :  { %v1679_v4 = vsel %vm298_vm4, %v1649_v40, 0.0 }
 0x4b1   :  { %1680 = vadd.xlane.f32.xlu1 %v1679_v4  ;;  %v1542_v20 = vpop.f32.mrf.mxu0 }
 0x4b2   :  { %v1543_v37 = vadd.f32 %v1542_v20, %v4334_v11 }
 0x4b4   :  { %v4413_v52 = vadd.f32 %v1543_v37, %v4262_v27 }
 0x4b6   :  { %v1602_v28 = vsel %vm298_vm4, %v4413_v52, 0.0  ;;  %v1650_v30 = vmul.f32 %v4413_v52, %v4413_v52 }
 0x4b7   :  { %1603 = vadd.xlane.f32.xlu2 %v1602_v28 }
 0x4b8   :  { %v1682_v61 = vsel %vm298_vm4, %v1650_v30, 0.0 }
 0x4b9   :  { %v1544_v45 = vpop.f32.mrf.mxu0  ;;  %1683 = vadd.xlane.f32.xlu1 %v1682_v61 }
 0x4ba   :  { %v1545_v63 = vadd.f32 %v1544_v45, %v4334_v11 }
 0x4bc   :  { %v4425_v27 = vadd.f32 %v1545_v63, %v4265_v55 }
 0x4be   :  { %v1605_v53 = vsel %vm298_vm4, %v4425_v27, 0.0  ;;  %v1651_v47 = vmul.f32 %v4425_v27, %v4425_v27 }
 0x4bf   :  { %1606 = vadd.xlane.f32.xlu0 %v1605_v53 }
 0x4c0   :  { %v1685_v9 = vsel %vm298_vm4, %v1651_v47, 0.0 }
 0x4c1   :  { %1686 = vadd.xlane.f32.xlu2 %v1685_v9  ;;  %v1547_v16 = vpop.f32.mrf.mxu0 }
 0x4c2   :  { %v1548_v33 = vadd.f32 %v1547_v16, %v4334_v11 }
 0x4c4   :  { %v4434_v2 = vadd.f32 %v1548_v33, %v4289_v22 }
 0x4c6   :  { %v1608_v55 = vsel %vm298_vm4, %v4434_v2, 0.0  ;;  %v1652_v29 = vmul.f32 %v4434_v2, %v4434_v2 }
 0x4c7   :  { %1609 = vadd.xlane.f32.xlu0 %v1608_v55 }
 0x4c8   :  { %v1688_v7 = vsel %vm298_vm4, %v1652_v29, 0.0 }
 0x4c9   :  { %v1549_v3 = vpop.f32.mrf.mxu0  ;;  %1689 = vadd.xlane.f32.xlu2 %v1688_v7 }
 0x4ca   :  { %v1550_v13 = vadd.f32 %v1549_v3, %v4334_v11 }
 0x4cc   :  { %v4443_v24 = vadd.f32 %v1550_v13, %v4292_v39 }
 0x4ce   :  { %v1611_v22 = vsel %vm298_vm4, %v4443_v24, 0.0  ;;  %v1653_v36 = vmul.f32 %v4443_v24, %v4443_v24 }
 0x4cf   :  { %1612 = vadd.xlane.f32.xlu1 %v1611_v22 }
 0x4d0   :  { %v1691_v62 = vsel %vm298_vm4, %v1653_v36, 0.0 }
 0x4d1   :  { %1692 = vadd.xlane.f32.xlu0 %v1691_v62  ;;  %v1552_v34 = vpop.f32.mrf.mxu0 }
 0x4d2   :  { %v1553_v0 = vadd.f32 %v1552_v34, %v4334_v11 }
 0x4d4   :  { %v4452_v18 = vadd.f32 %v1553_v0, %v4306_v57 }
 0x4d6   :  { %v1614_v39 = vsel %vm298_vm4, %v4452_v18, 0.0  ;;  %v1654_v5 = vmul.f32 %v4452_v18, %v4452_v18 }
 0x4d7   :  { %1615 = vadd.xlane.f32.xlu1 %v1614_v39 }
 0x4d8   :  { %v1694_v59 = vsel %vm298_vm4, %v1654_v5, 0.0 }
 0x4d9   :  { %v1554_v49 = vpop.f32.mrf.mxu0  ;;  %1695 = vadd.xlane.f32.xlu0 %v1694_v59 }
 0x4da   :  { %v1555_v42 = vadd.f32 %v1554_v49, %v4334_v11 }
 0x4dc   :  { %v4461_v51 = vadd.f32 %v1555_v42, %v4309_v8 }
 0x4de   :  { %v1617_v57 = vsel %vm298_vm4, %v4461_v51, 0.0  ;;  %v1655_v35 = vmul.f32 %v4461_v51, %v4461_v51 }
 0x4df   :  { %1618 = vadd.xlane.f32.xlu2 %v1617_v57 }
 0x4e0   :  { %v1697_v10 = vsel %vm298_vm4, %v1655_v35, 0.0 }
 0x4e1   :  { %1698 = vadd.xlane.f32.xlu1 %v1697_v10  ;;  %v1557_v58 = vpop.f32.mrf.mxu0 }
 0x4e2   :  { %v1558_v46 = vadd.f32 %v1557_v58, %v4334_v11 }
 0x4e4   :  { %v4470_v12 = vadd.f32 %v1558_v46, %v4320_v21 }
 0x4e6   :  { %v1620_v8 = vsel %vm298_vm4, %v4470_v12, 0.0  ;;  %v1656_v48 = vmul.f32 %v4470_v12, %v4470_v12 }
 0x4e7   :  { %1621 = vadd.xlane.f32.xlu2 %v1620_v8 }
 0x4e8   :  { %v1700_v25 = vsel %vm298_vm4, %v1656_v48, 0.0 }
 0x4e9   :  { %v1559_v32 = vpop.f32.mrf.mxu0  ;;  %1701 = vadd.xlane.f32.xlu1 %v1700_v25 }
 0x4ea   :  { %v1560_v19 = vadd.f32 %v1559_v32, %v4334_v11  ;;  %v1580_v50 = vpop.xlane.xlu1 %1579  ;;  %v4504_v32 = vperm.slane %v4331_v31, 1 }
 0x4eb   :  { %v1626_v60 = vmul.f32 %v1580_v50, %v3724_v56 }
 0x4ec   :  { %v4480_v44 = vadd.f32 %v1560_v19, %v4323_v1  ;;  %v1660_v21 = vpop.xlane.xlu0 %1659 }
 0x4ed   :  { %v1722_v38 = vmul.f32 %v1626_v60, %v1626_v60  ;;  %v1706_v40 = vmul.f32 %v1660_v21, %v3724_v56  ;;  %v1754_v46 = vsub.f32 %v4338_v26, %v1626_v60  ;;  %v4511_v26 = vperm.slane %v4331_v31, 2 }
 0x4ee   :  { %v1623_v4 = vsel %vm298_vm4, %v4480_v44, 0.0  ;;  %v1657_v20 = vmul.f32 %v4480_v44, %v4480_v44 }
 0x4ef   :  { %v1738_v37 = vsub.f32 %v1706_v40, %v1722_v38  ;;  %1624 = vadd.xlane.f32.xlu0 %v1623_v4 }
 0x4f0   :  { %v1703_v11 = vsel %vm298_vm4, %v1657_v20, 0.0 }
 0x4f1   :  { %v1770_v17 = vadd.f32 1e-05, %v1738_v37  ;;  %1704 = vadd.xlane.f32.xlu2 %v1703_v11 }
 0x4f2   :  { %v1583_v28 = vpop.xlane.xlu2 %1582 }
 0x4f3   :  { %3183 = vrsqrt.f32 %v1770_v17  ;;  %v1627_v1 = vmul.f32 %v1583_v28, %v3724_v56  ;;  %vm1792_vm13 = vweird.f32 %v1770_v17 }
 0x4f4   :  { %v1663_v30 = vpop.xlane.xlu1 %1662 }
 0x4f5   :  { %v1723_v61 = vmul.f32 %v1627_v1, %v1627_v1  ;;  %v1707_v45 = vmul.f32 %v1663_v30, %v3724_v56  ;;  %v1755_v4 = vsub.f32 %v4350_v54, %v1627_v1 }
 0x4f7   :  { %v1739_v63 = vsub.f32 %v1707_v45, %v1723_v61 }
 0x4f9   :  { %v3184_v53 = vpop.eup %3183  ;;  %v1771_v47 = vadd.f32 1e-05, %v1739_v63 }
 0x4fa   :  { %v1787_v9 = vmul.f32 %v3184_v53, %v1770_v17  ;;  %v1586_v16 = vpop.xlane.xlu2 %1585  ;;  %vm1793_vm12 = vweird.f32 %v3184_v53 }
 0x4fb   :  { %3185 = vrsqrt.f32 %v1771_v47  ;;  %v4491_v33 = vmul.f32 %v1586_v16, %v3724_v56  ;;  %vm1794_vm14 = vmor %vm1792_vm13, %vm1793_vm12  ;;  %vm1802_vm0 = vweird.f32 %v1771_v47 }
 0x4fc   :  { %v1788_v55 = vmul.f32 %v3184_v53, %v1787_v9  ;;  %v1666_v29 = vpop.xlane.xlu1 %1665 }
 0x4fd   :  { %v1724_v7 = vmul.f32 %v4491_v33, %v4491_v33  ;;  %v1708_v3 = vmul.f32 %v1666_v29, %v3724_v56 }
 0x4fe   :  { %v1789_v13 = vmul.f32 0.5, %v1788_v55 }
 0x4ff   :  { %v1740_v22 = vsub.f32 %v1708_v3, %v1724_v7 }
 0x500   :  { %v1790_v36 = vsub.f32 1.5, %v1789_v13 }
 0x501   :  { %v3186_v62 = vpop.eup %3185  ;;  %v1772_v34 = vadd.f32 1e-05, %v1740_v22 }
 0x502   :  { %v1791_v0 = vmul.f32 %v3184_v53, %v1790_v36  ;;  %v1797_v39 = vmul.f32 %v3186_v62, %v1771_v47  ;;  %v1589_v5 = vpop.xlane.xlu0 %1588  ;;  %vm1803_vm15 = vweird.f32 %v3186_v62 }
 0x503   :  { %3187 = vrsqrt.f32 %v1772_v34  ;;  %v4497_v59 = vmul.f32 %v1589_v5, %v3724_v56  ;;  %vm1804_vm1 = vmor %vm1802_vm0, %vm1803_vm15  ;;  %vm1812_vm3 = vweird.f32 %v1772_v34 }
 0x504   :  { %v1798_v49 = vmul.f32 %v3186_v62, %v1797_v39  ;;  %v1669_v42 = vpop.xlane.xlu2 %1668  ;;  %v1795_v10 = vsel %vm1794_vm14, %v3184_v53, %v1791_v0 }
 0x505   :  { %v1725_v57 = vmul.f32 %v4497_v59, %v4497_v59  ;;  %v1709_v35 = vmul.f32 %v1669_v42, %v3724_v56  ;;  %v1946_v19 = vmul.f32 %v1795_v10, %v1754_v46 }
 0x506   :  { %v1799_v58 = vmul.f32 0.5, %v1798_v49  ;;  %v1756_v49 = vsub.f32 %v4359_v43, %v4491_v33 }
 0x507   :  { %v1741_v8 = vsub.f32 %v1709_v35, %v1725_v57  ;;  %v1963_v17 = vmul.f32 %v4504_v32, %v1946_v19 }
 0x508   :  { %v1800_v48 = vsub.f32 1.5, %v1799_v58 }
 0x509   :  { %v3188_v25 = vpop.eup %3187  ;;  %v1773_v50 = vadd.f32 1e-05, %v1741_v8  ;;  %v4519_v9 = vadd.f32 %v4511_v26, %v1963_v17 }
 0x50a   :  { %v1801_v21 = vmul.f32 %v3186_v62, %v1800_v48  ;;  %v1807_v38 = vmul.f32 %v3188_v25, %v1772_v34  ;;  %v1592_v40 = vpop.xlane.xlu0 %1591  ;;  %vm1813_vm2 = vweird.f32 %v3188_v25  ;;  %v1757_v48 = vsub.f32 %v4368_v23, %v4497_v59  ;;  %v3107_v23 = vld [vmem:[%s5334_s4 + $0x58] sm:$0xff] }
 0x50b   :  { %3189 = vrsqrt.f32 %v1773_v50  ;;  %v4508_v20 = vmul.f32 %v1592_v40, %v3724_v56  ;;  %vm1814_vm5 = vmor %vm1812_vm3, %vm1813_vm2  ;;  %vm1822_vm7 = vweird.f32 %v1773_v50  ;;  %2167 = vmatpush.bf16.msra.mxu3 %v3107_v23 }
 0x50c   :  { %v1805_v60 = vsel %vm1804_vm1, %v3186_v62, %v1801_v21  ;;  %v1808_v37 = vmul.f32 %v3188_v25, %v1807_v38  ;;  %v1672_v11 = vpop.xlane.xlu2 %1671 }
 0x50d   :  { %v1947_v28 = vmul.f32 %v1805_v60, %v1755_v4  ;;  %v1726_v30 = vmul.f32 %v4508_v20, %v4508_v20  ;;  %v1710_v61 = vmul.f32 %v1672_v11, %v3724_v56 }
 0x50e   :  { %v1809_v54 = vmul.f32 0.5, %v1808_v37 }
 0x50f   :  { %v1964_v1 = vmul.f32 %v4504_v32, %v1947_v28  ;;  %v1742_v45 = vsub.f32 %v1710_v61, %v1726_v30 }
 0x510   :  { %v1810_v63 = vsub.f32 1.5, %v1809_v54 }
 0x511   :  { %v3190_v53 = vpop.eup %3189  ;;  %v1774_v47 = vadd.f32 1e-05, %v1742_v45  ;;  %v4522_v16 = vadd.f32 %v4511_v26, %v1964_v1 }
 0x512   :  { %v1811_v55 = vmul.f32 %v3188_v25, %v1810_v63  ;;  %v1817_v29 = vmul.f32 %v3190_v53, %v1773_v50  ;;  %v1595_v7 = vpop.xlane.xlu1 %1594  ;;  %vm1823_vm6 = vweird.f32 %v3190_v53 }
 0x513   :  { %3191 = vrsqrt.f32 %v1774_v47  ;;  %v4525_v3 = vmul.f32 %v1595_v7, %v3724_v56  ;;  %v1996_v13 = vpack.c.bf16 %v4522_v16, %v4519_v9  ;;  %vm1824_vm8 = vmor %vm1822_vm7, %vm1823_vm6  ;;  %vm1832_vm10 = vweird.f32 %v1774_v47 }
 0x514   :  { %v1818_v22 = vmul.f32 %v3190_v53, %v1817_v29  ;;  %v1675_v36 = vpop.xlane.xlu0 %1674  ;;  %v1815_v39 = vsel %vm1814_vm5, %v3188_v25, %v1811_v55 }
 0x515   :  { %v1727_v62 = vmul.f32 %v4525_v3, %v4525_v3  ;;  %v1711_v0 = vmul.f32 %v1675_v36, %v3724_v56  ;;  %3050 = vmatmul.msk.bf16.vlgmr.msra.gmra.mxu2 %vm298_vm4, %v1996_v13  ;;  %v1948_v34 = vmul.f32 %v1815_v39, %v1756_v49  ;;  %v1758_v36 = vsub.f32 %v4377_v14, %v4508_v20 }
 0x516   :  { %v1819_v5 = vmul.f32 0.5, %v1818_v22 }
 0x517   :  { %v1743_v42 = vsub.f32 %v1711_v0, %v1727_v62  ;;  %v1965_v50 = vmul.f32 %v4504_v32, %v1948_v34  ;;  %v1759_v34 = vsub.f32 %v4386_v41, %v4525_v3 }
 0x518   :  { %v1820_v57 = vsub.f32 1.5, %v1819_v5 }
 0x519   :  { %v3192_v35 = vpop.eup %3191  ;;  %v1775_v10 = vadd.f32 1e-05, %v1743_v42  ;;  %v4549_v28 = vadd.f32 %v4511_v26, %v1965_v50 }
 0x51a   :  { %v1821_v58 = vmul.f32 %v3190_v53, %v1820_v57  ;;  %v1827_v46 = vmul.f32 %v3192_v35, %v1774_v47  ;;  %v1598_v8 = vpop.xlane.xlu1 %1597  ;;  %vm1833_vm9 = vweird.f32 %v3192_v35 }
 0x51b   :  { %3193 = vrsqrt.f32 %v1775_v10  ;;  %v4538_v25 = vmul.f32 %v1598_v8, %v3724_v56  ;;  %vm1834_vm11 = vmor %vm1832_vm10, %vm1833_vm9  ;;  %vm1842_vm13 = vweird.f32 %v1775_v10 }
 0x51c   :  { %v1825_v19 = vsel %vm1824_vm8, %v3190_v53, %v1821_v58  ;;  %v1828_v43 = vmul.f32 %v3192_v35, %v1827_v46  ;;  %v1678_v33 = vpop.xlane.xlu0 %1677 }
 0x51d   :  { %v1949_v21 = vmul.f32 %v1825_v19, %v1757_v48  ;;  %v1728_v38 = vmul.f32 %v4538_v25, %v4538_v25  ;;  %v1712_v40 = vmul.f32 %v1678_v33, %v3724_v56 }
 0x51e   :  { %v1829_v59 = vmul.f32 0.5, %v1828_v43 }
 0x51f   :  { %v1744_v4 = vsub.f32 %v1712_v40, %v1728_v38  ;;  %v1966_v60 = vmul.f32 %v4504_v32, %v1949_v21 }
 0x520   :  { %v1830_v37 = vsub.f32 1.5, %v1829_v59 }
 0x521   :  { %v3194_v11 = vpop.eup %3193  ;;  %v1776_v17 = vadd.f32 1e-05, %v1744_v4  ;;  %v4552_v30 = vadd.f32 %v4511_v26, %v1966_v60 }
 0x522   :  { %v1831_v61 = vmul.f32 %v3192_v35, %v1830_v37  ;;  %v1837_v54 = vmul.f32 %v3194_v11, %v1775_v10  ;;  %v1601_v1 = vpop.xlane.xlu2 %1600  ;;  %vm1843_vm12 = vweird.f32 %v3194_v11 }
 0x523   :  { %3195 = vrsqrt.f32 %v1776_v17  ;;  %v4555_v45 = vmul.f32 %v1601_v1, %v3724_v56  ;;  %v1997_v63 = vpack.c.bf16 %v4552_v30, %v4549_v28  ;;  %vm1844_vm14 = vmor %vm1842_vm13, %vm1843_vm12  ;;  %vm1852_vm0 = vweird.f32 %v1776_v17 }
 0x524   :  { %v1838_v53 = vmul.f32 %v3194_v11, %v1837_v54  ;;  %v1681_v55 = vpop.xlane.xlu1 %1680  ;;  %v1835_v13 = vsel %vm1834_vm11, %v3192_v35, %v1831_v61 }
 0x525   :  { %v1729_v29 = vmul.f32 %v4555_v45, %v4555_v45  ;;  %v1713_v7 = vmul.f32 %v1681_v55, %v3724_v56  ;;  %3051 = vmatmul.msk.bf16.gmra.mxu2 %vm298_vm4, %v1997_v63  ;;  %v1950_v47 = vmul.f32 %v1835_v13, %v1758_v36 }
 0x526   :  { %v1839_v22 = vmul.f32 0.5, %v1838_v53  ;;  %v1760_v53 = vsub.f32 %v4395_v6, %v4538_v25 }
 0x527   :  { %v1745_v62 = vsub.f32 %v1713_v7, %v1729_v29  ;;  %v1967_v10 = vmul.f32 %v4504_v32, %v1950_v47 }
 0x528   :  { %v1840_v0 = vsub.f32 1.5, %v1839_v22 }
 0x529   :  { %v3196_v39 = vpop.eup %3195  ;;  %v1777_v5 = vadd.f32 1e-05, %v1745_v62  ;;  %v4576_v38 = vadd.f32 %v4511_v26, %v1967_v10 }
 0x52a   :  { %v1841_v49 = vmul.f32 %v3194_v11, %v1840_v0  ;;  %v1847_v42 = vmul.f32 %v3196_v39, %v1776_v17  ;;  %v1604_v57 = vpop.xlane.xlu2 %1603  ;;  %vm1853_vm15 = vweird.f32 %v3196_v39  ;;  %v1761_v0 = vsub.f32 %v4404_v15, %v4555_v45 }
 0x52b   :  { %3197 = vrsqrt.f32 %v1777_v5  ;;  %v4568_v35 = vmul.f32 %v1604_v57, %v3724_v56  ;;  %vm1854_vm1 = vmor %vm1852_vm0, %vm1853_vm15  ;;  %vm1862_vm3 = vweird.f32 %v1777_v5 }
 0x52c   :  { %v1845_v58 = vsel %vm1844_vm14, %v3194_v11, %v1841_v49  ;;  %v1848_v14 = vmul.f32 %v3196_v39, %v1847_v42  ;;  %v1684_v20 = vpop.xlane.xlu1 %1683 }
 0x52d   :  { %v1951_v46 = vmul.f32 %v1845_v58, %v1759_v34  ;;  %v1730_v8 = vmul.f32 %v4568_v35, %v4568_v35  ;;  %v1714_v48 = vmul.f32 %v1684_v20, %v3724_v56 }
 0x52e   :  { %v1849_v19 = vmul.f32 0.5, %v1848_v14 }
 0x52f   :  { %v1746_v43 = vsub.f32 %v1714_v48, %v1730_v8  ;;  %v1968_v41 = vmul.f32 %v4504_v32, %v1951_v46 }
 0x530   :  { %v1850_v3 = vsub.f32 1.5, %v1849_v19 }
 0x531   :  { %v3198_v33 = vpop.eup %3197  ;;  %v1778_v21 = vadd.f32 1e-05, %v1746_v43  ;;  %v4579_v40 = vadd.f32 %v4511_v26, %v1968_v41 }
 0x532   :  { %v1851_v50 = vmul.f32 %v3196_v39, %v1850_v3  ;;  %v1857_v23 = vmul.f32 %v3198_v33, %v1777_v5  ;;  %v1607_v59 = vpop.xlane.xlu0 %1606  ;;  %vm1863_vm2 = vweird.f32 %v3198_v33 }
 0x533   :  { %3199 = vrsqrt.f32 %v1778_v21  ;;  %v4582_v4 = vmul.f32 %v1607_v59, %v3724_v56  ;;  %v1998_v60 = vpack.c.bf16 %v4579_v40, %v4576_v38  ;;  %vm1864_vm5 = vmor %vm1862_vm3, %vm1863_vm2  ;;  %vm1872_vm7 = vweird.f32 %v1778_v21 }
 0x534   :  { %v1858_v37 = vmul.f32 %v3198_v33, %v1857_v23  ;;  %v1687_v11 = vpop.xlane.xlu2 %1686  ;;  %v1855_v1 = vsel %vm1854_vm1, %v3196_v39, %v1851_v50 }
 0x535   :  { %v1731_v61 = vmul.f32 %v4582_v4, %v4582_v4  ;;  %v1715_v54 = vmul.f32 %v1687_v11, %v3724_v56  ;;  %3052 = vmatmul.msk.bf16.gmra.mxu2 %vm298_vm4, %v1998_v60  ;;  %v1952_v17 = vmul.f32 %v1855_v1, %v1760_v53 }
 0x536   :  { %v1859_v63 = vmul.f32 0.5, %v1858_v37  ;;  %v1762_v37 = vsub.f32 %v4413_v52, %v4568_v35 }
 0x537   :  { %v1747_v55 = vsub.f32 %v1715_v54, %v1731_v61  ;;  %v1969_v5 = vmul.f32 %v4504_v32, %v1952_v17 }
 0x538   :  { %v1860_v29 = vsub.f32 1.5, %v1859_v63 }
 0x539   :  { %v3200_v7 = vpop.eup %3199  ;;  %v1779_v13 = vadd.f32 1e-05, %v1747_v55  ;;  %v4603_v46 = vadd.f32 %v4511_v26, %v1969_v5 }
 0x53a   :  { %v1861_v22 = vmul.f32 %v3198_v33, %v1860_v29  ;;  %v1867_v36 = vmul.f32 %v3200_v7, %v1778_v21  ;;  %v1610_v62 = vpop.xlane.xlu0 %1609  ;;  %vm1873_vm6 = vweird.f32 %v3200_v7  ;;  %v1763_v29 = vsub.f32 %v4425_v27, %v4582_v4 }
 0x53b   :  { %3201 = vrsqrt.f32 %v1779_v13  ;;  %v4595_v39 = vmul.f32 %v1610_v62, %v3724_v56  ;;  %vm1874_vm8 = vmor %vm1872_vm7, %vm1873_vm6  ;;  %vm1882_vm10 = vweird.f32 %v1779_v13 }
 0x53c   :  { %v1865_v47 = vsel %vm1864_vm5, %v3198_v33, %v1861_v22  ;;  %v1868_v6 = vmul.f32 %v3200_v7, %v1867_v36  ;;  %v1690_v25 = vpop.xlane.xlu2 %1689 }
 0x53d   :  { %v1953_v49 = vmul.f32 %v1865_v47, %v1761_v0  ;;  %v1732_v42 = vmul.f32 %v4595_v39, %v4595_v39  ;;  %v1716_v57 = vmul.f32 %v1690_v25, %v3724_v56 }
 0x53e   :  { %v1869_v34 = vmul.f32 0.5, %v1868_v6 }
 0x53f   :  { %v1748_v58 = vsub.f32 %v1716_v57, %v1732_v42  ;;  %v1970_v15 = vmul.f32 %v4504_v32, %v1953_v49 }
 0x540   :  { %v1870_v45 = vsub.f32 1.5, %v1869_v34 }
 0x541   :  { %v3202_v14 = vpop.eup %3201  ;;  %v1780_v20 = vadd.f32 1e-05, %v1748_v58  ;;  %v4606_v8 = vadd.f32 %v4511_v26, %v1970_v15 }
 0x542   :  { %v1871_v48 = vmul.f32 %v3200_v7, %v1870_v45  ;;  %v1877_v10 = vmul.f32 %v3202_v14, %v1779_v13  ;;  %v1613_v19 = vpop.xlane.xlu1 %1612  ;;  %vm1883_vm9 = vweird.f32 %v3202_v14 }
 0x543   :  { %3203 = vrsqrt.f32 %v1780_v20  ;;  %v4609_v43 = vmul.f32 %v1613_v19, %v3724_v56  ;;  %v1999_v41 = vpack.c.bf16 %v4606_v8, %v4603_v46  ;;  %vm1884_vm11 = vmor %vm1882_vm10, %vm1883_vm9  ;;  %vm1892_vm13 = vweird.f32 %v1780_v20 }
 0x544   :  { %v1878_v3 = vmul.f32 %v3202_v14, %v1877_v10  ;;  %v1693_v33 = vpop.xlane.xlu0 %1692  ;;  %v1875_v59 = vsel %vm1874_vm8, %v3200_v7, %v1871_v48 }
 0x545   :  { %v1733_v50 = vmul.f32 %v4609_v43, %v4609_v43  ;;  %v1717_v23 = vmul.f32 %v1693_v33, %v3724_v56  ;;  %3053 = vmatmul.msk.bf16.gmra.mxu2 %vm298_vm4, %v1999_v41  ;;  %v1954_v21 = vmul.f32 %v1875_v59, %v1762_v37 }
 0x546   :  { %v1879_v60 = vmul.f32 0.5, %v1878_v3  ;;  %v1764_v3 = vsub.f32 %v4434_v2, %v4595_v39 }
 0x547   :  { %v1749_v11 = vsub.f32 %v1717_v23, %v1733_v50  ;;  %v1971_v13 = vmul.f32 %v4504_v32, %v1954_v21 }
 0x548   :  { %v1880_v61 = vsub.f32 1.5, %v1879_v60 }
 0x549   :  { %v3204_v54 = vpop.eup %3203  ;;  %v1781_v1 = vadd.f32 1e-05, %v1749_v11  ;;  %v4630_v49 = vadd.f32 %v4511_v26, %v1971_v13 }
 0x54a   :  { %v1881_v63 = vmul.f32 %v3202_v14, %v1880_v61  ;;  %v1887_v53 = vmul.f32 %v3204_v54, %v1780_v20  ;;  %v1616_v55 = vpop.xlane.xlu1 %1615  ;;  %vm1893_vm12 = vweird.f32 %v3204_v54  ;;  %v1765_v61 = vsub.f32 %v4443_v24, %v4609_v43  ;;  %v3106_v24 = vld [vmem:[%s5334_s4 + $0x50] sm:$0xff] }
 0x54b   :  { %3205 = vrsqrt.f32 %v1781_v1  ;;  %v4622_v7 = vmul.f32 %v1616_v55, %v3724_v56  ;;  %vm1894_vm14 = vmor %vm1892_vm13, %vm1893_vm12  ;;  %vm1902_vm0 = vweird.f32 %v1781_v1  ;;  %2168 = vmatpush.bf16.msra.mxu3 %v3106_v24 }
 0x54c   :  { %v1885_v17 = vsel %vm1884_vm11, %v3202_v14, %v1881_v63  ;;  %v1888_v52 = vmul.f32 %v3204_v54, %v1887_v53  ;;  %v1696_v35 = vpop.xlane.xlu0 %1695 }
 0x54d   :  { %v1955_v22 = vmul.f32 %v1885_v17, %v1763_v29  ;;  %v1734_v36 = vmul.f32 %v4622_v7, %v4622_v7  ;;  %v1718_v62 = vmul.f32 %v1696_v35, %v3724_v56 }
 0x54e   :  { %v1889_v0 = vmul.f32 0.5, %v1888_v52 }
 0x54f   :  { %v1750_v47 = vsub.f32 %v1718_v62, %v1734_v36  ;;  %v1972_v27 = vmul.f32 %v4504_v32, %v1955_v22 }
 0x550   :  { %v1890_v4 = vsub.f32 1.5, %v1889_v0 }
 0x551   :  { %v3206_v6 = vpop.eup %3205  ;;  %v1782_v25 = vadd.f32 1e-05, %v1750_v47  ;;  %v4633_v42 = vadd.f32 %v4511_v26, %v1972_v27 }
 0x552   :  { %v1891_v57 = vmul.f32 %v3204_v54, %v1890_v4  ;;  %v1897_v5 = vmul.f32 %v3206_v6, %v1781_v1  ;;  %v1619_v34 = vpop.xlane.xlu2 %1618  ;;  %vm1903_vm15 = vweird.f32 %v3206_v6 }
 0x553   :  { %3207 = vrsqrt.f32 %v1782_v25  ;;  %v4636_v58 = vmul.f32 %v1619_v34, %v3724_v56  ;;  %v2000_v15 = vpack.c.bf16 %v4633_v42, %v4630_v49  ;;  %vm1904_vm1 = vmor %vm1902_vm0, %vm1903_vm15  ;;  %vm1912_vm3 = vweird.f32 %v1782_v25 }
 0x554   :  { %v1898_v45 = vmul.f32 %v3206_v6, %v1897_v5  ;;  %v1699_v14 = vpop.xlane.xlu1 %1698  ;;  %v1895_v19 = vsel %vm1894_vm14, %v3204_v54, %v1891_v57 }
 0x555   :  { %v1735_v48 = vmul.f32 %v4636_v58, %v4636_v58  ;;  %v1719_v10 = vmul.f32 %v1699_v14, %v3724_v56  ;;  %3054 = vmatmul.msk.bf16.gmra.mxu2 %vm298_vm4, %v2000_v15  ;;  %v1956_v20 = vmul.f32 %v1895_v19, %v1764_v3  ;;  %v1766_v14 = vsub.f32 %v4452_v18, %v4622_v7 }
 0x556   :  { %v1899_v41 = vmul.f32 0.5, %v1898_v45 }
 0x557   :  { %v1751_v33 = vsub.f32 %v1719_v10, %v1735_v48  ;;  %v1973_v1 = vmul.f32 %v4504_v32, %v1956_v20 }
 0x558   :  { %v1900_v50 = vsub.f32 1.5, %v1899_v41 }
 0x559   :  { %v3208_v23 = vpop.eup %3207  ;;  %v1783_v59 = vadd.f32 1e-05, %v1751_v33  ;;  %v4660_v36 = vadd.f32 %v4511_v26, %v1973_v1 }
 0x55a   :  { %v1901_v60 = vmul.f32 %v3206_v6, %v1900_v50  ;;  %v1907_v37 = vmul.f32 %v3208_v23, %v1782_v25  ;;  %v1622_v11 = vpop.xlane.xlu2 %1621  ;;  %vm1913_vm2 = vweird.f32 %v3208_v23  ;;  %v1767_v50 = vsub.f32 %v4461_v51, %v4636_v58 }
 0x55b   :  { %3209 = vrsqrt.f32 %v1783_v59  ;;  %v4649_v54 = vmul.f32 %v1622_v11, %v3724_v56  ;;  %vm1914_vm5 = vmor %vm1912_vm3, %vm1913_vm2  ;;  %vm1922_vm7 = vweird.f32 %v1783_v59 }
 0x55c   :  { %v1905_v21 = vsel %vm1904_vm1, %v3206_v6, %v1901_v60  ;;  %v1908_v2 = vmul.f32 %v3208_v23, %v1907_v37  ;;  %v1702_v39 = vpop.xlane.xlu1 %1701 }
 0x55d   :  { %v1957_v63 = vmul.f32 %v1905_v21, %v1765_v61  ;;  %v1736_v53 = vmul.f32 %v4649_v54, %v4649_v54  ;;  %v1720_v55 = vmul.f32 %v1702_v39, %v3724_v56 }
 0x55e   :  { %v1909_v43 = vmul.f32 0.5, %v1908_v2 }
 0x55f   :  { %v1752_v29 = vsub.f32 %v1720_v55, %v1736_v53  ;;  %v1974_v17 = vmul.f32 %v4504_v32, %v1957_v63  ;;  %v1768_v55 = vsub.f32 %v4470_v12, %v4649_v54 }
 0x560   :  { %v1910_v52 = vsub.f32 1.5, %v1909_v43 }
 0x561   :  { %v3210_v35 = vpop.eup %3209  ;;  %v1784_v22 = vadd.f32 1e-05, %v1752_v29  ;;  %v4663_v62 = vadd.f32 %v4511_v26, %v1974_v17 }
 0x562   :  { %v1911_v13 = vmul.f32 %v3208_v23, %v1910_v52  ;;  %v1917_v0 = vmul.f32 %v3210_v35, %v1783_v59  ;;  %v1625_v47 = vpop.xlane.xlu0 %1624  ;;  %vm1923_vm6 = vweird.f32 %v3210_v35 }
 0x563   :  { %3211 = vrsqrt.f32 %v1784_v22  ;;  %v1641_v27 = vmul.f32 %v1625_v47, %v3724_v56  ;;  %v2001_v4 = vpack.c.bf16 %v4663_v62, %v4660_v36  ;;  %vm1924_vm8 = vmor %vm1922_vm7, %vm1923_vm6  ;;  %vm1932_vm10 = vweird.f32 %v1784_v22 }
 0x564   :  { %v1918_v6 = vmul.f32 %v3210_v35, %v1917_v0  ;;  %v1705_v57 = vpop.xlane.xlu2 %1704  ;;  %v1915_v15 = vsel %vm1914_vm5, %v3208_v23, %v1911_v13 }
 0x565   :  { %v1737_v5 = vmul.f32 %v1641_v27, %v1641_v27  ;;  %v1721_v34 = vmul.f32 %v1705_v57, %v3724_v56  ;;  %3055 = vmatmul.msk.bf16.gmra.mxu2 %vm298_vm4, %v2001_v4  ;;  %v1958_v41 = vmul.f32 %v1915_v15, %v1766_v14  ;;  %v1769_v29 = vsub.f32 %v4480_v44, %v1641_v27 }
 0x566   :  { %v1919_v45 = vmul.f32 0.5, %v1918_v6  ;;  %v2009_v44 = vperm.slane %v4331_v31, 3 }
 0x567   :  { %v1753_v48 = vsub.f32 %v1721_v34, %v1737_v5  ;;  %v1975_v37 = vmul.f32 %v4504_v32, %v1958_v41 }
 0x568   :  { %v1920_v10 = vsub.f32 1.5, %v1919_v45 }
 0x569   :  { %v3212_v19 = vpop.eup %3211  ;;  %v1785_v3 = vadd.f32 1e-05, %v1753_v48  ;;  %v4677_v21 = vadd.f32 %v4511_v26, %v1975_v37 }
 0x56a   :  { %v1921_v25 = vmul.f32 %v3210_v35, %v1920_v10  ;;  %v1927_v33 = vmul.f32 %v3212_v19, %v1784_v22  ;;  %vm1933_vm9 = vweird.f32 %v3212_v19 }
 0x56b   :  { %3213 = vrsqrt.f32 %v1785_v3  ;;  %vm1934_vm11 = vmor %vm1932_vm10, %vm1933_vm9  ;;  %vm1942_vm13 = vweird.f32 %v1785_v3 }
 0x56c   :  { %v1925_v20 = vsel %vm1924_vm8, %v3210_v35, %v1921_v25  ;;  %v1928_v23 = vmul.f32 %v3212_v19, %v1927_v33 }
 0x56d   :  { %v1959_v60 = vmul.f32 %v1925_v20, %v1767_v50 }
 0x56e   :  { %v1929_v18 = vmul.f32 0.5, %v1928_v23 }
 0x56f   :  { %v1976_v7 = vmul.f32 %v4504_v32, %v1959_v60 }
 0x570   :  { %v1930_v11 = vsub.f32 1.5, %v1929_v18 }
 0x571   :  { %v3214_v61 = vpop.eup %3213  ;;  %v4680_v59 = vadd.f32 %v4511_v26, %v1976_v7 }
 0x572   :  { %v1931_v2 = vmul.f32 %v3212_v19, %v1930_v11  ;;  %v1937_v51 = vmul.f32 %v3214_v61, %v1785_v3  ;;  %vm1943_vm12 = vweird.f32 %v3214_v61 }
 0x573   :  { %v2002_v58 = vpack.c.bf16 %v4680_v59, %v4677_v21  ;;  %vm1944_vm14 = vmor %vm1942_vm13, %vm1943_vm12 }
 0x574   :  { %v1938_v39 = vmul.f32 %v3214_v61, %v1937_v51  ;;  %v1935_v63 = vsel %vm1934_vm11, %v3212_v19, %v1931_v2 }
 0x575   :  { %3056 = vmatmul.msk.bf16.gmra.mxu2 %vm298_vm4, %v2002_v58  ;;  %v1960_v24 = vmul.f32 %v1935_v63, %v1768_v55 }
 0x576   :  { %v1939_v53 = vmul.f32 0.5, %v1938_v39 }
 0x577   :  { %v1977_v35 = vmul.f32 %v4504_v32, %v1960_v24 }
 0x578   :  { %v1940_v1 = vsub.f32 1.5, %v1939_v53 }
 0x579   :  { %v4691_v13 = vadd.f32 %v4511_v26, %v1977_v35 }
 0x57a   :  { %v1941_v43 = vmul.f32 %v3214_v61, %v1940_v1 }
 0x57c   :  { %v1945_v17 = vsel %vm1944_vm14, %v3214_v61, %v1941_v43 }
 0x57d   :  { %v1961_v52 = vmul.f32 %v1945_v17, %v1769_v29 }
 0x57f   :  { %v1978_v22 = vmul.f32 %v4504_v32, %v1961_v52 }
 0x581   :  { %v4694_v0 = vadd.f32 %v4511_v26, %v1978_v22 }
 0x583   :  { %v2003_v12 = vpack.c.bf16 %v4694_v0, %v4691_v13 }
 0x585   :  { %3057 = vmatmul.msk.bf16.gmra.mxu2 %vm298_vm4, %v2003_v12 }
 0x598   :  { %v2055_v54 = vpop.f32.mrf.mxu2 }
 0x599   :  { %v2056_v47 = vadd.f32 %v2055_v54, %v2009_v44 }
 0x59b   :  { %v2095_v6 = vmax.f32 %v2056_v47, 0.0 }
 0x5a0   :  { %v2057_v27 = vpop.f32.mrf.mxu2 }
 0x5a1   :  { %v2058_v4 = vadd.f32 %v2057_v27, %v2009_v44 }
 0x5a3   :  { %v2096_v57 = vmax.f32 %v2058_v4, 0.0 }
 0x5a5   :  { %v2111_v32 = vpack.c.bf16 %v2096_v57, %v2095_v6 }
 0x5a7   :  { %3070 = vmatmul.msk.bf16.vlgmr.msra.gmra.mxu3 %vm298_vm4, %v2111_v32 }
 0x5a8   :  { %v2060_v5 = vpop.f32.mrf.mxu2 }
 0x5a9   :  { %v2061_v34 = vadd.f32 %v2060_v5, %v2009_v44 }
 0x5ab   :  { %v2097_v45 = vmax.f32 %v2061_v34, 0.0 }
 0x5b0   :  { %v2062_v26 = vpop.f32.mrf.mxu2 }
 0x5b1   :  { %v2063_v15 = vadd.f32 %v2062_v26, %v2009_v44 }
 0x5b3   :  { %v2098_v14 = vmax.f32 %v2063_v15, 0.0  ;;  %v3312_v15 = vld [vmem:[%s5335_s5 + $0x8] sm:$0xff] }
 0x5b5   :  { %v2112_v48 = vpack.c.bf16 %v2098_v14, %v2097_v45  ;;  %v4711_v45 = vperm.slane %v3312_v15, 4  ;;  %v3109_v14 = vld [vmem:[%s5336_s6 + $0x8] sm:$0xff] }
 0x5b6   :  { %2665 = vmatpush.bf16.msra.mxu1 %v3109_v14 }
 0x5b7   :  { %3071 = vmatmul.msk.bf16.gmra.mxu3 %vm298_vm4, %v2112_v48 }
 0x5b8   :  { %v2065_v10 = vpop.f32.mrf.mxu2 }
 0x5b9   :  { %v2066_v19 = vadd.f32 %v2065_v10, %v2009_v44 }
 0x5bb   :  { %v2099_v3 = vmax.f32 %v2066_v19, 0.0 }
 0x5c0   :  { %v2067_v31 = vpop.f32.mrf.mxu2 }
 0x5c1   :  { %v2068_v41 = vadd.f32 %v2067_v31, %v2009_v44 }
 0x5c3   :  { %v2100_v25 = vmax.f32 %v2068_v41, 0.0 }
 0x5c5   :  { %v2113_v33 = vpack.c.bf16 %v2100_v25, %v2099_v3 }
 0x5c7   :  { %3072 = vmatmul.msk.bf16.gmra.mxu3 %vm298_vm4, %v2113_v33 }
 0x5c8   :  { %v2070_v50 = vpop.f32.mrf.mxu2 }
 0x5c9   :  { %v2071_v20 = vadd.f32 %v2070_v50, %v2009_v44 }
 0x5cb   :  { %v2101_v37 = vmax.f32 %v2071_v20, 0.0 }
 0x5d0   :  { %v2072_v23 = vpop.f32.mrf.mxu2 }
 0x5d1   :  { %v2073_v60 = vadd.f32 %v2072_v23, %v2009_v44 }
 0x5d3   :  { %v2102_v18 = vmax.f32 %v2073_v60, 0.0 }
 0x5d5   :  { %v2114_v7 = vpack.c.bf16 %v2102_v18, %v2101_v37 }
 0x5d7   :  { %3073 = vmatmul.msk.bf16.gmra.mxu3 %vm298_vm4, %v2114_v7 }
 0x5d8   :  { %v2075_v11 = vpop.f32.mrf.mxu2 }
 0x5d9   :  { %v2076_v61 = vadd.f32 %v2075_v11, %v2009_v44 }
 0x5db   :  { %v2103_v58 = vmax.f32 %v2076_v61, 0.0 }
 0x5e0   :  { %v2077_v2 = vpop.f32.mrf.mxu2 }
 0x5e1   :  { %v2078_v51 = vadd.f32 %v2077_v2, %v2009_v44 }
 0x5e3   :  { %v2104_v39 = vmax.f32 %v2078_v51, 0.0 }
 0x5e5   :  { %v2115_v63 = vpack.c.bf16 %v2104_v39, %v2103_v58 }
 0x5e7   :  { %3074 = vmatmul.msk.bf16.gmra.mxu3 %vm298_vm4, %v2115_v63 }
 0x5e8   :  { %v2080_v53 = vpop.f32.mrf.mxu2 }
 0x5e9   :  { %v2081_v55 = vadd.f32 %v2080_v53, %v2009_v44 }
 0x5eb   :  { %v2105_v43 = vmax.f32 %v2081_v55, 0.0 }
 0x5f0   :  { %v2082_v1 = vpop.f32.mrf.mxu2 }
 0x5f1   :  { %v2083_v24 = vadd.f32 %v2082_v1, %v2009_v44 }
 0x5f3   :  { %v2106_v29 = vmax.f32 %v2083_v24, 0.0 }
 0x5f5   :  { %v2116_v17 = vpack.c.bf16 %v2106_v29, %v2105_v43 }
 0x5f7   :  { %3075 = vmatmul.msk.bf16.gmra.mxu3 %vm298_vm4, %v2116_v17 }
 0x5f8   :  { %v2085_v52 = vpop.f32.mrf.mxu2 }
 0x5f9   :  { %v2086_v35 = vadd.f32 %v2085_v52, %v2009_v44 }
 0x5fb   :  { %v2107_v54 = vmax.f32 %v2086_v35, 0.0 }
 0x600   :  { %v2087_v22 = vpop.f32.mrf.mxu2 }
 0x601   :  { %v2088_v12 = vadd.f32 %v2087_v22, %v2009_v44 }
 0x603   :  { %v2108_v47 = vmax.f32 %v2088_v12, 0.0 }
 0x605   :  { %v2117_v27 = vpack.c.bf16 %v2108_v47, %v2107_v54 }
 0x607   :  { %3076 = vmatmul.msk.bf16.gmra.mxu3 %vm298_vm4, %v2117_v27 }
 0x608   :  { %v2090_v4 = vpop.f32.mrf.mxu2 }
 0x609   :  { %v2091_v6 = vadd.f32 %v2090_v4, %v2009_v44 }
 0x60b   :  { %v2109_v5 = vmax.f32 %v2091_v6, 0.0 }
 0x610   :  { %v2092_v57 = vpop.f32.mrf.mxu2 }
 0x611   :  { %v2093_v32 = vadd.f32 %v2092_v57, %v2009_v44 }
 0x613   :  { %v2110_v34 = vmax.f32 %v2093_v32, 0.0  ;;  %v3108_v32 = vld [vmem:[%s5336_s6] sm:$0xff] }
 0x614   :  { %2666 = vmatpush.bf16.msra.mxu1 %v3108_v32 }
 0x615   :  { %v2118_v26 = vpack.c.bf16 %v2110_v34, %v2109_v5 }
 0x617   :  { %3077 = vmatmul.msk.bf16.gmra.mxu3 %vm298_vm4, %v2118_v26 }
 0x62a   :  { %v2170_v48 = vpop.f32.mrf.mxu3 }
 0x62b   :  { %v2171_v10 = vadd.f32 %v2170_v48, %v4711_v45 }
 0x62d   :  { %v4718_v44 = vadd.f32 %v2171_v10, %v4519_v9 }
 0x62f   :  { %v2226_v19 = vsel %vm298_vm4, %v4718_v44, 0.0  ;;  %v2290_v31 = vmul.f32 %v4718_v44, %v4718_v44 }
 0x630   :  { %2227 = vadd.xlane.f32.xlu0 %v2226_v19 }
 0x631   :  { %v2306_v41 = vsel %vm298_vm4, %v2290_v31, 0.0 }
 0x632   :  { %v2172_v3 = vpop.f32.mrf.mxu3  ;;  %2307 = vadd.xlane.f32.xlu2 %v2306_v41 }
 0x633   :  { %v2173_v25 = vadd.f32 %v2172_v3, %v4711_v45 }
 0x635   :  { %v4727_v33 = vadd.f32 %v2173_v25, %v4522_v16 }
 0x637   :  { %v2229_v9 = vsel %vm298_vm4, %v4727_v33, 0.0  ;;  %v2291_v50 = vmul.f32 %v4727_v33, %v4727_v33 }
 0x638   :  { %2230 = vadd.xlane.f32.xlu1 %v2229_v9 }
 0x639   :  { %v2309_v20 = vsel %vm298_vm4, %v2291_v50, 0.0 }
 0x63a   :  { %2310 = vadd.xlane.f32.xlu0 %v2309_v20  ;;  %v2175_v23 = vpop.f32.mrf.mxu3 }
 0x63b   :  { %v2176_v60 = vadd.f32 %v2175_v23, %v4711_v45 }
 0x63d   :  { %v4736_v37 = vadd.f32 %v2176_v60, %v4549_v28 }
 0x63f   :  { %v2232_v16 = vsel %vm298_vm4, %v4736_v37, 0.0  ;;  %v2292_v18 = vmul.f32 %v4736_v37, %v4736_v37 }
 0x640   :  { %2233 = vadd.xlane.f32.xlu1 %v2232_v16 }
 0x641   :  { %v2312_v7 = vsel %vm298_vm4, %v2292_v18, 0.0 }
 0x642   :  { %v2177_v11 = vpop.f32.mrf.mxu3  ;;  %2313 = vadd.xlane.f32.xlu0 %v2312_v7 }
 0x643   :  { %v2178_v61 = vadd.f32 %v2177_v11, %v4711_v45 }
 0x645   :  { %v4745_v2 = vadd.f32 %v2178_v61, %v4552_v30 }
 0x647   :  { %v2235_v28 = vsel %vm298_vm4, %v4745_v2, 0.0  ;;  %v2293_v51 = vmul.f32 %v4745_v2, %v4745_v2 }
 0x648   :  { %2236 = vadd.xlane.f32.xlu2 %v2235_v28 }
 0x649   :  { %v2315_v58 = vsel %vm298_vm4, %v2293_v51, 0.0 }
 0x64a   :  { %2316 = vadd.xlane.f32.xlu1 %v2315_v58  ;;  %v2180_v39 = vpop.f32.mrf.mxu3 }
 0x64b   :  { %v2181_v63 = vadd.f32 %v2180_v39, %v4711_v45 }
 0x64d   :  { %v4754_v53 = vadd.f32 %v2181_v63, %v4576_v38 }
 0x64f   :  { %v2238_v30 = vsel %vm298_vm4, %v4754_v53, 0.0  ;;  %v2294_v55 = vmul.f32 %v4754_v53, %v4754_v53 }
 0x650   :  { %2239 = vadd.xlane.f32.xlu2 %v2238_v30 }
 0x651   :  { %v2318_v1 = vsel %vm298_vm4, %v2294_v55, 0.0 }
 0x652   :  { %v2182_v24 = vpop.f32.mrf.mxu3  ;;  %2319 = vadd.xlane.f32.xlu1 %v2318_v1 }
 0x653   :  { %v2183_v43 = vadd.f32 %v2182_v24, %v4711_v45 }
 0x655   :  { %v4763_v29 = vadd.f32 %v2183_v43, %v4579_v40 }
 0x657   :  { %v2241_v38 = vsel %vm298_vm4, %v4763_v29, 0.0  ;;  %v2295_v17 = vmul.f32 %v4763_v29, %v4763_v29 }
 0x658   :  { %2242 = vadd.xlane.f32.xlu0 %v2241_v38 }
 0x659   :  { %v2321_v52 = vsel %vm298_vm4, %v2295_v17, 0.0 }
 0x65a   :  { %2322 = vadd.xlane.f32.xlu2 %v2321_v52  ;;  %v2185_v35 = vpop.f32.mrf.mxu3 }
 0x65b   :  { %v2186_v22 = vadd.f32 %v2185_v35, %v4711_v45 }
 0x65d   :  { %v4772_v12 = vadd.f32 %v2186_v22, %v4603_v46 }
 0x65f   :  { %v2244_v40 = vsel %vm298_vm4, %v4772_v12, 0.0  ;;  %v2296_v54 = vmul.f32 %v4772_v12, %v4772_v12 }
 0x660   :  { %2245 = vadd.xlane.f32.xlu0 %v2244_v40 }
 0x661   :  { %v2324_v47 = vsel %vm298_vm4, %v2296_v54, 0.0 }
 0x662   :  { %v2187_v27 = vpop.f32.mrf.mxu3  ;;  %2325 = vadd.xlane.f32.xlu2 %v2324_v47 }
 0x663   :  { %v2188_v4 = vadd.f32 %v2187_v27, %v4711_v45 }
 0x665   :  { %v4781_v6 = vadd.f32 %v2188_v4, %v4606_v8 }
 0x667   :  { %v2247_v46 = vsel %vm298_vm4, %v4781_v6, 0.0  ;;  %v2297_v57 = vmul.f32 %v4781_v6, %v4781_v6 }
 0x668   :  { %2248 = vadd.xlane.f32.xlu1 %v2247_v46 }
 0x669   :  { %v2327_v5 = vsel %vm298_vm4, %v2297_v57, 0.0 }
 0x66a   :  { %2328 = vadd.xlane.f32.xlu0 %v2327_v5  ;;  %v2190_v34 = vpop.f32.mrf.mxu3 }
 0x66b   :  { %v2191_v26 = vadd.f32 %v2190_v34, %v4711_v45 }
 0x66d   :  { %v4793_v8 = vadd.f32 %v2191_v26, %v4630_v49 }
 0x66f   :  { %v2250_v15 = vsel %vm298_vm4, %v4793_v8, 0.0  ;;  %v2298_v14 = vmul.f32 %v4793_v8, %v4793_v8 }
 0x670   :  { %2251 = vadd.xlane.f32.xlu1 %v2250_v15 }
 0x671   :  { %v2330_v48 = vsel %vm298_vm4, %v2298_v14, 0.0 }
 0x672   :  { %v2192_v10 = vpop.f32.mrf.mxu3  ;;  %2331 = vadd.xlane.f32.xlu0 %v2330_v48 }
 0x673   :  { %v2193_v19 = vadd.f32 %v2192_v10, %v4711_v45 }
 0x675   :  { %v4802_v31 = vadd.f32 %v2193_v19, %v4633_v42 }
 0x677   :  { %v2253_v49 = vsel %vm298_vm4, %v4802_v31, 0.0  ;;  %v2299_v41 = vmul.f32 %v4802_v31, %v4802_v31 }
 0x678   :  { %2254 = vadd.xlane.f32.xlu2 %v2253_v49 }
 0x679   :  { %v2333_v3 = vsel %vm298_vm4, %v2299_v41, 0.0 }
 0x67a   :  { %2334 = vadd.xlane.f32.xlu1 %v2333_v3  ;;  %v2195_v25 = vpop.f32.mrf.mxu3 }
 0x67b   :  { %v2196_v9 = vadd.f32 %v2195_v25, %v4711_v45 }
 0x67d   :  { %v4811_v50 = vadd.f32 %v2196_v9, %v4660_v36 }
 0x67f   :  { %v2256_v42 = vsel %vm298_vm4, %v4811_v50, 0.0  ;;  %v2300_v20 = vmul.f32 %v4811_v50, %v4811_v50 }
 0x680   :  { %2257 = vadd.xlane.f32.xlu2 %v2256_v42 }
 0x681   :  { %v2336_v23 = vsel %vm298_vm4, %v2300_v20, 0.0 }
 0x682   :  { %v2197_v60 = vpop.f32.mrf.mxu3  ;;  %2337 = vadd.xlane.f32.xlu1 %v2336_v23 }
 0x683   :  { %v2198_v16 = vadd.f32 %v2197_v60, %v4711_v45 }
 0x685   :  { %v4820_v18 = vadd.f32 %v2198_v16, %v4663_v62 }
 0x687   :  { %v2259_v36 = vsel %vm298_vm4, %v4820_v18, 0.0  ;;  %v2301_v7 = vmul.f32 %v4820_v18, %v4820_v18 }
 0x688   :  { %2260 = vadd.xlane.f32.xlu0 %v2259_v36 }
 0x689   :  { %v2339_v11 = vsel %vm298_vm4, %v2301_v7, 0.0 }
 0x68a   :  { %2340 = vadd.xlane.f32.xlu2 %v2339_v11  ;;  %v2200_v61 = vpop.f32.mrf.mxu3 }
 0x68b   :  { %v2201_v28 = vadd.f32 %v2200_v61, %v4711_v45 }
 0x68d   :  { %v4829_v51 = vadd.f32 %v2201_v28, %v4677_v21 }
 0x68f   :  { %v2262_v62 = vsel %vm298_vm4, %v4829_v51, 0.0  ;;  %v2302_v58 = vmul.f32 %v4829_v51, %v4829_v51 }
 0x690   :  { %2263 = vadd.xlane.f32.xlu0 %v2262_v62 }
 0x691   :  { %v2342_v39 = vsel %vm298_vm4, %v2302_v58, 0.0 }
 0x692   :  { %v2202_v63 = vpop.f32.mrf.mxu3  ;;  %2343 = vadd.xlane.f32.xlu2 %v2342_v39 }
 0x693   :  { %v2203_v30 = vadd.f32 %v2202_v63, %v4711_v45 }
 0x695   :  { %v4838_v55 = vadd.f32 %v2203_v30, %v4680_v59 }
 0x697   :  { %v2265_v21 = vsel %vm298_vm4, %v4838_v55, 0.0  ;;  %v2303_v1 = vmul.f32 %v4838_v55, %v4838_v55 }
 0x698   :  { %2266 = vadd.xlane.f32.xlu1 %v2265_v21 }
 0x699   :  { %v2345_v24 = vsel %vm298_vm4, %v2303_v1, 0.0 }
 0x69a   :  { %2346 = vadd.xlane.f32.xlu0 %v2345_v24  ;;  %v2205_v43 = vpop.f32.mrf.mxu3 }
 0x69b   :  { %v2206_v38 = vadd.f32 %v2205_v43, %v4711_v45 }
 0x69d   :  { %v4847_v17 = vadd.f32 %v2206_v38, %v4691_v13 }
 0x69f   :  { %v2268_v59 = vsel %vm298_vm4, %v4847_v17, 0.0  ;;  %v2304_v52 = vmul.f32 %v4847_v17, %v4847_v17 }
 0x6a0   :  { %2269 = vadd.xlane.f32.xlu1 %v2268_v59 }
 0x6a1   :  { %v2348_v35 = vsel %vm298_vm4, %v2304_v52, 0.0 }
 0x6a2   :  { %v2207_v22 = vpop.f32.mrf.mxu3  ;;  %2349 = vadd.xlane.f32.xlu0 %v2348_v35 }
 0x6a3   :  { %v2208_v40 = vadd.f32 %v2207_v22, %v4711_v45  ;;  %v2228_v54 = vpop.xlane.xlu0 %2227 }
 0x6a4   :  { %v4856_v47 = vmul.f32 %v2228_v54, %v3724_v56 }
 0x6a5   :  { %v4859_v13 = vadd.f32 %v2208_v40, %v4694_v0  ;;  %v2308_v27 = vpop.xlane.xlu2 %2307 }
 0x6a6   :  { %v2370_v4 = vmul.f32 %v4856_v47, %v4856_v47  ;;  %v2354_v46 = vmul.f32 %v2308_v27, %v3724_v56  ;;  %v2402_v54 = vsub.f32 %v4718_v44, %v4856_v47 }
 0x6a7   :  { %v2271_v57 = vsel %vm298_vm4, %v4859_v13, 0.0  ;;  %v2305_v32 = vmul.f32 %v4859_v13, %v4859_v13 }
 0x6a8   :  { %v2386_v45 = vsub.f32 %v2354_v46, %v2370_v4  ;;  %2272 = vadd.xlane.f32.xlu2 %v2271_v57 }
 0x6a9   :  { %v2351_v5 = vsel %vm298_vm4, %v2305_v32, 0.0 }
 0x6aa   :  { %v2418_v34 = vadd.f32 1e-05, %v2386_v45  ;;  %2352 = vadd.xlane.f32.xlu1 %v2351_v5 }
 0x6ab   :  { %v2231_v0 = vpop.xlane.xlu1 %2230 }
 0x6ac   :  { %3215 = vrsqrt.f32 %v2418_v34  ;;  %v2275_v26 = vmul.f32 %v2231_v0, %v3724_v56  ;;  %vm2440_vm0 = vweird.f32 %v2418_v34 }
 0x6ad   :  { %v2311_v15 = vpop.xlane.xlu0 %2310 }
 0x6ae   :  { %v2371_v14 = vmul.f32 %v2275_v26, %v2275_v26  ;;  %v2355_v48 = vmul.f32 %v2311_v15, %v3724_v56  ;;  %v2403_v27 = vsub.f32 %v4727_v33, %v2275_v26 }
 0x6b0   :  { %v2387_v10 = vsub.f32 %v2355_v48, %v2371_v14 }
 0x6b2   :  { %v3216_v19 = vpop.eup %3215  ;;  %v2419_v49 = vadd.f32 1e-05, %v2387_v10 }
 0x6b3   :  { %v2435_v41 = vmul.f32 %v3216_v19, %v2418_v34  ;;  %v2234_v3 = vpop.xlane.xlu1 %2233  ;;  %vm2441_vm15 = vweird.f32 %v3216_v19 }
 0x6b4   :  { %3217 = vrsqrt.f32 %v2419_v49  ;;  %v4872_v25 = vmul.f32 %v2234_v3, %v3724_v56  ;;  %vm2442_vm2 = vmor %vm2440_vm0, %vm2441_vm15  ;;  %vm2450_vm3 = vweird.f32 %v2419_v49 }
 0x6b5   :  { %v2436_v9 = vmul.f32 %v3216_v19, %v2435_v41  ;;  %v2314_v42 = vpop.xlane.xlu0 %2313 }
 0x6b6   :  { %v2372_v20 = vmul.f32 %v4872_v25, %v4872_v25  ;;  %v2356_v23 = vmul.f32 %v2314_v42, %v3724_v56 }
 0x6b7   :  { %v2437_v60 = vmul.f32 0.5, %v2436_v9 }
 0x6b8   :  { %v2388_v16 = vsub.f32 %v2356_v23, %v2372_v20 }
 0x6b9   :  { %v2438_v11 = vsub.f32 1.5, %v2437_v60 }
 0x6ba   :  { %v3218_v36 = vpop.eup %3217  ;;  %v2420_v7 = vadd.f32 1e-05, %v2388_v16 }
 0x6bb   :  { %v2445_v61 = vmul.f32 %v3218_v36, %v2419_v49  ;;  %v2237_v28 = vpop.xlane.xlu2 %2236  ;;  %v2439_v21 = vmul.f32 %v3216_v19, %v2438_v11  ;;  %vm2451_vm1 = vweird.f32 %v3218_v36 }
 0x6bc   :  { %3219 = vrsqrt.f32 %v2420_v7  ;;  %v4878_v62 = vmul.f32 %v2237_v28, %v3724_v56  ;;  %vm2452_vm5 = vmor %vm2450_vm3, %vm2451_vm1  ;;  %vm2460_vm7 = vweird.f32 %v2420_v7 }
 0x6bd   :  { %v2446_v58 = vmul.f32 %v3218_v36, %v2445_v61  ;;  %v2317_v39 = vpop.xlane.xlu1 %2316  ;;  %v2443_v52 = vsel %vm2442_vm2, %v3216_v19, %v2439_v21 }
 0x6be   :  { %v2373_v63 = vmul.f32 %v4878_v62, %v4878_v62  ;;  %v2357_v30 = vmul.f32 %v2317_v39, %v3724_v56  ;;  %v2594_v45 = vmul.f32 %v2443_v52, %v2402_v54 }
 0x6bf   :  { %v2447_v1 = vmul.f32 0.5, %v2446_v58 }
 0x6c0   :  { %v2389_v24 = vsub.f32 %v2357_v30, %v2373_v63  ;;  %v2404_v63 = vsub.f32 %v4736_v37, %v4872_v25 }
 0x6c1   :  { %v2448_v43 = vsub.f32 1.5, %v2447_v1 }
 0x6c2   :  { %v3220_v38 = vpop.eup %3219  ;;  %v2421_v59 = vadd.f32 1e-05, %v2389_v24 }
 0x6c3   :  { %v2449_v35 = vmul.f32 %v3218_v36, %v2448_v43  ;;  %v2455_v22 = vmul.f32 %v3220_v38, %v2420_v7  ;;  %v2240_v40 = vpop.xlane.xlu2 %2239  ;;  %vm2461_vm6 = vweird.f32 %v3220_v38  ;;  %v2405_v7 = vsub.f32 %v4745_v2, %v4878_v62 }
 0x6c4   :  { %3221 = vrsqrt.f32 %v2421_v59  ;;  %v4887_v4 = vmul.f32 %v2240_v40, %v3724_v56  ;;  %vm4899_vm9 = vmor %vm2460_vm7, %vm2461_vm6  ;;  %vm2470_vm10 = vweird.f32 %v2421_v59 }
 0x6c5   :  { %v2453_v46 = vsel %vm2452_vm5, %v3218_v36, %v2449_v35  ;;  %v2456_v57 = vmul.f32 %v3220_v38, %v2455_v22  ;;  %v2320_v32 = vpop.xlane.xlu1 %2319 }
 0x6c6   :  { %v2595_v5 = vmul.f32 %v2453_v46, %v2403_v27  ;;  %v2374_v34 = vmul.f32 %v4887_v4, %v4887_v4  ;;  %v2358_v0 = vmul.f32 %v2320_v32, %v3724_v56 }
 0x6c7   :  { %v2457_v15 = vmul.f32 0.5, %v2456_v57 }
 0x6c8   :  { %v2390_v14 = vsub.f32 %v2358_v0, %v2374_v34  ;;  %v2610_v44 = vpack.c.bf16 %v2595_v5, %v2594_v45 }
 0x6c9   :  { %v2458_v26 = vsub.f32 1.5, %v2457_v15 }
 0x6ca   :  { %v3222_v47 = vpop.eup %3221  ;;  %v2422_v33 = vadd.f32 1e-05, %v2390_v14  ;;  %3086 = vmatmul.msk.bf16.vlgmr.msra.gmra.mxu1 %vm298_vm4, %v2610_v44 }
 0x6cb   :  { %v2465_v48 = vmul.f32 %v3222_v47, %v2421_v59  ;;  %v2243_v10 = vpop.xlane.xlu0 %2242  ;;  %v2459_v20 = vmul.f32 %v3220_v38, %v2458_v26  ;;  %vm2471_vm8 = vweird.f32 %v3222_v47 }
 0x6cc   :  { %3223 = vrsqrt.f32 %v2422_v33  ;;  %v4894_v19 = vmul.f32 %v2243_v10, %v3724_v56  ;;  %vm2472_vm11 = vmor %vm2470_vm10, %vm2471_vm8  ;;  %vm2480_vm13 = vweird.f32 %v2422_v33 }
 0x6cd   :  { %v2466_v49 = vmul.f32 %v3222_v47, %v2465_v48  ;;  %v2323_v41 = vpop.xlane.xlu2 %2322  ;;  %v2463_v58 = vsel %vm4899_vm9, %v3220_v38, %v2459_v20 }
 0x6ce   :  { %v2375_v3 = vmul.f32 %v4894_v19, %v4894_v19  ;;  %v2359_v9 = vmul.f32 %v2323_v41, %v3724_v56  ;;  %v2596_v59 = vmul.f32 %v2463_v58, %v2404_v63  ;;  %v2406_v41 = vsub.f32 %v4754_v53, %v4887_v4 }
 0x6cf   :  { %v2467_v42 = vmul.f32 0.5, %v2466_v49 }
 0x6d0   :  { %v2391_v23 = vsub.f32 %v2359_v9, %v2375_v3 }
 0x6d1   :  { %v2468_v60 = vsub.f32 1.5, %v2467_v42 }
 0x6d2   :  { %v3224_v16 = vpop.eup %3223  ;;  %v2423_v11 = vadd.f32 1e-05, %v2391_v23 }
 0x6d3   :  { %v2475_v61 = vmul.f32 %v3224_v16, %v2422_v33  ;;  %v2246_v28 = vpop.xlane.xlu0 %2245  ;;  %v2469_v39 = vmul.f32 %v3222_v47, %v2468_v60  ;;  %vm2481_vm12 = vweird.f32 %v3224_v16  ;;  %v2407_v33 = vsub.f32 %v4763_v29, %v4894_v19 }
 0x6d4   :  { %3225 = vrsqrt.f32 %v2423_v11  ;;  %v4910_v30 = vmul.f32 %v2246_v28, %v3724_v56  ;;  %vm4922_vm15 = vmor %vm2480_vm13, %vm2481_vm12  ;;  %vm2490_vm0 = vweird.f32 %v2423_v11 }
 0x6d5   :  { %v2476_v21 = vmul.f32 %v3224_v16, %v2475_v61  ;;  %v2326_v1 = vpop.xlane.xlu2 %2325  ;;  %v2473_v24 = vsel %vm2472_vm11, %v3222_v47, %v2469_v39 }
 0x6d6   :  { %v2376_v43 = vmul.f32 %v4910_v30, %v4910_v30  ;;  %v2360_v38 = vmul.f32 %v2326_v1, %v3724_v56  ;;  %v2597_v52 = vmul.f32 %v2473_v24, %v2405_v7 }
 0x6d7   :  { %v2477_v35 = vmul.f32 0.5, %v2476_v21 }
 0x6d8   :  { %v2392_v37 = vsub.f32 %v2360_v38, %v2376_v43  ;;  %v2611_v25 = vpack.c.bf16 %v2597_v52, %v2596_v59 }
 0x6d9   :  { %v2478_v62 = vsub.f32 1.5, %v2477_v35 }
 0x6da   :  { %v3226_v22 = vpop.eup %3225  ;;  %v2424_v2 = vadd.f32 1e-05, %v2392_v37  ;;  %3087 = vmatmul.msk.bf16.gmra.mxu1 %vm298_vm4, %v2611_v25 }
 0x6db   :  { %v2485_v40 = vmul.f32 %v3226_v22, %v2423_v11  ;;  %v2249_v54 = vpop.xlane.xlu1 %2248  ;;  %v2479_v34 = vmul.f32 %v3224_v16, %v2478_v62  ;;  %vm2491_vm14 = vweird.f32 %v3226_v22 }
 0x6dc   :  { %3227 = vrsqrt.f32 %v2424_v2  ;;  %v4917_v27 = vmul.f32 %v2249_v54, %v3724_v56  ;;  %vm2492_vm1 = vmor %vm2490_vm0, %vm2491_vm14  ;;  %vm2500_vm3 = vweird.f32 %v2424_v2  ;;  %v2408_v54 = vsub.f32 %v4772_v12, %v4910_v30 }
 0x6dd   :  { %v2486_v46 = vmul.f32 %v3226_v22, %v2485_v40  ;;  %v2329_v57 = vpop.xlane.xlu0 %2328  ;;  %v2483_v10 = vsel %vm4922_vm15, %v3224_v16, %v2479_v34 }
 0x6de   :  { %v2377_v32 = vmul.f32 %v4917_v27, %v4917_v27  ;;  %v2361_v45 = vmul.f32 %v2329_v57, %v3724_v56  ;;  %v2598_v16 = vmul.f32 %v2483_v10, %v2406_v41 }
 0x6df   :  { %v2487_v5 = vmul.f32 0.5, %v2486_v46 }
 0x6e0   :  { %v2393_v0 = vsub.f32 %v2361_v45, %v2377_v32 }
 0x6e1   :  { %v2488_v15 = vsub.f32 1.5, %v2487_v5 }
 0x6e2   :  { %v3228_v14 = vpop.eup %3227  ;;  %v2425_v47 = vadd.f32 1e-05, %v2393_v0 }
 0x6e3   :  { %v2495_v26 = vmul.f32 %v3228_v14, %v2424_v2  ;;  %v2252_v48 = vpop.xlane.xlu1 %2251  ;;  %v2489_v49 = vmul.f32 %v3226_v22, %v2488_v15  ;;  %vm2501_vm2 = vweird.f32 %v3228_v14  ;;  %v2409_v2 = vsub.f32 %v4781_v6, %v4917_v27 }
 0x6e4   :  { %3229 = vrsqrt.f32 %v2425_v47  ;;  %v4933_v3 = vmul.f32 %v2252_v48, %v3724_v56  ;;  %vm4945_vm6 = vmor %vm2500_vm3, %vm2501_vm2  ;;  %vm2510_vm7 = vweird.f32 %v2425_v47 }
 0x6e5   :  { %v2496_v9 = vmul.f32 %v3228_v14, %v2495_v26  ;;  %v2332_v42 = vpop.xlane.xlu0 %2331  ;;  %v2493_v20 = vsel %vm2492_vm1, %v3226_v22, %v2489_v49 }
 0x6e6   :  { %v2378_v23 = vmul.f32 %v4933_v3, %v4933_v3  ;;  %v2362_v60 = vmul.f32 %v2332_v42, %v3724_v56  ;;  %v2599_v36 = vmul.f32 %v2493_v20, %v2407_v33 }
 0x6e7   :  { %v2497_v11 = vmul.f32 0.5, %v2496_v9 }
 0x6e8   :  { %v2394_v53 = vsub.f32 %v2362_v60, %v2378_v23  ;;  %v2612_v4 = vpack.c.bf16 %v2599_v36, %v2598_v16 }
 0x6e9   :  { %v2498_v19 = vsub.f32 1.5, %v2497_v11 }
 0x6ea   :  { %v3230_v61 = vpop.eup %3229  ;;  %v2426_v29 = vadd.f32 1e-05, %v2394_v53  ;;  %3088 = vmatmul.msk.bf16.gmra.mxu1 %vm298_vm4, %v2612_v4 }
 0x6eb   :  { %v2505_v28 = vmul.f32 %v3230_v61, %v2425_v47  ;;  %v2255_v58 = vpop.xlane.xlu2 %2254  ;;  %v2499_v24 = vmul.f32 %v3228_v14, %v2498_v19  ;;  %vm2511_vm5 = vweird.f32 %v3230_v61  ;;  %v2410_v19 = vsub.f32 %v4793_v8, %v4933_v3 }
 0x6ec   :  { %3231 = vrsqrt.f32 %v2426_v29  ;;  %v4940_v39 = vmul.f32 %v2255_v58, %v3724_v56  ;;  %vm2512_vm8 = vmor %vm2510_vm7, %vm2511_vm5  ;;  %vm2520_vm10 = vweird.f32 %v2426_v29 }
 0x6ed   :  { %v2506_v63 = vmul.f32 %v3230_v61, %v2505_v28  ;;  %v2335_v7 = vpop.xlane.xlu1 %2334  ;;  %v2503_v40 = vsel %vm4945_vm6, %v3228_v14, %v2499_v24 }
 0x6ee   :  { %v2379_v21 = vmul.f32 %v4940_v39, %v4940_v39  ;;  %v2363_v1 = vmul.f32 %v2335_v7, %v3724_v56  ;;  %v2600_v0 = vmul.f32 %v2503_v40, %v2408_v54 }
 0x6ef   :  { %v2507_v43 = vmul.f32 0.5, %v2506_v63 }
 0x6f0   :  { %v2395_v38 = vsub.f32 %v2363_v1, %v2379_v21 }
 0x6f1   :  { %v2508_v59 = vsub.f32 1.5, %v2507_v43 }
 0x6f2   :  { %v3232_v52 = vpop.eup %3231  ;;  %v2427_v37 = vadd.f32 1e-05, %v2395_v38 }
 0x6f3   :  { %v2509_v25 = vmul.f32 %v3230_v61, %v2508_v59  ;;  %v2515_v22 = vmul.f32 %v3232_v52, %v2426_v29  ;;  %v2258_v62 = vpop.xlane.xlu2 %2257  ;;  %vm2521_vm9 = vweird.f32 %v3232_v52  ;;  %v2411_v29 = vsub.f32 %v4802_v31, %v4940_v39 }
 0x6f4   :  { %3233 = vrsqrt.f32 %v2427_v37  ;;  %v4956_v46 = vmul.f32 %v2258_v62, %v3724_v56  ;;  %vm4968_vm12 = vmor %vm2520_vm10, %vm2521_vm9  ;;  %vm2530_vm13 = vweird.f32 %v2427_v37 }
 0x6f5   :  { %v2516_v57 = vmul.f32 %v3232_v52, %v2515_v22  ;;  %v2338_v32 = vpop.xlane.xlu1 %2337  ;;  %v2513_v45 = vsel %vm2512_vm8, %v3230_v61, %v2509_v25 }
 0x6f6   :  { %v2380_v5 = vmul.f32 %v4956_v46, %v4956_v46  ;;  %v2364_v34 = vmul.f32 %v2338_v32, %v3724_v56  ;;  %v2601_v15 = vmul.f32 %v2513_v45, %v2409_v2 }
 0x6f7   :  { %v2517_v14 = vmul.f32 0.5, %v2516_v57 }
 0x6f8   :  { %v2396_v12 = vsub.f32 %v2364_v34, %v2380_v5  ;;  %v2613_v30 = vpack.c.bf16 %v2601_v15, %v2600_v0 }
 0x6f9   :  { %v2518_v27 = vsub.f32 1.5, %v2517_v14 }
 0x6fa   :  { %v3234_v44 = vpop.eup %3233  ;;  %v2428_v6 = vadd.f32 1e-05, %v2396_v12  ;;  %3089 = vmatmul.msk.bf16.gmra.mxu1 %vm298_vm4, %v2613_v30  ;;  %v2412_v30 = vsub.f32 %v4811_v50, %v4956_v46 }
 0x6fb   :  { %v2525_v47 = vmul.f32 %v3234_v44, %v2427_v37  ;;  %v2261_v26 = vpop.xlane.xlu0 %2260  ;;  %v2519_v9 = vmul.f32 %v3232_v52, %v2518_v27  ;;  %vm2531_vm11 = vweird.f32 %v3234_v44 }
 0x6fc   :  { %3235 = vrsqrt.f32 %v2428_v6  ;;  %v4963_v48 = vmul.f32 %v2261_v26, %v3724_v56  ;;  %vm2532_vm14 = vmor %vm2530_vm13, %vm2531_vm11  ;;  %vm2540_vm0 = vweird.f32 %v2428_v6 }
 0x6fd   :  { %v2526_v10 = vmul.f32 %v3234_v44, %v2525_v47  ;;  %v2341_v49 = vpop.xlane.xlu2 %2340  ;;  %v2523_v61 = vsel %vm4968_vm12, %v3232_v52, %v2519_v9 }
 0x6fe   :  { %v2381_v41 = vmul.f32 %v4963_v48, %v4963_v48  ;;  %v2365_v33 = vmul.f32 %v2341_v49, %v3724_v56  ;;  %v2602_v24 = vmul.f32 %v2523_v61, %v2410_v19 }
 0x6ff   :  { %v2527_v42 = vmul.f32 0.5, %v2526_v10 }
 0x700   :  { %v2397_v20 = vsub.f32 %v2365_v33, %v2381_v41 }
 0x701   :  { %v2528_v23 = vsub.f32 1.5, %v2527_v42 }
 0x702   :  { %v3236_v60 = vpop.eup %3235  ;;  %v2429_v36 = vadd.f32 1e-05, %v2397_v20 }
 0x703   :  { %v2529_v11 = vmul.f32 %v3234_v44, %v2528_v23  ;;  %v2535_v53 = vmul.f32 %v3236_v60, %v2428_v6  ;;  %v2264_v4 = vpop.xlane.xlu0 %2263  ;;  %vm2541_vm15 = vweird.f32 %v3236_v60 }
 0x704   :  { %3237 = vrsqrt.f32 %v2429_v36  ;;  %v4979_v28 = vmul.f32 %v2264_v4, %v3724_v56  ;;  %vm4991_vm2 = vmor %vm2540_vm0, %vm2541_vm15  ;;  %vm2550_vm3 = vweird.f32 %v2429_v36 }
 0x705   :  { %v2536_v58 = vmul.f32 %v3236_v60, %v2535_v53  ;;  %v2344_v63 = vpop.xlane.xlu2 %2343  ;;  %v2533_v7 = vsel %vm2532_vm14, %v3234_v44, %v2529_v11  ;;  %v2413_v44 = vsub.f32 %v4820_v18, %v4963_v48 }
 0x706   :  { %v2382_v21 = vmul.f32 %v4979_v28, %v4979_v28  ;;  %v2366_v1 = vmul.f32 %v2344_v63, %v3724_v56  ;;  %v2603_v43 = vmul.f32 %v2533_v7, %v2411_v29 }
 0x707   :  { %v2537_v38 = vmul.f32 0.5, %v2536_v58 }
 0x708   :  { %v2398_v8 = vsub.f32 %v2366_v1, %v2382_v21  ;;  %v2614_v3 = vpack.c.bf16 %v2603_v43, %v2602_v24  ;;  %v2414_v24 = vsub.f32 %v4829_v51, %v4979_v28 }
 0x709   :  { %v2538_v39 = vsub.f32 1.5, %v2537_v38 }
 0x70a   :  { %v3238_v59 = vpop.eup %3237  ;;  %v2430_v31 = vadd.f32 1e-05, %v2398_v8  ;;  %3090 = vmatmul.msk.bf16.gmra.mxu1 %vm298_vm4, %v2614_v3 }
 0x70b   :  { %v2545_v52 = vmul.f32 %v3238_v59, %v2429_v36  ;;  %v2267_v35 = vpop.xlane.xlu1 %2266  ;;  %v2539_v54 = vmul.f32 %v3236_v60, %v2538_v39  ;;  %vm2551_vm1 = vweird.f32 %v3238_v59 }
 0x70c   :  { %3239 = vrsqrt.f32 %v2430_v31  ;;  %v4986_v37 = vmul.f32 %v2267_v35, %v3724_v56  ;;  %vm2552_vm5 = vmor %vm2550_vm3, %vm2551_vm1  ;;  %vm2560_vm7 = vweird.f32 %v2430_v31 }
 0x70d   :  { %v2546_v25 = vmul.f32 %v3238_v59, %v2545_v52  ;;  %v2347_v22 = vpop.xlane.xlu0 %2346  ;;  %v2543_v12 = vsel %vm4991_vm2, %v3236_v60, %v2539_v54 }
 0x70e   :  { %v2383_v62 = vmul.f32 %v4986_v37, %v4986_v37  ;;  %v2367_v40 = vmul.f32 %v2347_v22, %v3724_v56  ;;  %v2604_v41 = vmul.f32 %v2543_v12, %v2412_v30 }
 0x70f   :  { %v2547_v2 = vmul.f32 0.5, %v2546_v25 }
 0x710   :  { %v2399_v57 = vsub.f32 %v2367_v40, %v2383_v62 }
 0x711   :  { %v2548_v32 = vsub.f32 1.5, %v2547_v2 }
 0x712   :  { %v3240_v45 = vpop.eup %3239  ;;  %v2431_v34 = vadd.f32 1e-05, %v2399_v57 }
 0x713   :  { %v2549_v0 = vmul.f32 %v3238_v59, %v2548_v32  ;;  %v2555_v15 = vmul.f32 %v3240_v45, %v2430_v31  ;;  %v2270_v14 = vpop.xlane.xlu1 %2269  ;;  %vm2561_vm6 = vweird.f32 %v3240_v45 }
 0x714   :  { %3241 = vrsqrt.f32 %v2431_v34  ;;  %v5002_v6 = vmul.f32 %v2270_v14, %v3724_v56  ;;  %vm2562_vm9 = vmor %vm2560_vm7, %vm2561_vm6  ;;  %vm2570_vm10 = vweird.f32 %v2431_v34 }
 0x715   :  { %v2556_v27 = vmul.f32 %v3240_v45, %v2555_v15  ;;  %v2350_v47 = vpop.xlane.xlu0 %2349  ;;  %v2553_v26 = vsel %vm2552_vm5, %v3238_v59, %v2549_v0 }
 0x716   :  { %v2384_v10 = vmul.f32 %v5002_v6, %v5002_v6  ;;  %v2368_v49 = vmul.f32 %v2350_v47, %v3724_v56  ;;  %v2605_v33 = vmul.f32 %v2553_v26, %v2413_v44  ;;  %v2416_v62 = vsub.f32 %v4847_v17, %v5002_v6 }
 0x717   :  { %v2557_v9 = vmul.f32 0.5, %v2556_v27 }
 0x718   :  { %v2400_v50 = vsub.f32 %v2368_v49, %v2384_v10  ;;  %v2615_v46 = vpack.c.bf16 %v2605_v33, %v2604_v41 }
 0x719   :  { %v2558_v48 = vsub.f32 1.5, %v2557_v9 }
 0x71a   :  { %v3242_v42 = vpop.eup %3241  ;;  %v2432_v18 = vadd.f32 1e-05, %v2400_v50  ;;  %3091 = vmatmul.msk.bf16.gmra.mxu1 %vm298_vm4, %v2615_v46 }
 0x71b   :  { %v2565_v20 = vmul.f32 %v3242_v42, %v2431_v34  ;;  %v2273_v23 = vpop.xlane.xlu2 %2272  ;;  %v2559_v4 = vmul.f32 %v3240_v45, %v2558_v48  ;;  %vm2571_vm8 = vweird.f32 %v3242_v42  ;;  %v3313_v34 = vld [vmem:[%s5337_s7] sm:$0x3]  ;;  %s3341_s7 = smov [#allocation2]  }
 0x71c   :  { %3243 = vrsqrt.f32 %v2432_v18  ;;  %v2289_v60 = vmul.f32 %v2273_v23, %v3724_v56  ;;  %vm2572_vm11 = vmor %vm2570_vm10, %vm2571_vm8  ;;  %vm2580_vm13 = vweird.f32 %v2432_v18  ;;  %v5024_v0 = vperm.slane %v3313_v34, 1  ;;  %s2923_s14 = sshll.u32 %s3341_s7, 4  ;;  %s2924_s14 = int_to_ptr.vmem [resolvable:$true] %s2923_s14 }
 0x71d   :  { %v2566_v16 = vmul.f32 %v3242_v42, %v2565_v20  ;;  %v2353_v36 = vpop.xlane.xlu1 %2352  ;;  %v2563_v1 = vsel %vm2562_vm9, %v3240_v45, %v2559_v4  ;;  %v2708_v45 = vlaneseq }
 0x71e   :  { %v2385_v11 = vmul.f32 %v2289_v60, %v2289_v60  ;;  %v2369_v53 = vmul.f32 %v2353_v36, %v3724_v56  ;;  %v2415_v56 = vsub.f32 %v4838_v55, %v4986_v37  ;;  %v2606_v8 = vmul.f32 %v2563_v1, %v2414_v24 }
 0x71f   :  { %v2567_v61 = vmul.f32 0.5, %v2566_v16  ;;  %v2417_v40 = vsub.f32 %v4859_v13, %v2289_v60  ;;  %v5019_v5 = vand.u32 127, %v2708_v45 }
 0x720   :  { %v2401_v19 = vsub.f32 %v2369_v53, %v2385_v11 }
 0x721   :  { %v2568_v29 = vsub.f32 1.5, %v2567_v61  ;;  %vm2710_vm2 = vcmp.lt.s32.totalorder %v5019_v5, 6 }
 0x722   :  { %v3244_v58 = vpop.eup %3243  ;;  %v2433_v63 = vadd.f32 1e-05, %v2401_v19 }
 0x723   :  { %v2569_v7 = vmul.f32 %v3242_v42, %v2568_v29  ;;  %v2575_v21 = vmul.f32 %v3244_v58, %v2432_v18  ;;  %vm2581_vm12 = vweird.f32 %v3244_v58 }
 0x724   :  { %3245 = vrsqrt.f32 %v2433_v63  ;;  %vm2582_vm15 = vmor %vm2580_vm13, %vm2581_vm12  ;;  %vm2590_vm0 = vweird.f32 %v2433_v63 }
 0x725   :  { %v2576_v43 = vmul.f32 %v3244_v58, %v2575_v21  ;;  %v2573_v38 = vsel %vm2572_vm11, %v3242_v42, %v2569_v7 }
 0x726   :  { %v2607_v3 = vmul.f32 %v2573_v38, %v2415_v56 }
 0x727   :  { %v2577_v59 = vmul.f32 0.5, %v2576_v43 }
 0x728   :  { %v2616_v31 = vpack.c.bf16 %v2607_v3, %v2606_v8 }
 0x729   :  { %v2578_v52 = vsub.f32 1.5, %v2577_v59 }
 0x72a   :  { %v3246_v39 = vpop.eup %3245  ;;  %3092 = vmatmul.msk.bf16.gmra.mxu1 %vm298_vm4, %v2616_v31 }
 0x72b   :  { %v2585_v35 = vmul.f32 %v3246_v39, %v2433_v63  ;;  %v2579_v22 = vmul.f32 %v3244_v58, %v2578_v52  ;;  %vm2591_vm14 = vweird.f32 %v3246_v39 }
 0x72c   :  { %vm2592_vm1 = vmor %vm2590_vm0, %vm2591_vm14 }
 0x72d   :  { %v2586_v25 = vmul.f32 %v3246_v39, %v2585_v35  ;;  %v2583_v37 = vsel %vm2582_vm15, %v3244_v58, %v2579_v22 }
 0x72e   :  { %v2608_v2 = vmul.f32 %v2583_v37, %v2416_v62 }
 0x72f   :  { %v2587_v51 = vmul.f32 0.5, %v2586_v25 }
 0x731   :  { %v2588_v28 = vsub.f32 1.5, %v2587_v51 }
 0x733   :  { %v2589_v55 = vmul.f32 %v3246_v39, %v2588_v28 }
 0x735   :  { %v2593_v54 = vsel %vm2592_vm1, %v3246_v39, %v2589_v55 }
 0x736   :  { %v2609_v57 = vmul.f32 %v2593_v54, %v2417_v40 }
 0x738   :  { %v2617_v32 = vpack.c.bf16 %v2609_v57, %v2608_v2 }
 0x73a   :  { %3093 = vmatmul.msk.bf16.gmra.mxu1 %vm298_vm4, %v2617_v32 }
 0x747   :  { %v2668_v15 = vpop.f32.mrf.mxu1 }
 0x748   :  { %v5028_v17 = vadd.f32 %v2668_v15, %v5024_v0 }
 0x74a   :  { %v2711_v13 = vsel %vm2710_vm2, %v5028_v17, -1e+30 }
 0x74b   :  { %2727 = vmax.xlane.f32.xlu2 %v2711_v13 }
 0x74f   :  { %v2670_v14 = vpop.f32.mrf.mxu1 }
 0x750   :  { %v5034_v12 = vadd.f32 %v2670_v14, %v5024_v0 }
 0x752   :  { %v5039_v30 = vsel %vm2710_vm2, %v5034_v12, -1e+30 }
 0x753   :  { %2729 = vmax.xlane.f32.xlu0 %v5039_v30 }
 0x757   :  { %v2673_v44 = vpop.f32.mrf.mxu1 }
 0x758   :  { %v5043_v6 = vadd.f32 %v2673_v44, %v5024_v0 }
 0x75a   :  { %v5048_v27 = vsel %vm2710_vm2, %v5043_v6, -1e+30 }
 0x75b   :  { %2731 = vmax.xlane.f32.xlu1 %v5048_v27 }
 0x75f   :  { %v2675_v47 = vpop.f32.mrf.mxu1 }
 0x760   :  { %v5052_v26 = vadd.f32 %v2675_v47, %v5024_v0 }
 0x762   :  { %v5057_v10 = vsel %vm2710_vm2, %v5052_v26, -1e+30 }
 0x763   :  { %2733 = vmax.xlane.f32.xlu2 %v5057_v10 }
 0x767   :  { %v2678_v49 = vpop.f32.mrf.mxu1 }
 0x768   :  { %v5061_v41 = vadd.f32 %v2678_v49, %v5024_v0 }
 0x76a   :  { %v5066_v33 = vsel %vm2710_vm2, %v5061_v41, -1e+30 }
 0x76b   :  { %2735 = vmax.xlane.f32.xlu0 %v5066_v33 }
 0x76f   :  { %v2680_v9 = vpop.f32.mrf.mxu1 }
 0x770   :  { %v5070_v50 = vadd.f32 %v2680_v9, %v5024_v0 }
 0x772   :  { %v5075_v46 = vsel %vm2710_vm2, %v5070_v50, -1e+30 }
 0x773   :  { %2737 = vmax.xlane.f32.xlu1 %v5075_v46 }
 0x777   :  { %v2683_v42 = vpop.f32.mrf.mxu1 }
 0x778   :  { %v5079_v18 = vadd.f32 %v2683_v42, %v5024_v0 }
 0x77a   :  { %v5084_v48 = vsel %vm2710_vm2, %v5079_v18, -1e+30 }
 0x77b   :  { %2739 = vmax.xlane.f32.xlu2 %v5084_v48 }
 0x77f   :  { %v2685_v20 = vpop.f32.mrf.mxu1 }
 0x780   :  { %v5088_v23 = vadd.f32 %v2685_v20, %v5024_v0 }
 0x782   :  { %v5093_v60 = vsel %vm2710_vm2, %v5088_v23, -1e+30 }
 0x783   :  { %2741 = vmax.xlane.f32.xlu0 %v5093_v60 }
 0x787   :  { %v2688_v16 = vpop.f32.mrf.mxu1 }
 0x788   :  { %v5097_v36 = vadd.f32 %v2688_v16, %v5024_v0 }
 0x78a   :  { %v5102_v11 = vsel %vm2710_vm2, %v5097_v36, -1e+30 }
 0x78b   :  { %2743 = vmax.xlane.f32.xlu1 %v5102_v11 }
 0x78f   :  { %v2690_v53 = vpop.f32.mrf.mxu1 }
 0x790   :  { %v5106_v4 = vadd.f32 %v2690_v53, %v5024_v0 }
 0x792   :  { %v5111_v61 = vsel %vm2710_vm2, %v5106_v4, -1e+30 }
 0x793   :  { %2745 = vmax.xlane.f32.xlu2 %v5111_v61 }
 0x797   :  { %v2693_v19 = vpop.f32.mrf.mxu1 }
 0x798   :  { %v5115_v29 = vadd.f32 %v2693_v19, %v5024_v0 }
 0x79a   :  { %v5120_v58 = vsel %vm2710_vm2, %v5115_v29, -1e+30 }
 0x79b   :  { %2747 = vmax.xlane.f32.xlu0 %v5120_v58 }
 0x79f   :  { %v2695_v63 = vpop.f32.mrf.mxu1 }
 0x7a0   :  { %v5124_v7 = vadd.f32 %v2695_v63, %v5024_v0 }
 0x7a2   :  { %v5129_v21 = vsel %vm2710_vm2, %v5124_v7, -1e+30 }
 0x7a3   :  { %2749 = vmax.xlane.f32.xlu1 %v5129_v21 }
 0x7a7   :  { %v2698_v1 = vpop.f32.mrf.mxu1 }
 0x7a8   :  { %v5133_v24 = vadd.f32 %v2698_v1, %v5024_v0 }
 0x7aa   :  { %v5138_v56 = vsel %vm2710_vm2, %v5133_v24, -1e+30 }
 0x7ab   :  { %2751 = vmax.xlane.f32.xlu2 %v5138_v56 }
 0x7af   :  { %v2700_v43 = vpop.f32.mrf.mxu1 }
 0x7b0   :  { %v5142_v38 = vadd.f32 %v2700_v43, %v5024_v0 }
 0x7b2   :  { %v5147_v8 = vsel %vm2710_vm2, %v5142_v38, -1e+30 }
 0x7b3   :  { %2753 = vmax.xlane.f32.xlu0 %v5147_v8 }
 0x7b7   :  { %v2703_v3 = vpop.f32.mrf.mxu1 }
 0x7b8   :  { %v5151_v59 = vadd.f32 %v2703_v3, %v5024_v0 }
 0x7ba   :  { %v5156_v31 = vsel %vm2710_vm2, %v5151_v59, -1e+30 }
 0x7bb   :  { %2755 = vmax.xlane.f32.xlu1 %v5156_v31 }
 0x7be   :  { %v2728_v39 = vpop.xlane.xlu2 %2727 }
 0x7bf   :  { %v2759_v52 = vsub.f32 %v2711_v13, %v2728_v39  ;;  %v2705_v35 = vpop.f32.mrf.mxu1 }
 0x7c0   :  { %v5160_v25 = vadd.f32 %v2705_v35, %v5024_v0 }
 0x7c1   :  { %v2775_v22 = vmul.f32 1.442695, %v2759_v52 }
 0x7c2   :  { %v5165_v51 = vsel %vm2710_vm2, %v5160_v25, -1e+30 }
 0x7c3   :  { %3247 = vpow2.f32 %v2775_v22  ;;  %2757 = vmax.xlane.f32.xlu2 %v5165_v51 }
 0x7c6   :  { %v2730_v28 = vpop.xlane.xlu0 %2729 }
 0x7c7   :  { %v2760_v55 = vsub.f32 %v5039_v30, %v2730_v28 }
 0x7c9   :  { %v3248_v37 = vpop.eup %3247  ;;  %v2777_v62 = vmul.f32 1.442695, %v2760_v55 }
 0x7ca   :  { %v5171_v40 = vsel %vm2710_vm2, %v3248_v37, 0.0 }
 0x7cb   :  { %3249 = vpow2.f32 %v2777_v62  ;;  %2823 = vadd.xlane.f32.xlu0 %v5171_v40 }
 0x7ce   :  { %v2732_v54 = vpop.xlane.xlu1 %2731 }
 0x7cf   :  { %v2761_v2 = vsub.f32 %v5048_v27, %v2732_v54 }
 0x7d1   :  { %v3250_v57 = vpop.eup %3249  ;;  %v2779_v32 = vmul.f32 1.442695, %v2761_v2 }
 0x7d2   :  { %v5177_v45 = vsel %vm2710_vm2, %v3250_v57, 0.0 }
 0x7d3   :  { %3251 = vpow2.f32 %v2779_v32  ;;  %2825 = vadd.xlane.f32.xlu1 %v5177_v45 }
 0x7d6   :  { %v2734_v34 = vpop.xlane.xlu2 %2733 }
 0x7d7   :  { %v2762_v0 = vsub.f32 %v5057_v10, %v2734_v34 }
 0x7d9   :  { %v3252_v15 = vpop.eup %3251  ;;  %v2781_v13 = vmul.f32 1.442695, %v2762_v0 }
 0x7da   :  { %v5183_v14 = vsel %vm2710_vm2, %v3252_v15, 0.0 }
 0x7db   :  { %3253 = vpow2.f32 %v2781_v13  ;;  %2827 = vadd.xlane.f32.xlu2 %v5183_v14 }
 0x7de   :  { %v2736_v30 = vpop.xlane.xlu0 %2735 }
 0x7df   :  { %v2763_v44 = vsub.f32 %v5066_v33, %v2736_v30 }
 0x7e1   :  { %v3254_v27 = vpop.eup %3253  ;;  %v2783_v47 = vmul.f32 1.442695, %v2763_v44 }
 0x7e2   :  { %v5189_v49 = vsel %vm2710_vm2, %v3254_v27, 0.0 }
 0x7e3   :  { %3255 = vpow2.f32 %v2783_v47  ;;  %2829 = vadd.xlane.f32.xlu0 %v5189_v49 }
 0x7e6   :  { %v2738_v10 = vpop.xlane.xlu1 %2737 }
 0x7e7   :  { %v2764_v9 = vsub.f32 %v5075_v46, %v2738_v10 }
 0x7e9   :  { %v3256_v42 = vpop.eup %3255  ;;  %v2785_v20 = vmul.f32 1.442695, %v2764_v9 }
 0x7ea   :  { %v5195_v16 = vsel %vm2710_vm2, %v3256_v42, 0.0 }
 0x7eb   :  { %3257 = vpow2.f32 %v2785_v20  ;;  %2831 = vadd.xlane.f32.xlu1 %v5195_v16 }
 0x7ee   :  { %v2740_v33 = vpop.xlane.xlu2 %2739 }
 0x7ef   :  { %v2765_v53 = vsub.f32 %v5084_v48, %v2740_v33 }
 0x7f1   :  { %v3258_v19 = vpop.eup %3257  ;;  %v2787_v63 = vmul.f32 1.442695, %v2765_v53 }
 0x7f2   :  { %v5201_v1 = vsel %vm2710_vm2, %v3258_v19, 0.0 }
 0x7f3   :  { %3259 = vpow2.f32 %v2787_v63  ;;  %2833 = vadd.xlane.f32.xlu2 %v5201_v1 }
 0x7f6   :  { %v2742_v46 = vpop.xlane.xlu0 %2741 }
 0x7f7   :  { %v2766_v43 = vsub.f32 %v5093_v60, %v2742_v46 }
 0x7f9   :  { %v3260_v3 = vpop.eup %3259  ;;  %v2789_v39 = vmul.f32 1.442695, %v2766_v43 }
 0x7fa   :  { %v5207_v52 = vsel %vm2710_vm2, %v3260_v3, 0.0 }
 0x7fb   :  { %3261 = vpow2.f32 %v2789_v39  ;;  %2835 = vadd.xlane.f32.xlu0 %v5207_v52 }
 0x7fe   :  { %v2744_v48 = vpop.xlane.xlu1 %2743 }
 0x7ff   :  { %v2767_v35 = vsub.f32 %v5102_v11, %v2744_v48 }
 0x801   :  { %v3262_v22 = vpop.eup %3261  ;;  %v2791_v28 = vmul.f32 1.442695, %v2767_v35 }
 0x802   :  { %v5213_v55 = vsel %vm2710_vm2, %v3262_v22, 0.0 }
 0x803   :  { %3263 = vpow2.f32 %v2791_v28  ;;  %2837 = vadd.xlane.f32.xlu1 %v5213_v55 }
 0x806   :  { %v2746_v60 = vpop.xlane.xlu2 %2745 }
 0x807   :  { %v2768_v37 = vsub.f32 %v5111_v61, %v2746_v60 }
 0x809   :  { %v3264_v62 = vpop.eup %3263  ;;  %v2793_v54 = vmul.f32 1.442695, %v2768_v37 }
 0x80a   :  { %v5219_v2 = vsel %vm2710_vm2, %v3264_v62, 0.0 }
 0x80b   :  { %3265 = vpow2.f32 %v2793_v54  ;;  %2839 = vadd.xlane.f32.xlu2 %v5219_v2 }
 0x80e   :  { %v2748_v11 = vpop.xlane.xlu0 %2747 }
 0x80f   :  { %v2769_v57 = vsub.f32 %v5120_v58, %v2748_v11 }
 0x811   :  { %v3266_v32 = vpop.eup %3265  ;;  %v2795_v34 = vmul.f32 1.442695, %v2769_v57 }
 0x812   :  { %v5225_v0 = vsel %vm2710_vm2, %v3266_v32, 0.0 }
 0x813   :  { %3267 = vpow2.f32 %v2795_v34  ;;  %2841 = vadd.xlane.f32.xlu0 %v5225_v0 }
 0x816   :  { %v2750_v61 = vpop.xlane.xlu1 %2749 }
 0x817   :  { %v2770_v15 = vsub.f32 %v5129_v21, %v2750_v61 }
 0x819   :  { %v3268_v13 = vpop.eup %3267  ;;  %v2797_v30 = vmul.f32 1.442695, %v2770_v15 }
 0x81a   :  { %v5231_v44 = vsel %vm2710_vm2, %v3268_v13, 0.0 }
 0x81b   :  { %3269 = vpow2.f32 %v2797_v30  ;;  %2843 = vadd.xlane.f32.xlu1 %v5231_v44 }
 0x81e   :  { %v2752_v58 = vpop.xlane.xlu2 %2751 }
 0x81f   :  { %v2771_v27 = vsub.f32 %v5138_v56, %v2752_v58 }
 0x821   :  { %v3270_v47 = vpop.eup %3269  ;;  %v2799_v10 = vmul.f32 1.442695, %v2771_v27 }
 0x822   :  { %v5237_v9 = vsel %vm2710_vm2, %v3270_v47, 0.0 }
 0x823   :  { %3271 = vpow2.f32 %v2799_v10  ;;  %2845 = vadd.xlane.f32.xlu2 %v5237_v9 }
 0x826   :  { %v2754_v21 = vpop.xlane.xlu0 %2753 }
 0x827   :  { %v2772_v42 = vsub.f32 %v5147_v8, %v2754_v21 }
 0x829   :  { %v3272_v20 = vpop.eup %3271  ;;  %v2801_v33 = vmul.f32 1.442695, %v2772_v42 }
 0x82a   :  { %v5243_v53 = vsel %vm2710_vm2, %v3272_v20, 0.0 }
 0x82b   :  { %3273 = vpow2.f32 %v2801_v33  ;;  %2847 = vadd.xlane.f32.xlu0 %v5243_v53 }
 0x82e   :  { %v2756_v56 = vpop.xlane.xlu1 %2755 }
 0x82f   :  { %v2773_v19 = vsub.f32 %v5156_v31, %v2756_v56 }
 0x831   :  { %v3274_v63 = vpop.eup %3273  ;;  %v2803_v46 = vmul.f32 1.442695, %v2773_v19 }
 0x832   :  { %v5249_v43 = vsel %vm2710_vm2, %v3274_v63, 0.0 }
 0x833   :  { %3275 = vpow2.f32 %v2803_v46  ;;  %2849 = vadd.xlane.f32.xlu1 %v5249_v43 }
 0x836   :  { %v2758_v8 = vpop.xlane.xlu2 %2757 }
 0x837   :  { %v2774_v3 = vsub.f32 %v5165_v51, %v2758_v8 }
 0x839   :  { %v3276_v39 = vpop.eup %3275  ;;  %v2805_v48 = vmul.f32 1.442695, %v2774_v3 }
 0x83a   :  { %v5255_v35 = vsel %vm2710_vm2, %v3276_v39, 0.0 }
 0x83b   :  { %3277 = vpow2.f32 %v2805_v48  ;;  %2851 = vadd.xlane.f32.xlu2 %v5255_v35 }
 0x83e   :  { %v2824_v31 = vpop.xlane.xlu0 %2823 }
 0x83f   :  { %3279 = vrcp.f32 %v2824_v31 }
 0x841   :  { %v3278_v22 = vpop.eup %3277 }
 0x842   :  { %v5260_v28 = vsel %vm2710_vm2, %v3278_v22, 0.0 }
 0x843   :  { %2853 = vadd.xlane.f32.xlu0 %v5260_v28 }
 0x845   :  { %v3280_v60 = vpop.eup %3279 }
 0x846   :  { %v2871_v51 = vmul.f32 %v3280_v60, %v5171_v40  ;;  %v2826_v37 = vpop.xlane.xlu1 %2825 }
 0x847   :  { %3281 = vrcp.f32 %v2826_v37 }
 0x848   :  { %v2887_v62 = vsel %vm2710_vm2, %v2871_v51, %v5028_v17 }
 0x849   :  { %2903 = vst [vmem:[#allocation2] sm:$0xff] %v2887_v62 }
 0x84d   :  { %v3282_v54 = vpop.eup %3281 }
 0x84e   :  { %v2872_v11 = vmul.f32 %v3282_v54, %v5177_v45  ;;  %v2828_v57 = vpop.xlane.xlu2 %2827 }
 0x84f   :  { %3283 = vrcp.f32 %v2828_v57 }
 0x850   :  { %v2888_v32 = vsel %vm2710_vm2, %v2872_v11, %v5034_v12 }
 0x851   :  { %2904 = vst [vmem:[#allocation2 + $0x8] sm:$0xff] %v2888_v32 }
 0x855   :  { %v3284_v34 = vpop.eup %3283 }
 0x856   :  { %v2873_v40 = vmul.f32 %v3284_v34, %v5183_v14  ;;  %v2830_v61 = vpop.xlane.xlu0 %2829 }
 0x857   :  { %3285 = vrcp.f32 %v2830_v61 }
 0x858   :  { %v2889_v17 = vsel %vm2710_vm2, %v2873_v40, %v5043_v6 }
 0x859   :  { %2905 = vst [vmem:[#allocation2 + $0x10] sm:$0xff] %v2889_v17 }
 0x85d   :  { %v3286_v15 = vpop.eup %3285 }
 0x85e   :  { %v2874_v45 = vmul.f32 %v3286_v15, %v5189_v49  ;;  %v2832_v13 = vpop.xlane.xlu1 %2831 }
 0x85f   :  { %3287 = vrcp.f32 %v2832_v13 }
 0x860   :  { %v2890_v12 = vsel %vm2710_vm2, %v2874_v45, %v5052_v26 }
 0x861   :  { %2906 = vst [vmem:[#allocation2 + $0x18] sm:$0xff] %v2890_v12 }
 0x865   :  { %v3288_v30 = vpop.eup %3287 }
 0x866   :  { %v2875_v14 = vmul.f32 %v3288_v30, %v5195_v16  ;;  %v2834_v58 = vpop.xlane.xlu2 %2833 }
 0x867   :  { %3289 = vrcp.f32 %v2834_v58 }
 0x868   :  { %v2891_v6 = vsel %vm2710_vm2, %v2875_v14, %v5061_v41 }
 0x869   :  { %2907 = vst [vmem:[#allocation2 + $0x20] sm:$0xff] %v2891_v6 }
 0x86d   :  { %v3290_v27 = vpop.eup %3289 }
 0x86e   :  { %v2876_v49 = vmul.f32 %v3290_v27, %v5201_v1  ;;  %v2836_v47 = vpop.xlane.xlu0 %2835 }
 0x86f   :  { %3291 = vrcp.f32 %v2836_v47 }
 0x870   :  { %v2892_v26 = vsel %vm2710_vm2, %v2876_v49, %v5070_v50 }
 0x871   :  { %2908 = vst [vmem:[#allocation2 + $0x28] sm:$0xff] %v2892_v26 }
 0x875   :  { %v3292_v10 = vpop.eup %3291 }
 0x876   :  { %v2877_v16 = vmul.f32 %v3292_v10, %v5207_v52  ;;  %v2838_v21 = vpop.xlane.xlu1 %2837 }
 0x877   :  { %3293 = vrcp.f32 %v2838_v21 }
 0x878   :  { %v2893_v41 = vsel %vm2710_vm2, %v2877_v16, %v5079_v18 }
 0x879   :  { %2909 = vst [vmem:[#allocation2 + $0x30] sm:$0xff] %v2893_v41 }
 0x87d   :  { %v3294_v42 = vpop.eup %3293 }
 0x87e   :  { %v2878_v1 = vmul.f32 %v3294_v42, %v5213_v55  ;;  %v2840_v20 = vpop.xlane.xlu2 %2839 }
 0x87f   :  { %3295 = vrcp.f32 %v2840_v20 }
 0x880   :  { %v2894_v50 = vsel %vm2710_vm2, %v2878_v1, %v5088_v23 }
 0x881   :  { %2910 = vst [vmem:[#allocation2 + $0x38] sm:$0xff] %v2894_v50 }
 0x885   :  { %v3296_v33 = vpop.eup %3295 }
 0x886   :  { %v2879_v52 = vmul.f32 %v3296_v33, %v5219_v2  ;;  %v2842_v56 = vpop.xlane.xlu0 %2841 }
 0x887   :  { %3297 = vrcp.f32 %v2842_v56 }
 0x888   :  { %v2895_v18 = vsel %vm2710_vm2, %v2879_v52, %v5097_v36 }
 0x889   :  { %2911 = vst [vmem:[#allocation2 + $0x40] sm:$0xff] %v2895_v18 }
 0x88d   :  { %v3298_v19 = vpop.eup %3297 }
 0x88e   :  { %v2880_v55 = vmul.f32 %v3298_v19, %v5225_v0  ;;  %v2844_v63 = vpop.xlane.xlu1 %2843 }
 0x88f   :  { %3299 = vrcp.f32 %v2844_v63 }
 0x890   :  { %v2896_v23 = vsel %vm2710_vm2, %v2880_v55, %v5106_v4 }
 0x891   :  { %2912 = vst [vmem:[#allocation2 + $0x48] sm:$0xff] %v2896_v23 }
 0x895   :  { %v3300_v46 = vpop.eup %3299 }
 0x896   :  { %v2881_v2 = vmul.f32 %v3300_v46, %v5231_v44  ;;  %v2846_v8 = vpop.xlane.xlu2 %2845 }
 0x897   :  { %3301 = vrcp.f32 %v2846_v8 }
 0x898   :  { %v2897_v36 = vsel %vm2710_vm2, %v2881_v2, %v5115_v29 }
 0x899   :  { %2913 = vst [vmem:[#allocation2 + $0x50] sm:$0xff] %v2897_v36 }
 0x89d   :  { %v3302_v3 = vpop.eup %3301 }
 0x89e   :  { %v2882_v0 = vmul.f32 %v3302_v3, %v5237_v9  ;;  %v2848_v39 = vpop.xlane.xlu0 %2847 }
 0x89f   :  { %3303 = vrcp.f32 %v2848_v39 }
 0x8a0   :  { %v2898_v4 = vsel %vm2710_vm2, %v2882_v0, %v5124_v7 }
 0x8a1   :  { %2914 = vst [vmem:[#allocation2 + $0x58] sm:$0xff] %v2898_v4 }
 0x8a5   :  { %v3304_v48 = vpop.eup %3303 }
 0x8a6   :  { %v2883_v44 = vmul.f32 %v3304_v48, %v5243_v53  ;;  %v2850_v31 = vpop.xlane.xlu1 %2849 }
 0x8a7   :  { %3305 = vrcp.f32 %v2850_v31 }
 0x8a8   :  { %v2899_v29 = vsel %vm2710_vm2, %v2883_v44, %v5133_v24 }
 0x8a9   :  { %2915 = vst [vmem:[#allocation2 + $0x60] sm:$0xff] %v2899_v29 }
 0x8ad   :  { %v3306_v22 = vpop.eup %3305 }
 0x8ae   :  { %v2884_v9 = vmul.f32 %v3306_v22, %v5249_v43  ;;  %v2852_v60 = vpop.xlane.xlu2 %2851 }
 0x8af   :  { %3307 = vrcp.f32 %v2852_v60 }
 0x8b0   :  { %v2900_v7 = vsel %vm2710_vm2, %v2884_v9, %v5142_v38 }
 0x8b1   :  { %2916 = vst [vmem:[#allocation2 + $0x68] sm:$0xff] %v2900_v7 }
 0x8b5   :  { %v3308_v51 = vpop.eup %3307 }
 0x8b6   :  { %v2885_v53 = vmul.f32 %v3308_v51, %v5255_v35  ;;  %v2854_v37 = vpop.xlane.xlu0 %2853 }
 0x8b7   :  { %3309 = vrcp.f32 %v2854_v37 }
 0x8b8   :  { %v2901_v24 = vsel %vm2710_vm2, %v2885_v53, %v5151_v59 }
 0x8b9   :  { %2917 = vst [vmem:[#allocation2 + $0x70] sm:$0xff] %v2901_v24 }
 0x8bd   :  { %v3310_v43 = vpop.eup %3309 }
 0x8be   :  { %v2886_v38 = vmul.f32 %v3310_v43, %v5260_v28 }
 0x8c0   :  { %v2902_v35 = vsel %vm2710_vm2, %v2886_v38, %v5160_v25 }
 0x8c1   :  { %2918 = vst [vmem:[#allocation2 + $0x78] sm:$0xff] %v2902_v35 }
 0x8c2   :  { %2931 = dma.vmem_to_hbm [thread:$0]  %s2924_s14, 2048, %s2926_s16, [#allocation3], %s3342_s17, %s3342_s17, %s3343_s18  }
 0x8c3   :  { %3338 = dma.done.wait [#allocation3], 2048  }
 0x8c4   :  { %3339 = vsyncadd [#allocation3], 4294965248 }
 0x8c5   :  { %2936 = vsyncpa [#allocation3], 1 }

</bundles_post_ra>
